<compile_context>
chip_gen: v7x
topology: tpu7x:2x2x1
jax: 0.10.0
libtpu: 0.0.40
codegen_flags: <defaults>
</compile_context>

<pallas_src>
import functools

import jax
import jax.numpy as jnp
from jax.experimental import pallas as pl
from jax.experimental.pallas import tpu as pltpu


# ---------------------------------------------------------------------------
# Kernels
# ---------------------------------------------------------------------------
def _ffn_resident_kernel(x_ref, w1_ref, b1_ref, w2_ref, b2_ref, o_ref):
    """Weights resident in VMEM: one fused FFN pass per row tile."""
    x = x_ref[...]
    h = jnp.dot(x, w1_ref[...], preferred_element_type=jnp.float32)
    h = h + b1_ref[...].astype(jnp.float32)
    h = jnp.maximum(h, 0.0)  # ReLU (forward hardcodes F.relu regardless of atv_fun)
    # TODO(synk): training-mode dropout (pltpu.prng_seed + stateful_bernoulli) not
    # implemented; eval-mode dropout is identity.
    y = jnp.dot(h.astype(w2_ref.dtype), w2_ref[...],
                preferred_element_type=jnp.float32)
    y = y + b2_ref[...].astype(jnp.float32)
    o_ref[...] = y.astype(o_ref.dtype)


def _ffn_streaming_kernel(x_ref, w1_ref, b1_ref, w2_ref, b2_ref, o_ref, acc_ref):
    """d_ff streamed as innermost (reduction) grid axis with an f32 accumulator."""
    k = pl.program_id(1)

    @pl.when(k == 0)
    def _():
        # Fold the second bias into the accumulator init (saves a VPU pass later).
        acc_ref[...] = jnp.broadcast_to(
            b2_ref[...].astype(jnp.float32), acc_ref.shape
        )

    h = jnp.dot(x_ref[...], w1_ref[...], preferred_element_type=jnp.float32)
    h = h + b1_ref[...].astype(jnp.float32)
    h = jnp.maximum(h, 0.0)
    acc_ref[...] += jnp.dot(h.astype(w2_ref.dtype), w2_ref[...],
                            preferred_element_type=jnp.float32)

    @pl.when(k == pl.num_programs(1) - 1)
    def _():
        o_ref[...] = acc_ref[...].astype(o_ref.dtype)


# ---------------------------------------------------------------------------
# Tiling / budget helpers
# ---------------------------------------------------------------------------
def _round_up(x, n):
    return (x + n - 1) // n * n


def _vmem_budget_bytes():
    """Per-generation usable VMEM budget (headroom for Mosaic internal scratch)."""
    cap = 128 << 20
    try:
        cap = int(pltpu.get_tpu_info().vmem_capacity_bytes)
    except Exception:  # pragma: no cover - query unavailable -> conservative default
        pass
    if cap <= (64 << 20):
        # v7x-class: 64 MiB physical per TC -> leave ~12 MiB of headroom.
        return (cap * 13) // 16
    # v5e / v6e: 128 MiB physical -> use up to ~104 MiB.
    return min((cap * 13) // 16, 108 << 20)


def _resident_vmem_bytes(tm, d_model, d_ff, x_isz, w_isz, o_isz):
    return (2 * x_isz * tm * d_model                               # x tile (dbl-buf)
            + 2 * o_isz * tm * d_model                             # out tile (dbl-buf)
            + 2 * w_isz * (2 * d_model * d_ff + d_ff + d_model)    # W1,b1,W2,b2 (worst case 2 bufs)
            + 4 * tm * d_ff                                        # f32 hidden intermediate
            + 4 * tm * d_model)                                    # f32 second-matmul result


def _streaming_vmem_bytes(tm, tk, d_model, d_ff, x_isz, w_isz, o_isz):
    return (2 * x_isz * tm * d_model                               # x tile
            + 2 * o_isz * tm * d_model                             # out tile
            + 2 * w_isz * (d_model * tk + tk)                      # W1 k-slab + b1 slab
            + 2 * w_isz * (tk * d_model + d_model)                 # W2 k-slab + b2
            + 4 * tm * tk                                          # f32 hidden intermediate
            + 4 * tm * d_model)                                    # f32 accumulator scratch


_TM_CANDIDATES = (1024, 768, 512, 384, 256, 192, 128, 64, 32, 16)


def _pick_tm(m_r, fits):
    """Largest row tile (mult. of 16) that fits the budget, preferring >=2 row tiles."""
    cands = [t for t in _TM_CANDIDATES if t <= m_r] or [m_r]
    fitting = [t for t in cands if fits(t)] or [cands[-1]]
    for t in fitting:  # descending
        if m_r // t >= 2 or t <= 128:
            return t
    return fitting[-1]


def _pick_tk(d_ff, d_model, tm, w_isz, budget):
    """Reduction tile: slabs + hidden intermediate bounded by ~half the budget."""
    if d_ff % 128 != 0:
        return d_ff  # block must equal full dim when not 128-aligned
    per_tk = 4 * d_model * w_isz + 4 * tm   # dbl-buffered W1+W2 slabs + f32 hidden
    tk_max = max(128, (budget // 2) // per_tk)
    for gran in (256, 128):                 # 256-granular keeps v6e/v7x MXU fully fed
        tk = int(min(tk_max, d_ff))
        tk -= tk % gran
        while tk >= gran and d_ff % tk != 0:
            tk -= gran
        if tk >= gran and d_ff % tk == 0:
            return tk
    return d_ff


# ---------------------------------------------------------------------------
# Host wrapper
# ---------------------------------------------------------------------------
@functools.partial(jax.jit, static_argnames=("tm", "tk"))
def pos_wise_ff(x, w1, b1, w2, b2, *, tm=None, tk=None):
    """x: (batch, seq, d_model). Returns same shape/dtype. Eval-mode FFN."""
    batch, seq, d_model = x.shape
    d_ff = w1.shape[1]
    m = batch * seq
    x2d = x.reshape(m, d_model)

    x_isz = jnp.dtype(x.dtype).itemsize
    w_isz = jnp.dtype(w1.dtype).itemsize
    o_isz = x_isz
    budget = _vmem_budget_bytes()
    m_r = _round_up(m, 16)

    b1_2d = b1.reshape(1, d_ff)
    b2_2d = b2.reshape(1, d_model)
    w_bytes_once = w_isz * (2 * d_model * d_ff + d_ff + d_model)

    def resident_fits(t):
        return _resident_vmem_bytes(t, d_model, d_ff, x_isz, w_isz, o_isz) <= budget

    probe_tm = tm if tm is not None else min(128, m_r)
    use_resident = (tk is None) and resident_fits(probe_tm)

    if use_resident:
        # ---------------- Weight-resident schedule ----------------
        if tm is None:
            tm = _pick_tm(m_r, resident_fits)
        m_pad = _round_up(m, tm)
        if m_pad != m:
            x2d = jnp.pad(x2d, ((0, m_pad - m), (0, 0)))
        n_row = m_pad // tm

        vmem_est = _resident_vmem_bytes(tm, d_model, d_ff, x_isz, w_isz, o_isz)
        vmem_limit = int(min(max(vmem_est + (8 << 20), 32 << 20), budget))

        cost = pl.CostEstimate(
            flops=int(4 * m_pad * d_model * d_ff),
            transcendentals=0,
            bytes_accessed=int(x_isz * m_pad * d_model
                               + o_isz * m_pad * d_model
                               + w_bytes_once),
        )

        out2d = pl.pallas_call(
            _ffn_resident_kernel,
            out_shape=jax.ShapeDtypeStruct((m_pad, d_model), x.dtype),
            grid_spec=pltpu.PrefetchScalarGridSpec(
                num_scalar_prefetch=0,
                grid=(n_row,),
                in_specs=[
                    pl.BlockSpec((tm, d_model), lambda i: (i, 0)),    # x row tile
                    pl.BlockSpec((d_model, d_ff), lambda i: (0, 0)),  # W1 (resident)
                    pl.BlockSpec((1, d_ff), lambda i: (0, 0)),        # b1 (resident)
                    pl.BlockSpec((d_ff, d_model), lambda i: (0, 0)),  # W2 (resident)
                    pl.BlockSpec((1, d_model), lambda i: (0, 0)),     # b2 (resident)
                ],
                out_specs=pl.BlockSpec((tm, d_model), lambda i: (i, 0)),
            ),
            compiler_params=pltpu.CompilerParams(
                dimension_semantics=("parallel",),
                vmem_limit_bytes=vmem_limit,
            ),
            cost_estimate=cost,
        )(x2d, w1, b1_2d, w2, b2_2d)
    else:
        # ---------------- Weight-streaming schedule (fallback) ----------------
        if tm is None:
            tk_probe = min(512, d_ff)
            tm = _pick_tm(
                m_r,
                lambda t: _streaming_vmem_bytes(
                    t, tk_probe, d_model, d_ff, x_isz, w_isz, o_isz) <= budget,
            )
        if tk is None:
            tk = _pick_tk(d_ff, d_model, tm, w_isz, budget)
        assert d_ff % tk == 0

        m_pad = _round_up(m, tm)
        if m_pad != m:
            x2d = jnp.pad(x2d, ((0, m_pad - m), (0, 0)))
        n_row = m_pad // tm

        vmem_est = _streaming_vmem_bytes(tm, tk, d_model, d_ff, x_isz, w_isz, o_isz)
        vmem_limit = int(min(max(vmem_est + (8 << 20), 32 << 20), budget))

        cost = pl.CostEstimate(
            flops=int(4 * m_pad * d_model * d_ff),
            transcendentals=0,
            bytes_accessed=int(x_isz * m_pad * d_model
                               + o_isz * m_pad * d_model
                               + n_row * w_bytes_once),   # weights re-streamed per row tile
        )

        out2d = pl.pallas_call(
            _ffn_streaming_kernel,
            out_shape=jax.ShapeDtypeStruct((m_pad, d_model), x.dtype),
            grid_spec=pltpu.PrefetchScalarGridSpec(
                num_scalar_prefetch=0,
                grid=(n_row, d_ff // tk),
                in_specs=[
                    pl.BlockSpec((tm, d_model), lambda i, k: (i, 0)),   # x row tile
                    pl.BlockSpec((d_model, tk), lambda i, k: (0, k)),   # W1 k-slab
                    pl.BlockSpec((1, tk), lambda i, k: (0, k)),         # b1 k-slab
                    pl.BlockSpec((tk, d_model), lambda i, k: (k, 0)),   # W2 k-slab
                    pl.BlockSpec((1, d_model), lambda i, k: (0, 0)),    # b2
                ],
                out_specs=pl.BlockSpec((tm, d_model), lambda i, k: (i, 0)),
                scratch_shapes=[pltpu.VMEM((tm, d_model), jnp.float32)],
            ),
            compiler_params=pltpu.CompilerParams(
                dimension_semantics=("parallel", "arbitrary"),
                vmem_limit_bytes=vmem_limit,
            ),
            cost_estimate=cost,
        )(x2d, w1, b1_2d, w2, b2_2d)

    if m_pad != m:
        out2d = out2d[:m]
    return out2d.reshape(batch, seq, d_model)


def init_params(key, d_model, d_ff, dtype=jnp.float32):
    """Deterministic init mimicking nn.Linear default (U[-1/sqrt(fan_in), 1/sqrt(fan_in)])."""
    k1, k2, k3, k4 = jax.random.split(key, 4)
    bound1 = 1.0 / (d_model ** 0.5)
    bound2 = 1.0 / (d_ff ** 0.5)
    w1 = jax.random.uniform(k1, (d_model, d_ff), dtype, -bound1, bound1)
    b1 = jax.random.uniform(k2, (d_ff,), dtype, -bound1, bound1)
    w2 = jax.random.uniform(k3, (d_ff, d_model), dtype, -bound2, bound2)
    b2 = jax.random.uniform(k4, (d_model,), dtype, -bound2, bound2)
    return w1, b1, w2, b2


if __name__ == "__main__":
    # Small but tile-exercising config: m = batch*seq = 512 -> 2 row tiles,
    # d_ff = 1024 -> weights (1 MiB f32) trivially VMEM-resident.
    d_model, d_ff = 128, 1024
    batch, seq = 2, 256

    key = jax.random.PRNGKey(0)
    kx, kp = jax.random.split(key)
    x = jax.random.normal(kx, (batch, seq, d_model), jnp.float32)
    w1, b1, w2, b2 = init_params(kp, d_model, d_ff)

    out = pos_wise_ff(x, w1, b1, w2, b2)
    out = jax.block_until_ready(out)

    # Pure-JAX reference check (eval-mode dropout = identity).
    h_ref = jnp.maximum(jnp.dot(x, w1, precision="highest") + b1, 0.0)
    ref = jnp.dot(h_ref, w2, precision="highest") + b2
    assert out.shape == x.shape
    assert jnp.allclose(out, ref, atol=1e-3, rtol=1e-3), "mismatch vs reference"

    print("KERNEL_OK")
</pallas_src>

<mosaic_0001>
module attributes {stable_mosaic.version = 11 : i64} {
  func.func @_ffn_resident_kernel(%arg0: i32, %arg1: memref<256x128xf32, #tpu.memory_space<vmem>>, %arg2: memref<128x1024xf32, #tpu.memory_space<vmem>>, %arg3: memref<1x1024xf32, #tpu.memory_space<vmem>>, %arg4: memref<1024x128xf32, #tpu.memory_space<vmem>>, %arg5: memref<1x128xf32, #tpu.memory_space<vmem>>, %arg6: memref<256x128xf32, #tpu.memory_space<vmem>>) attributes {dimension_semantics = [#tpu.dimension_semantics<parallel>], iteration_bounds = array<i64: 2>, scalar_prefetch = 0 : i64, scratch_operands = 0 : i64, tpu.core_type = #tpu.core_type<tc>, window_params = [{transform_indices = @transform_0, window_bounds = array<i64: 256, 128>}, {pipeline_mode = #tpu.pipeline_mode<synchronous>, transform_indices = @transform_1, window_bounds = array<i64: 128, 1024>}, {pipeline_mode = #tpu.pipeline_mode<synchronous>, transform_indices = @transform_2, window_bounds = array<i64: 1, 1024>}, {pipeline_mode = #tpu.pipeline_mode<synchronous>, transform_indices = @transform_3, window_bounds = array<i64: 1024, 128>}, {pipeline_mode = #tpu.pipeline_mode<synchronous>, transform_indices = @transform_4, window_bounds = array<i64: 1, 128>}, {transform_indices = @transform_5, window_bounds = array<i64: 256, 128>}]} {
    %c0 = arith.constant 0 : index
    %c0_0 = arith.constant 0 : index
    %0 = vector.load %arg1[%c0, %c0_0] : memref<256x128xf32, #tpu.memory_space<vmem>>, vector<256x128xf32>
    %c0_1 = arith.constant 0 : index
    %c0_2 = arith.constant 0 : index
    %1 = vector.load %arg2[%c0_1, %c0_2] : memref<128x1024xf32, #tpu.memory_space<vmem>>, vector<128x1024xf32>
    %cst = arith.constant dense<0.000000e+00> : vector<256x1024xf32>
    %2 = tpu.matmul %0, %1, %cst {dimension_numbers = #tpu.dot_dimension_numbers<[1], [0], [0], [1], [0, 0, 1, 1], [], []>} : vector<256x128xf32>, vector<128x1024xf32>, vector<256x1024xf32> -> vector<256x1024xf32>
    %c0_3 = arith.constant 0 : index
    %c0_4 = arith.constant 0 : index
    %3 = vector.load %arg3[%c0_3, %c0_4] : memref<1x1024xf32, #tpu.memory_space<vmem>>, vector<1x1024xf32>
    %4 = vector.broadcast %3 : vector<1x1024xf32> to vector<256x1024xf32>
    %5 = arith.addf %2, %4 : vector<256x1024xf32>
    %cst_5 = arith.constant 0.000000e+00 : f32
    %6 = vector.broadcast %cst_5 : f32 to vector<256x1024xf32>
    %7 = arith.maximumf %5, %6 : vector<256x1024xf32>
    %c0_6 = arith.constant 0 : index
    %c0_7 = arith.constant 0 : index
    %8 = vector.load %arg4[%c0_6, %c0_7] : memref<1024x128xf32, #tpu.memory_space<vmem>>, vector<1024x128xf32>
    %cst_8 = arith.constant dense<0.000000e+00> : vector<256x128xf32>
    %9 = tpu.matmul %7, %8, %cst_8 {dimension_numbers = #tpu.dot_dimension_numbers<[1], [0], [0], [1], [0, 0, 1, 1], [], []>} : vector<256x1024xf32>, vector<1024x128xf32>, vector<256x128xf32> -> vector<256x128xf32>
    %c0_9 = arith.constant 0 : index
    %c0_10 = arith.constant 0 : index
    %10 = vector.load %arg5[%c0_9, %c0_10] : memref<1x128xf32, #tpu.memory_space<vmem>>, vector<1x128xf32>
    %11 = vector.broadcast %10 : vector<1x128xf32> to vector<256x128xf32>
    %12 = arith.addf %9, %11 : vector<256x128xf32>
    %c0_11 = arith.constant 0 : index
    %c0_12 = arith.constant 0 : index
    %13 = vector.load %arg6[%c0_11, %c0_12] : memref<256x128xf32, #tpu.memory_space<vmem>>, vector<256x128xf32>
    tpu.vector_store %arg6[%c0_11, %c0_12], %12 {strides = array<i32>} : memref<256x128xf32, #tpu.memory_space<vmem>>, vector<256x128xf32>,
    return
  }
  func.func @transform_0(%arg0: i32) -> (i32, i32) {
    %c0_i32 = arith.constant 0 : i32
    %c0_i32_0 = arith.constant 0 : i32
    return %arg0, %c0_i32 : i32, i32
  }
  func.func @transform_1(%arg0: i32) -> (i32, i32) {
    %c0_i32 = arith.constant 0 : i32
    %c0_i32_0 = arith.constant 0 : i32
    %c0_i32_1 = arith.constant 0 : i32
    return %c0_i32, %c0_i32_0 : i32, i32
  }
  func.func @transform_2(%arg0: i32) -> (i32, i32) {
    %c0_i32 = arith.constant 0 : i32
    %c0_i32_0 = arith.constant 0 : i32
    %c0_i32_1 = arith.constant 0 : i32
    return %c0_i32, %c0_i32_0 : i32, i32
  }
  func.func @transform_3(%arg0: i32) -> (i32, i32) {
    %c0_i32 = arith.constant 0 : i32
    %c0_i32_0 = arith.constant 0 : i32
    %c0_i32_1 = arith.constant 0 : i32
    return %c0_i32, %c0_i32_0 : i32, i32
  }
  func.func @transform_4(%arg0: i32) -> (i32, i32) {
    %c0_i32 = arith.constant 0 : i32
    %c0_i32_0 = arith.constant 0 : i32
    %c0_i32_1 = arith.constant 0 : i32
    return %c0_i32, %c0_i32_0 : i32, i32
  }
  func.func @transform_5(%arg0: i32) -> (i32, i32) {
    %c0_i32 = arith.constant 0 : i32
    %c0_i32_0 = arith.constant 0 : i32
    return %arg0, %c0_i32 : i32, i32
  }
}

</mosaic_0001>

<bundles_post_ra>
// kernel: pos_wise_ff.1
= control target key start
LH: loop header
LB: loop body
LE: loop exit
PB: predicated region body
PF: predicated region fallthrough
CT: control target
= control target key end

     0   :  { %10 = vsyncpa [#allocation3], 0  ;;  %s5477_s0 = inlined_call_operand.hbm [shape: f32[512,128], index: 0, kind: input, shape index: {}]   ;;  %s5478_s1 = inlined_call_operand.hbm [shape: f32[128,1024], index: 1, kind: input, shape index: {}]   ;;  %s5479_s2 = inlined_call_operand.vmem [shape: f32[1,1024], index: 2, kind: input, shape index: {}]   ;;  %s5480_s3 = inlined_call_operand.hbm [shape: f32[1024,128], index: 3, kind: input, shape index: {}]   ;;  %s5481_s4 = inlined_call_operand.vmem [shape: f32[1,128], index: 4, kind: input, shape index: {}]   ;;  %s5482_s5 = inlined_call_operand.hbm [shape: f32[512,128], index: 5, kind: output, shape index: {}]  }
   0x1   :  { %12 = vsyncpa [#allocation3 + $0x1], 0 }
   0x2   :  { %13 = vsyncpa [#allocation6], 0 }
   0x3   :  { %14 = vsyncpa [#allocation4], 0 }
   0x4   :  { %16 = vsyncpa [#allocation4 + $0x1], 0  ;;  %s3771_s18 = smov 0   ;;  %s3773_s19 = smov 0  }
   0x5   :  { %s3775_s20 = smov 0   ;;  %s3777_s21 = smov 0  }
   0x6 LB: > { %s3792_s22 = sadd.s32 4294967295, %s3727_s21   ;;  %s2933_s23 = sadd.s32 4294967294, %s3727_s21   ;;  %s3727_s21 = sphi %s3777_s21, %s5670_s21   ;;  %s3723_s20 = sphi %s3775_s20, %s5669_s20   ;;  %s3719_s19 = sphi %s3773_s19, %s5668_s19   ;;  %s3715_s18 = sphi %s3771_s18, %s5667_s18  }
   0x7   : > { %p42_p0 = scmp.ne.s32.totalorder %s3719_s19, %s3715_s18  ;;  %p5483_p1 = scmp.eq.s32.totalorder %s3792_s22, 0 }
   0x8   : > { %p156_p3 = scmp.eq.s32.totalorder %s2933_s23, 1  ;;  %p2934_p5 = scmp.ge.s32.totalorder %s3727_s21, 1 }
   0x9   : > { %p3801_p4 = por %p5483_p1, %p42_p0  ;;  %p163_p7 = scmp.lt.s32.totalorder %s3727_s21, 3 }
   0xa   : > { %p3806_p6 = por %p156_p3, %p42_p0  ;;  %s3729_s27 = smov [#allocation5]  }
   0xb   : > { %s5492_s24 = scalar_select %p3801_p4, 1, 0 }
   0xc   : > { %s5493_s25 = scalar_select %p3806_p6, 1, 0 }
   0xd   : > { %p3811_p8 = pnand %p2934_p5, %p163_p7  ;;  %s175_s28 = sshll.u32 %s3729_s27, 4  ;;  %s3815_s28 = int_to_ptr.vmem [resolvable:$true] %s175_s28 }
   0xe   : > { %s3730_s30 = smov [#allocation7]   ;;  %s3571_s9 = scalar_lea.hbm %s5478_s1, 16384 }
   0xf   : > { %p3478_p9 = pneg %p3811_p8  ;;  %s191_s6 = sshll.u32 %s3730_s30, 4  ;;  %s3826_s6 = int_to_ptr.vmem [resolvable:$true] %s191_s6 }
  0x10   : > { %p3572_p12 = scmp.ne.s32.totalorder %s5478_s1, %s3571_s9  ;;  %p3578_p5 = scmp.lt.u32.totalorder %s3571_s9, %s5478_s1 }
  0x11   : > { %p3822_p11 = pnand %p3478_p9, %p5483_p1 }
  0x13   : > { %p3573_p13 = pneg %p3822_p11 }
  0x15   : > { %p3574_p0 = pnand %p3573_p13, %p3572_p12 }
  0x17   : > { %p3575_p3 = pneg %p3574_p0 }
  0x19   : > { %p3580_p7 = pnand %p3578_p5, %p3575_p3 }
  0x1b   : > { %3583 = shalt.err (!%p3580_p7)
}
  0x1c   : > { %s3584_s14 = scalar_lea.vmem %s3815_s28, 16384  ;;  %p3592_p2 = scmp.lt.s32.totalorder %s3815_s28, %s3815_s28 }
  0x1d   : > { %p3585_p9 = scmp.ne.s32.totalorder %s3815_s28, %s3584_s14  ;;  %p3593_p12 = scmp.lt.s32.totalorder %s3584_s14, %s3584_s14 }
  0x1f   : > { %p3587_p10 = pnand %p3585_p9, %p3573_p13  ;;  %p3594_p0 = por %p3593_p12, %p3592_p2 }
  0x21   : > { %p3588_p1 = pneg %p3587_p10 }
  0x23   : > { %p3595_p6 = pnand %p3594_p0, %p3588_p1 }
  0x25   : > { %3598 = shalt.err (!%p3595_p6)
}
  0x26   : > { %s3731_s15 = smov 1024   ;;  %s3732_s16 = smov 64  }
  0x27   : > { %3481 = dma.hbm_to_vmem [thread:$0]  (!%p3822_p11), %s5478_s1, 16384, %s3815_s28, [#allocation6], %s3731_s15, %s3731_s15, %s3732_s16  }
  0x28   : > { %s3599_s7 = scalar_lea.hbm %s5480_s3, 16384 }
  0x29   : > { %p3600_p2 = scmp.ne.s32.totalorder %s5480_s3, %s3599_s7  ;;  %p3606_p10 = scmp.lt.u32.totalorder %s3599_s7, %s5480_s3 }
  0x2b   : > { %p3602_p1 = pnand %p3600_p2, %p3573_p13 }
  0x2d   : > { %p3603_p6 = pneg %p3602_p1 }
  0x2f   : > { %p3608_p3 = pnand %p3606_p10, %p3603_p6 }
  0x31   : > { %3611 = shalt.err (!%p3608_p3)
}
  0x32   : > { %s3612_s28 = scalar_lea.vmem %s3826_s6, 16384  ;;  %p3620_p12 = scmp.lt.s32.totalorder %s3826_s6, %s3826_s6 }
  0x33   : > { %p3613_p5 = scmp.ne.s32.totalorder %s3826_s6, %s3612_s28  ;;  %p3621_p0 = scmp.lt.s32.totalorder %s3612_s28, %s3612_s28 }
  0x35   : > { %p3615_p7 = pnand %p3613_p5, %p3573_p13  ;;  %p3622_p2 = por %p3621_p0, %p3620_p12 }
  0x37   : > { %p3616_p9 = pneg %p3615_p7 }
  0x39   : > { %p3623_p1 = pnand %p3622_p2, %p3616_p9 }
  0x3b   : > { %3626 = shalt.err (!%p3623_p1)
}
  0x3c   : > { %s3733_s12 = smov 128   ;;  %s3734_s13 = smov 8  }
  0x3d   : > { %3484 = dma.hbm_to_vmem [thread:$0]  (!%p3822_p11), %s5480_s3, 16384, %s3826_s6, [#allocation6], %s3733_s12, %s3733_s12, %s3734_s13  }
  0x3e   : > { %s3884_s16 = sadd.s32 1, %s3727_s21   ;;  %s29_s23 = sadd.s32 1, %s3723_s20 }
  0x3f   : > { %s26_s17 = ssub.s32 %s3727_s21, %s3884_s16  ;;  %p36_p6 = scmp.ne.s32.totalorder %s3723_s20, %s3719_s19 }
  0x40   : > { %p27_p13 = scmp.eq.s32.totalorder %s26_s17, 0  ;;  %p37_p10 = scmp.eq.s32.totalorder %s3727_s21, 0 }
  0x41   : > { %p5496_p5 = scmp.eq.s32.totalorder %s3792_s22, 1  ;;  %p3495_p9 = scmp.lt.s32.totalorder %s3727_s21, 2 }
  0x42   : > { %s3893_s27 = scalar_select %p27_p13, %s3723_s20, %s29_s23  }
  0x43   : > { %p38_p3 = por %p37_p10, %p36_p6  ;;  %p3897_p7 = por %p5496_p5, %p36_p6 }
  0x44   : > { %s208_s30 = sand.u32 1, %s3723_s20   ;;  %s2952_s6 = sshll.u32 %s3727_s21, 12 }
  0x45   : > { %s5497_s29 = scalar_select %p3897_p7, 1, 0 }
  0x46   : > { %s2938_s7 = sshll.u32 %s208_s30, 8  ;;  %s3907_s10 = scalar_lea.hbm %s5477_s0, %s2952_s6 }
  0x47   : > { %s212_s11 = scalar_lea.vmem [#allocation2], %s2938_s7  ;;  %p3911_p11 = pnand %p3495_p9, %p38_p3 }
  0x48   : > { %s219_s28 = sshll.u32 %s212_s11, 4  ;;  %s3915_s15 = scalar_lea.sflag [#allocation3], %s208_s30  ;;  %s3909_s28 = int_to_ptr.vmem [resolvable:$true] %s219_s28 }
  0x49   : > { %s3627_s17 = scalar_lea.hbm %s3907_s10, 4096  ;;  %p3629_p0 = pneg %p3911_p11 }
  0x4a   : > { %p3628_p12 = scmp.ne.s32.totalorder %s3907_s10, %s3627_s17  ;;  %s3632_s6 = scalar_lea.hbm %s5477_s0, 8192 }
  0x4b   : > { %p3633_p13 = scmp.lt.u32.totalorder %s3907_s10, %s5477_s0  ;;  %p3634_p6 = scmp.lt.u32.totalorder %s3632_s6, %s3627_s17 }
  0x4c   : > { %p3630_p2 = pnand %p3629_p0, %p3628_p12  ;;  %p3636_p3 = scmp.lt.u32.totalorder %s3627_s17, %s3907_s10 }
  0x4d   : > { %p3635_p10 = por %p3634_p6, %p3633_p13 }
  0x4e   : > { %p3631_p1 = pneg %p3630_p2 }
  0x4f   : > { %p3637_p5 = por %p3636_p3, %p3635_p10 }
  0x51   : > { %p3638_p9 = pnand %p3637_p5, %p3631_p1 }
  0x53   : > { %3641 = shalt.err (!%p3638_p9)
}
  0x54   : > { %s3642_s30 = scalar_lea.vmem %s3909_s28, 4096  ;;  %s3735_s11 = smov [#allocation2]  }
  0x55   : > { %p3643_p12 = scmp.ne.s32.totalorder %s3909_s28, %s3642_s30  ;;  %s3647_s23 = sshll.u32 %s3735_s11, 4  ;;  %s3648_s23 = int_to_ptr.vmem [resolvable:$false] %s3647_s23 }
  0x56   : > { %s3649_s7 = scalar_lea.vmem %s3648_s23, 8192  ;;  %p3650_p4 = scmp.lt.s32.totalorder %s3909_s28, %s3648_s23 }
  0x57   : > { %p3645_p2 = pnand %p3643_p12, %p3629_p0  ;;  %p3651_p13 = scmp.lt.s32.totalorder %s3649_s7, %s3642_s30 }
  0x59   : > { %p3646_p7 = pneg %p3645_p2  ;;  %p3652_p6 = por %p3651_p13, %p3650_p4 }
  0x5b   : > { %p3653_p10 = pnand %p3652_p6, %p3646_p7 }
  0x5d   : > { %3656 = shalt.err (!%p3653_p10)
}
  0x5e   : > { %3488 = dma.hbm_to_vmem [thread:$0]  (!%p3911_p11), %s3907_s10, 4096, %s3909_s28, %s3915_s15, %s3733_s12, %s3733_s12, %s3734_s13  }
  0x5f   : > { %231 = sbr.rel (%p3811_p8) target bundleno = 1100 (0x44c), region = 40 }
  0x66   : > { %s3949_s17 = sand.u32 1, %s3719_s19   ;;  %p5499_p4 = scmp.ne.s32.totalorder %s5492_s24, 0 }
  0x67   : > { %s2942_s6 = sshll.u32 %s3949_s17, 8  ;;  %s234_s8 = scalar_lea.sflag [#allocation3], %s3949_s17 }
  0x68   : > { %s3955_s14 = scalar_lea.vmem [#allocation2], %s2942_s6 }
  0x69   : > { %3702 = dma.done.wait (%p5499_p4), %s234_s8, 4096  }
  0x6a   : > { %3704 = vsyncadd (%p5499_p4), %s234_s8, 4294963200  ;;  %p5500_p7 = scmp.eq.s32.totalorder %s3792_s22, 0 }
  0x6c   : > { %3706 = dma.done.wait (%p5500_p7), [#allocation6], 32768   ;;  %p5501_p8 = pmov %p5500_p7 }
  0x6d   : > { %v5488_v0 = vmov 0.0   ;;  %v307_v1 = vld [vmem:[#allocation5 + $0x8] sm:$0xff]  ;;  %v306_v3 = vld [vmem:[#allocation5] sm:$0xff]  ;;  %v309_v48 = vld [vmem:[#allocation5 + $0x18] sm:$0xff]  ;;  %s5332_s15 = scalar_lea.vmem [#allocation8], %s2942_s6  ;;  %s2953_s9 = sshll.u32 %s3792_s22, 12 }
  0x6e   : > { %3708 = vsyncadd (%p5501_p8), [#allocation6], 4294934528  ;;  %540 = vmatprep.mubr.f32.mxu1 %v5488_v0  ;;  %1054 = vmatprep.mubr.f32.mxu0 %v5488_v0  ;;  %v315_v2 = vld [vmem:[#allocation5 + $0x48] sm:$0xff]  ;;  %v314_v5 = vld [vmem:[#allocation5 + $0x40] sm:$0xff]  ;;  %s2841_s30 = sshll.u32 %s5332_s15, 4  ;;  %s5430_s7 = scalar_lea.hbm %s5482_s5, %s2953_s9  ;;  %s5432_s30 = int_to_ptr.vmem [resolvable:$true] %s2841_s30 }
  0x6f   : > { %v2954_v4 = vpack.c.bf16 %v315_v2, %v307_v1  ;;  %v323_v6 = vld [vmem:[#allocation5 + $0x88] sm:$0xff]  ;;  %v2956_v8 = vpack.c.bf16 %v314_v5, %v306_v3  ;;  %v322_v10 = vld [vmem:[#allocation5 + $0x80] sm:$0xff]  ;;  %v317_v49 = vld [vmem:[#allocation5 + $0x58] sm:$0xff]  ;;  %s2828_s22 = scalar_lea.sflag [#allocation4], %s3949_s17  ;;  %s3657_s6 = scalar_lea.vmem %s5432_s30, 4096 }
  0x70   : > { %v331_v7 = vld [vmem:[#allocation5 + $0xc8] sm:$0xff]  ;;  %v330_v11 = vld [vmem:[#allocation5 + $0xc0] sm:$0xff]  ;;  %v2986_v51 = vpack.c.bf16 %v317_v49, %v309_v48  ;;  %v308_v52 = vld [vmem:[#allocation5 + $0x10] sm:$0xff]  ;;  %p3658_p11 = scmp.ne.s32.totalorder %s5432_s30, %s3657_s6  ;;  %p5664_p0 = scmp.ne.s32.totalorder %s5497_s29, 0 }
  0x71   : > { %v2958_v9 = vpack.c.bf16 %v331_v7, %v323_v6  ;;  %v339_v12 = vld [vmem:[#allocation5 + $0x108] sm:$0xff]  ;;  %2955 = vmatprep.subr.bf16.mxu1 %v2954_v4  ;;  %v2960_v14 = vpack.c.bf16 %v330_v11, %v322_v10  ;;  %v338_v16 = vld [vmem:[#allocation5 + $0x100] sm:$0xff]  ;;  %v316_v53 = vld [vmem:[#allocation5 + $0x50] sm:$0xff]  ;;  %s3738_s8 = smov [#allocation8]  }
  0x72   : > { %v347_v13 = vld [vmem:[#allocation5 + $0x148] sm:$0xff]  ;;  %2957 = vmatpush1.bf16.msra.mxu1 %v2956_v8  ;;  %v346_v17 = vld [vmem:[#allocation5 + $0x140] sm:$0xff]  ;;  %v325_v54 = vld [vmem:[#allocation5 + $0x98] sm:$0xff]  ;;  %v2988_v57 = vpack.c.bf16 %v316_v53, %v308_v52  ;;  %p3659_p1 = pnand %p3658_p11, %p5664_p0 }
  0x73   : > { %2959 = vmatprep.subr.bf16.mxu1 %v2958_v9  ;;  %v2962_v15 = vpack.c.bf16 %v347_v13, %v339_v12  ;;  %v355_v18 = vld [vmem:[#allocation5 + $0x188] sm:$0xff]  ;;  %v2964_v20 = vpack.c.bf16 %v346_v17, %v338_v16  ;;  %v354_v22 = vld [vmem:[#allocation5 + $0x180] sm:$0xff]  ;;  %v333_v55 = vld [vmem:[#allocation5 + $0xd8] sm:$0xff] }
  0x74   : > { %v363_v19 = vld [vmem:[#allocation5 + $0x1c8] sm:$0xff]  ;;  %v362_v23 = vld [vmem:[#allocation5 + $0x1c0] sm:$0xff]  ;;  %v2990_v58 = vpack.c.bf16 %v333_v55, %v325_v54  ;;  %v324_v59 = vld [vmem:[#allocation5 + $0x90] sm:$0xff]  ;;  %p3660_p3 = pneg %p3659_p1 }
  0x75   : > { %v2966_v21 = vpack.c.bf16 %v363_v19, %v355_v18  ;;  %v371_v24 = vld [vmem:[#allocation5 + $0x208] sm:$0xff]  ;;  %v2968_v26 = vpack.c.bf16 %v362_v23, %v354_v22  ;;  %v370_v28 = vld [vmem:[#allocation5 + $0x200] sm:$0xff]  ;;  %v332_v60 = vld [vmem:[#allocation5 + $0xd0] sm:$0xff] }
  0x76   : > { %2961 = vmatpush1.bf16.msra.mxu1 %v2960_v14  ;;  %v379_v25 = vld [vmem:[#allocation5 + $0x248] sm:$0xff]  ;;  %v378_v29 = vld [vmem:[#allocation5 + $0x240] sm:$0xff]  ;;  %v341_v61 = vld [vmem:[#allocation5 + $0x118] sm:$0xff]  ;;  %v2992_v1 = vpack.c.bf16 %v332_v60, %v324_v59 }
  0x77   : > { %2963 = vmatprep.subr.bf16.mxu1 %v2962_v15  ;;  %v2970_v27 = vpack.c.bf16 %v379_v25, %v371_v24  ;;  %v387_v30 = vld [vmem:[#allocation5 + $0x288] sm:$0xff]  ;;  %v2972_v32 = vpack.c.bf16 %v378_v29, %v370_v28  ;;  %v386_v34 = vld [vmem:[#allocation5 + $0x280] sm:$0xff]  ;;  %v349_v62 = vld [vmem:[#allocation5 + $0x158] sm:$0xff] }
  0x78   : > { %v395_v31 = vld [vmem:[#allocation5 + $0x2c8] sm:$0xff]  ;;  %v394_v35 = vld [vmem:[#allocation5 + $0x2c0] sm:$0xff]  ;;  %v2994_v2 = vpack.c.bf16 %v349_v62, %v341_v61  ;;  %v340_v3 = vld [vmem:[#allocation5 + $0x110] sm:$0xff] }
  0x79   : > { %v2974_v33 = vpack.c.bf16 %v395_v31, %v387_v30  ;;  %v403_v36 = vld [vmem:[#allocation5 + $0x308] sm:$0xff]  ;;  %v2976_v38 = vpack.c.bf16 %v394_v35, %v386_v34  ;;  %v402_v40 = vld [vmem:[#allocation5 + $0x300] sm:$0xff]  ;;  %v348_v4 = vld [vmem:[#allocation5 + $0x150] sm:$0xff] }
  0x7a   : > { %2965 = vmatpush1.bf16.msra.mxu1 %v2964_v20  ;;  %v411_v37 = vld [vmem:[#allocation5 + $0x348] sm:$0xff]  ;;  %v410_v41 = vld [vmem:[#allocation5 + $0x340] sm:$0xff]  ;;  %v357_v5 = vld [vmem:[#allocation5 + $0x198] sm:$0xff]  ;;  %v2996_v8 = vpack.c.bf16 %v348_v4, %v340_v3 }
  0x7b   : > { %2967 = vmatprep.subr.bf16.mxu1 %v2966_v21  ;;  %v2978_v39 = vpack.c.bf16 %v411_v37, %v403_v36  ;;  %v419_v42 = vld [vmem:[#allocation5 + $0x388] sm:$0xff]  ;;  %v2980_v44 = vpack.c.bf16 %v410_v41, %v402_v40  ;;  %v418_v46 = vld [vmem:[#allocation5 + $0x380] sm:$0xff]  ;;  %v365_v6 = vld [vmem:[#allocation5 + $0x1d8] sm:$0xff] }
  0x7c   : > { %v427_v43 = vld [vmem:[#allocation5 + $0x3c8] sm:$0xff]  ;;  %v426_v47 = vld [vmem:[#allocation5 + $0x3c0] sm:$0xff]  ;;  %v3978_v7 = vld [vmem:[%s3955_s14 + $0x10] sm:$0xff]  ;;  %v2998_v9 = vpack.c.bf16 %v365_v6, %v357_v5 }
  0x7d   : > { %v2982_v45 = vpack.c.bf16 %v427_v43, %v419_v42  ;;  %v2984_v50 = vpack.c.bf16 %v426_v47, %v418_v46  ;;  %v3968_v56 = vld [vmem:[%s3955_s14] sm:$0xff]  ;;  %v3973_v63 = vld [vmem:[%s3955_s14 + $0x8] sm:$0xff]  ;;  %v356_v10 = vld [vmem:[#allocation5 + $0x190] sm:$0xff] }
  0x7e   : > { %2969 = vmatpush1.bf16.msra.mxu1 %v2968_v26  ;;  %v364_v11 = vld [vmem:[#allocation5 + $0x1d0] sm:$0xff]  ;;  %v373_v12 = vld [vmem:[#allocation5 + $0x218] sm:$0xff]  ;;  %v3988_v21 = vld [vmem:[%s3955_s14 + $0x20] sm:$0xff] }
  0x7f   : > { %2971 = vmatprep.subr.bf16.mxu1 %v2970_v27  ;;  %v381_v13 = vld [vmem:[#allocation5 + $0x258] sm:$0xff]  ;;  %v3000_v15 = vpack.c.bf16 %v364_v11, %v356_v10  ;;  %v372_v17 = vld [vmem:[#allocation5 + $0x210] sm:$0xff]  ;;  %v3993_v28 = vld [vmem:[%s3955_s14 + $0x28] sm:$0xff] }
  0x80   : > { %v3983_v14 = vld [vmem:[%s3955_s14 + $0x18] sm:$0xff]  ;;  %v3002_v16 = vpack.c.bf16 %v381_v13, %v373_v12  ;;  %v380_v18 = vld [vmem:[#allocation5 + $0x250] sm:$0xff]  ;;  %v4008_v42 = vld [vmem:[%s3955_s14 + $0x40] sm:$0xff] }
  0x81   : > { %v389_v19 = vld [vmem:[#allocation5 + $0x298] sm:$0xff]  ;;  %v3004_v22 = vpack.c.bf16 %v380_v18, %v372_v17  ;;  %v388_v24 = vld [vmem:[#allocation5 + $0x290] sm:$0xff]  ;;  %v4013_v43 = vld [vmem:[%s3955_s14 + $0x48] sm:$0xff] }
  0x82   : > { %2973 = vmatpush1.bf16.msra.mxu1 %v2972_v32  ;;  %v397_v20 = vld [vmem:[#allocation5 + $0x2d8] sm:$0xff]  ;;  %v396_v25 = vld [vmem:[#allocation5 + $0x2d0] sm:$0xff]  ;;  %v4028_v46 = vld [vmem:[%s3955_s14 + $0x60] sm:$0xff] }
  0x83   : > { %2975 = vmatprep.subr.bf16.mxu1 %v2974_v33  ;;  %v3006_v23 = vpack.c.bf16 %v397_v20, %v389_v19  ;;  %v405_v26 = vld [vmem:[#allocation5 + $0x318] sm:$0xff]  ;;  %v3008_v29 = vpack.c.bf16 %v396_v25, %v388_v24  ;;  %v404_v31 = vld [vmem:[#allocation5 + $0x310] sm:$0xff]  ;;  %v4033_v47 = vld [vmem:[%s3955_s14 + $0x68] sm:$0xff] }
  0x84   : > { %v413_v27 = vld [vmem:[#allocation5 + $0x358] sm:$0xff]  ;;  %v412_v32 = vld [vmem:[#allocation5 + $0x350] sm:$0xff]  ;;  %v311_v49 = vld [vmem:[#allocation5 + $0x28] sm:$0xff] }
  0x85   : > { %v3010_v30 = vpack.c.bf16 %v413_v27, %v405_v26  ;;  %v421_v33 = vld [vmem:[#allocation5 + $0x398] sm:$0xff]  ;;  %v3998_v35 = vld [vmem:[%s3955_s14 + $0x30] sm:$0xff]  ;;  %v3012_v36 = vpack.c.bf16 %v412_v32, %v404_v31  ;;  %v310_v52 = vld [vmem:[#allocation5 + $0x20] sm:$0xff] }
  0x86   : > { %2977 = vmatpush1.bf16.msra.mxu1 %v2976_v38  ;;  %v429_v34 = vld [vmem:[#allocation5 + $0x3d8] sm:$0xff]  ;;  %v420_v38 = vld [vmem:[#allocation5 + $0x390] sm:$0xff]  ;;  %v318_v53 = vld [vmem:[#allocation5 + $0x60] sm:$0xff] }
  0x87   : > { %2979 = vmatprep.subr.bf16.mxu1 %v2978_v39  ;;  %v3014_v37 = vpack.c.bf16 %v429_v34, %v421_v33  ;;  %v428_v39 = vld [vmem:[#allocation5 + $0x3d0] sm:$0xff]  ;;  %v4003_v40 = vld [vmem:[%s3955_s14 + $0x38] sm:$0xff]  ;;  %v3020_v54 = vpack.c.bf16 %v318_v53, %v310_v52  ;;  %v326_v60 = vld [vmem:[#allocation5 + $0xa0] sm:$0xff] }
  0x88   : > { %v3016_v41 = vpack.c.bf16 %v428_v39, %v420_v38  ;;  %v4038_v48 = vld [vmem:[%s3955_s14 + $0x70] sm:$0xff]  ;;  %v4043_v55 = vld [vmem:[%s3955_s14 + $0x78] sm:$0xff]  ;;  %v334_v61 = vld [vmem:[#allocation5 + $0xe0] sm:$0xff] }
  0x89   : > { %v3024_v62 = vpack.c.bf16 %v334_v61, %v326_v60  ;;  %v351_v3 = vld [vmem:[#allocation5 + $0x168] sm:$0xff]  ;;  %v342_v5 = vld [vmem:[#allocation5 + $0x120] sm:$0xff]  ;;  %v4058_v17 = vld [vmem:[%s3955_s14 + $0x90] sm:$0xff]  ;;  %v5486_v60 = vmov 0.0|0.0  }
  0x8a   : > { %2981 = vmatpush1.bf16.msra.mxu1 %v2980_v44  ;;  %v4018_v44 = vld [vmem:[%s3955_s14 + $0x50] sm:$0xff]  ;;  %v350_v6 = vld [vmem:[#allocation5 + $0x160] sm:$0xff]  ;;  %v359_v10 = vld [vmem:[#allocation5 + $0x1a8] sm:$0xff] }
  0x8b   : > { %2983 = vmatprep.subr.bf16.mxu1 %v2982_v45  ;;  %v4023_v45 = vld [vmem:[%s3955_s14 + $0x58] sm:$0xff]  ;;  %v367_v11 = vld [vmem:[#allocation5 + $0x1e8] sm:$0xff]  ;;  %v358_v13 = vld [vmem:[#allocation5 + $0x1a0] sm:$0xff] }
  0x8c   : > { %v3030_v12 = vpack.c.bf16 %v367_v11, %v359_v10  ;;  %v375_v18 = vld [vmem:[#allocation5 + $0x228] sm:$0xff]  ;;  %v4063_v25 = vld [vmem:[%s3955_s14 + $0x98] sm:$0xff]  ;;  %v398_v31 = vld [vmem:[#allocation5 + $0x2e0] sm:$0xff] }
  0x8d   : > { %v383_v19 = vld [vmem:[#allocation5 + $0x268] sm:$0xff]  ;;  %v4068_v33 = vld [vmem:[%s3955_s14 + $0xa0] sm:$0xff]  ;;  %v4106_v10 = vld [vmem:[%s3955_s14 + $0xd0] sm:$0xff] }
  0x8e   : > { %2985 = vmatpush1.bf16.msra.mxu1 %v2984_v50  ;;  %v319_v50 = vld [vmem:[#allocation5 + $0x68] sm:$0xff]  ;;  %v3034_v20 = vpack.c.bf16 %v383_v19, %v375_v18  ;;  %v406_v38 = vld [vmem:[#allocation5 + $0x320] sm:$0xff]  ;;  %v1794_v11 = vld [vmem:[#allocation7 + $0x110] sm:$0xff] }
  0x8f   : > { %2987 = vmatprep.subr.bf16.mxu1 %v2986_v51  ;;  %v3018_v51 = vpack.c.bf16 %v319_v50, %v311_v49  ;;  %v391_v26 = vld [vmem:[#allocation5 + $0x2a8] sm:$0xff]  ;;  %v414_v39 = vld [vmem:[#allocation5 + $0x360] sm:$0xff] }
  0x90   : > { %v399_v27 = vld [vmem:[#allocation5 + $0x2e8] sm:$0xff]  ;;  %v422_v53 = vld [vmem:[#allocation5 + $0x3a0] sm:$0xff] }
  0x91   : > { %541 = vmatmul.mubr.f32.vlgmr.msra.gmra.mrb[0].mxu1 %v3968_v56  ;;  %3019 = vmatprep.subr.bf16.mxu0 %v3018_v51  ;;  %v407_v34 = vld [vmem:[#allocation5 + $0x328] sm:$0xff]  ;;  %v4091_v61 = vld [vmem:[%s3955_s14 + $0xc0] sm:$0xff] }
  0x92   : > { %2989 = vmatpush1.bf16.msra.mxu1 %v2988_v57  ;;  %546 = vmatprep.mubr.f32.mxu1 %v5488_v0  ;;  %v327_v57 = vld [vmem:[#allocation5 + $0xa8] sm:$0xff]  ;;  %v1796_v18 = vld [vmem:[#allocation7 + $0x120] sm:$0xff] }
  0x93   : > { %2991 = vmatprep.subr.bf16.mxu1 %v2990_v58  ;;  %3021 = vmatpush1.bf16.msra.mxu0 %v3020_v54  ;;  %v335_v58 = vld [vmem:[#allocation5 + $0xe8] sm:$0xff]  ;;  %v430_v54 = vld [vmem:[#allocation5 + $0x3e0] sm:$0xff] }
  0x94   : > { %v3022_v59 = vpack.c.bf16 %v335_v58, %v327_v57  ;;  %v4073_v49 = vld [vmem:[%s3955_s14 + $0xa8] sm:$0xff]  ;;  %v3048_v57 = vpack.c.bf16 %v430_v54, %v422_v53  ;;  %v4078_v58 = vld [vmem:[%s3955_s14 + $0xb0] sm:$0xff] }
  0x95   : > { %547 = vmatmul.mubr.f32.gmra.mrb[2].mxu1 %v3973_v63  ;;  %v423_v50 = vld [vmem:[#allocation5 + $0x3a8] sm:$0xff] }
  0x96   : > { %552 = vmatprep.mubr.f32.mxu1 %v5488_v0  ;;  %2993 = vmatpush1.bf16.msra.mxu1 %v2992_v1  ;;  %v4048_v1 = vld [vmem:[%s3955_s14 + $0x80] sm:$0xff]  ;;  %v431_v51 = vld [vmem:[#allocation5 + $0x3e8] sm:$0xff] }
  0x97   : > { %2995 = vmatprep.subr.bf16.mxu1 %v2994_v2  ;;  %3023 = vmatprep.subr.bf16.mxu0 %v3022_v59  ;;  %v343_v2 = vld [vmem:[#allocation5 + $0x128] sm:$0xff]  ;;  %v3046_v52 = vpack.c.bf16 %v431_v51, %v423_v50  ;;  %v4083_v59 = vld [vmem:[%s3955_s14 + $0xb8] sm:$0xff] }
  0x98   : > { %3025 = vmatpush1.bf16.msra.mxu0 %v3024_v62  ;;  %v3026_v4 = vpack.c.bf16 %v351_v3, %v343_v2  ;;  %v313_v62 = vld [vmem:[#allocation5 + $0x38] sm:$0xff]  ;;  %v1792_v3 = vld [vmem:[#allocation7 + $0x100] sm:$0xff]  ;;  %v1797_v19 = vld [vmem:[#allocation7 + $0x128] sm:$0xff] }
  0x99   : > { %553 = vmatmul.mubr.f32.gmra.mrb[4].mxu1 %v3978_v7  ;;  %v321_v2 = vld [vmem:[#allocation5 + $0x78] sm:$0xff]  ;;  %v1801_v50 = vld [vmem:[#allocation7 + $0x148] sm:$0xff] }
  0x9a   : > { %558 = vmatprep.mubr.f32.mxu1 %v5488_v0  ;;  %2997 = vmatpush1.bf16.msra.mxu1 %v2996_v8  ;;  %v3028_v8 = vpack.c.bf16 %v350_v6, %v342_v5  ;;  %v3050_v5 = vpack.c.bf16 %v321_v2, %v313_v62  ;;  %v345_v51 = vld [vmem:[#allocation5 + $0x138] sm:$0xff]  ;;  %v344_v62 = vld [vmem:[#allocation5 + $0x130] sm:$0xff] }
  0x9b   : > { %2999 = vmatprep.subr.bf16.mxu1 %v2998_v9  ;;  %v4053_v9 = vld [vmem:[%s3955_s14 + $0x88] sm:$0xff]  ;;  %3027 = vmatprep.subr.bf16.mxu0 %v3026_v4  ;;  %v352_v2 = vld [vmem:[#allocation5 + $0x170] sm:$0xff] }
  0x9c   : > { %3029 = vmatpush1.bf16.msra.mxu0 %v3028_v8  ;;  %v1793_v4 = vld [vmem:[#allocation7 + $0x108] sm:$0xff] }
  0x9d   : > { %559 = vmatmul.mubr.f32.gmra.mrb[6].mxu1 %v3983_v14  ;;  %3031 = vmatprep.subr.bf16.mxu0 %v3030_v12  ;;  %v3131_v6 = vpack.c.bf16 %v1793_v4, %v1792_v3  ;;  %v4098_v8 = vld [vmem:[%s3955_s14 + $0xc8] sm:$0xff]  ;;  %v1795_v12 = vld [vmem:[#allocation7 + $0x118] sm:$0xff] }
  0x9e   : > { %564 = vmatprep.mubr.f32.mxu1 %v5488_v0  ;;  %3001 = vmatpush1.bf16.msra.mxu1 %v3000_v15  ;;  %v366_v15 = vld [vmem:[#allocation5 + $0x1e0] sm:$0xff]  ;;  %v361_v3 = vld [vmem:[#allocation5 + $0x1b8] sm:$0xff] }
  0x9f   : > { %3003 = vmatprep.subr.bf16.mxu1 %v3002_v16  ;;  %v3032_v16 = vpack.c.bf16 %v366_v15, %v358_v13  ;;  %v3134_v13 = vpack.c.bf16 %v1795_v12, %v1794_v11  ;;  %v4113_v15 = vld [vmem:[%s3955_s14 + $0xd8] sm:$0xff]  ;;  %v368_v11 = vld [vmem:[#allocation5 + $0x1f0] sm:$0xff] }
  0xa0   : > { %v369_v4 = vld [vmem:[#allocation5 + $0x1f8] sm:$0xff]  ;;  %v1802_v12 = vld [vmem:[#allocation7 + $0x150] sm:$0xff] }
  0xa1   : > { %565 = vmatmul.mubr.f32.gmra.mrb[8].mxu1 %v3988_v21  ;;  %3033 = vmatpush1.bf16.msra.mxu0 %v3032_v16  ;;  %v4121_v16 = vld [vmem:[%s3955_s14 + $0xe0] sm:$0xff] }
  0xa2   : > { %570 = vmatprep.mubr.f32.mxu1 %v5488_v0  ;;  %3005 = vmatpush1.bf16.msra.mxu1 %v3004_v22  ;;  %v374_v22 = vld [vmem:[#allocation5 + $0x220] sm:$0xff] }
  0xa3   : > { %3007 = vmatprep.subr.bf16.mxu1 %v3006_v23  ;;  %v382_v23 = vld [vmem:[#allocation5 + $0x260] sm:$0xff]  ;;  %3035 = vmatprep.subr.bf16.mxu0 %v3034_v20  ;;  %v3137_v20 = vpack.c.bf16 %v1797_v19, %v1796_v18  ;;  %v377_v18 = vld [vmem:[#allocation5 + $0x238] sm:$0xff] }
  0xa4   : > { %v3036_v24 = vpack.c.bf16 %v382_v23, %v374_v22  ;;  %v4128_v22 = vld [vmem:[%s3955_s14 + $0xe8] sm:$0xff]  ;;  %v4136_v23 = vld [vmem:[%s3955_s14 + $0xf0] sm:$0xff]  ;;  %v385_v19 = vld [vmem:[#allocation5 + $0x278] sm:$0xff] }
  0xa5   : > { %571 = vmatmul.mubr.f32.gmra.mrb[10].mxu1 %v3993_v28 }
  0xa6   : > { %576 = vmatprep.mubr.f32.mxu1 %v5488_v0  ;;  %3009 = vmatpush1.bf16.msra.mxu1 %v3008_v29  ;;  %v3038_v29 = vpack.c.bf16 %v399_v27, %v391_v26  ;;  %v1799_v26 = vld [vmem:[#allocation7 + $0x138] sm:$0xff] }
  0xa7   : > { %3011 = vmatprep.subr.bf16.mxu1 %v3010_v30  ;;  %3037 = vmatpush1.bf16.msra.mxu0 %v3036_v24  ;;  %v390_v30 = vld [vmem:[#allocation5 + $0x2a0] sm:$0xff]  ;;  %v1798_v24 = vld [vmem:[#allocation7 + $0x130] sm:$0xff] }
  0xa8   : > { %v3040_v32 = vpack.c.bf16 %v398_v31, %v390_v30  ;;  %3039 = vmatprep.subr.bf16.mxu0 %v3038_v29  ;;  %v3140_v27 = vpack.c.bf16 %v1799_v26, %v1798_v24  ;;  %v4143_v29 = vld [vmem:[%s3955_s14 + $0xf8] sm:$0xff]  ;;  %v312_v30 = vld [vmem:[#allocation5 + $0x30] sm:$0xff]  ;;  %v3066_v24 = vpack.c.bf16 %v385_v19, %v377_v18 }
  0xa9   : > { %577 = vmatmul.mubr.f32.gmra.mrb[12].mxu1 %v3998_v35  ;;  %v320_v31 = vld [vmem:[#allocation5 + $0x70] sm:$0xff]  ;;  %v1811_v19 = vld [vmem:[#allocation7 + $0x198] sm:$0xff] }
  0xaa   : > { %582 = vmatprep.mubr.f32.mxu1 %v5488_v0  ;;  %3013 = vmatpush1.bf16.msra.mxu1 %v3012_v36  ;;  %v415_v36 = vld [vmem:[#allocation5 + $0x368] sm:$0xff]  ;;  %v376_v26 = vld [vmem:[#allocation5 + $0x230] sm:$0xff] }
  0xab   : > { %3015 = vmatprep.subr.bf16.mxu1 %v3014_v37  ;;  %3041 = vmatpush1.bf16.msra.mxu0 %v3040_v32  ;;  %v3042_v37 = vpack.c.bf16 %v415_v36, %v407_v34  ;;  %v329_v32 = vld [vmem:[#allocation5 + $0xb8] sm:$0xff]  ;;  %v3052_v36 = vpack.c.bf16 %v320_v31, %v312_v30  ;;  %v1810_v18 = vld [vmem:[#allocation7 + $0x190] sm:$0xff] }
  0xac   : > { %v337_v34 = vld [vmem:[#allocation5 + $0xf8] sm:$0xff] }
  0xad   : > { %583 = vmatmul.mubr.f32.gmra.mrb[14].mxu1 %v4003_v40  ;;  %3043 = vmatprep.subr.bf16.mxu0 %v3042_v37  ;;  %v328_v37 = vld [vmem:[#allocation5 + $0xb0] sm:$0xff]  ;;  %v393_v30 = vld [vmem:[#allocation5 + $0x2b8] sm:$0xff] }
  0xae   : > { %588 = vmatprep.mubr.f32.mxu1 %v5488_v0  ;;  %3017 = vmatpush1.bf16.msra.mxu1 %v3016_v41  ;;  %v3044_v41 = vpack.c.bf16 %v414_v39, %v406_v38  ;;  %v3054_v38 = vpack.c.bf16 %v337_v34, %v329_v32  ;;  %v336_v39 = vld [vmem:[#allocation5 + $0xf0] sm:$0xff]  ;;  %v401_v31 = vld [vmem:[#allocation5 + $0x2f8] sm:$0xff] }
  0xaf   : > { %3051 = vmatprep.subr.bf16.mxu1 %v3050_v5  ;;  %v3056_v54 = vpack.c.bf16 %v336_v39, %v328_v37  ;;  %v360_v5 = vld [vmem:[#allocation5 + $0x1b0] sm:$0xff]  ;;  %v3070_v34 = vpack.c.bf16 %v401_v31, %v393_v30  ;;  %v1804_v37 = vld [vmem:[#allocation7 + $0x160] sm:$0xff]  ;;  %v409_v39 = vld [vmem:[#allocation5 + $0x338] sm:$0xff] }
  0xb0   : > { %3045 = vmatpush1.bf16.msra.mxu0 %v3044_v41  ;;  %v1800_v41 = vld [vmem:[#allocation7 + $0x140] sm:$0xff]  ;;  %v392_v32 = vld [vmem:[#allocation5 + $0x2b0] sm:$0xff] }
  0xb1   : > { %589 = vmatmul.mubr.f32.gmra.mrb[16].mxu1 %v4008_v42  ;;  %3047 = vmatprep.subr.bf16.mxu0 %v3046_v52  ;;  %v353_v52 = vld [vmem:[#allocation5 + $0x178] sm:$0xff]  ;;  %v3143_v53 = vpack.c.bf16 %v1801_v50, %v1800_v41  ;;  %v1822_v31 = vld [vmem:[#allocation7 + $0x1f0] sm:$0xff] }
  0xb2   : > { %594 = vmatprep.mubr.f32.mxu1 %v5488_v0  ;;  %v417_v41 = vld [vmem:[#allocation5 + $0x378] sm:$0xff] }
  0xb4   : > { %3049 = vmatpush1.bf16.msra.mxu0 %v3048_v57  ;;  %v3058_v57 = vpack.c.bf16 %v353_v52, %v345_v51  ;;  %v3074_v51 = vpack.c.bf16 %v417_v41, %v409_v39  ;;  %v408_v52 = vld [vmem:[#allocation5 + $0x330] sm:$0xff] }
  0xb5   : > { %595 = vmatmul.mubr.f32.gmra.mrb[18].mxu1 %v4013_v43  ;;  %3130 = vmatprep.subr.bf16.mxu0 %v5486_v60 }
  0xb6   : > { %600 = vmatprep.mubr.f32.mxu1 %v5488_v0 }
  0xb7   : > { %1055 = vmatmul.mubr.f32.vlgmr.msra.gmra.mrb[0].mxu0 %v3968_v56 }
  0xb8   : > { %1060 = vmatprep.mubr.f32.mxu0 %v5488_v0  ;;  %3132 = vmatpush1.bf16.msra.mxu0 %v3131_v6  ;;  %v3062_v6 = vpack.c.bf16 %v369_v4, %v361_v3  ;;  %v432_v3 = vld [vmem:[#allocation5 + $0x3f0] sm:$0xff] }
  0xb9   : > { %601 = vmatmul.mubr.f32.gmra.mrb[20].mxu1 %v4018_v44  ;;  %3133 = vmatprep.subr.bf16.mxu0 %v5486_v60  ;;  %v1806_v4 = vld [vmem:[#allocation7 + $0x170] sm:$0xff] }
  0xba   : > { %606 = vmatprep.mubr.f32.mxu1 %v5488_v0 }
  0xbb   : > { %1061 = vmatmul.mubr.f32.gmra.mrb[2].mxu0 %v3973_v63 }
  0xbc   : > { %1066 = vmatprep.mubr.f32.mxu0 %v5488_v0  ;;  %3135 = vmatpush1.bf16.msra.mxu0 %v3134_v13  ;;  %v1803_v13 = vld [vmem:[#allocation7 + $0x158] sm:$0xff] }
  0xbd   : > { %607 = vmatmul.mubr.f32.gmra.mrb[22].mxu1 %v4023_v45  ;;  %3136 = vmatprep.subr.bf16.mxu0 %v5486_v60 }
  0xbe   : > { %612 = vmatprep.mubr.f32.mxu1 %v5488_v0 }
  0xbf   : > { %1067 = vmatmul.mubr.f32.gmra.mrb[4].mxu0 %v3978_v7 }
  0xc0   : > { %1072 = vmatprep.mubr.f32.mxu0 %v5488_v0  ;;  %3138 = vmatpush1.bf16.msra.mxu0 %v3137_v20  ;;  %v3146_v20 = vpack.c.bf16 %v1803_v13, %v1802_v12  ;;  %v1809_v12 = vld [vmem:[#allocation7 + $0x188] sm:$0xff] }
  0xc1   : > { %613 = vmatmul.mubr.f32.gmra.mrb[24].mxu1 %v4028_v46  ;;  %3139 = vmatprep.subr.bf16.mxu0 %v5486_v60 }
  0xc2   : > { %618 = vmatprep.mubr.f32.mxu1 %v5488_v0 }
  0xc3   : > { %1073 = vmatmul.mubr.f32.gmra.mrb[6].mxu0 %v3983_v14 }
  0xc4   : > { %1078 = vmatprep.mubr.f32.mxu0 %v5488_v0  ;;  %3141 = vmatpush1.bf16.msra.mxu0 %v3140_v27  ;;  %v384_v27 = vld [vmem:[#allocation5 + $0x270] sm:$0xff] }
  0xc5   : > { %619 = vmatmul.mubr.f32.gmra.mrb[26].mxu1 %v4033_v47  ;;  %3142 = vmatprep.subr.bf16.mxu0 %v5486_v60 }
  0xc6   : > { %624 = vmatprep.mubr.f32.mxu1 %v5488_v0 }
  0xc7   : > { %1079 = vmatmul.mubr.f32.gmra.mrb[8].mxu0 %v3988_v21 }
  0xc8   : > { %1084 = vmatprep.mubr.f32.mxu0 %v5488_v0  ;;  %3144 = vmatpush1.bf16.msra.mxu0 %v3143_v53  ;;  %v416_v53 = vld [vmem:[#allocation5 + $0x370] sm:$0xff] }
  0xc9   : > { %625 = vmatmul.mubr.f32.gmra.mrb[28].mxu1 %v4038_v48  ;;  %3145 = vmatprep.subr.bf16.mxu0 %v5486_v60 }
  0xca   : > { %630 = vmatprep.mubr.f32.mxu1 %v5488_v0 }
  0xcb   : > { %1085 = vmatmul.mubr.f32.gmra.mrb[10].mxu0 %v3993_v28 }
  0xcc   : > { %1090 = vmatprep.mubr.f32.mxu0 %v5488_v0  ;;  %3147 = vmatpush1.bf16.msra.mxu0 %v3146_v20  ;;  %v3158_v20 = vpack.c.bf16 %v1811_v19, %v1810_v18  ;;  %v1767_v18 = vld [vmem:[#allocation7 + $0x38] sm:$0xff] }
  0xcd   : > { %631 = vmatmul.mubr.f32.gmra.mrb[30].mxu1 %v4043_v55  ;;  %3148 = vmatprep.subr.bf16.mxu0 %v5486_v60 }
  0xce   : > { %636 = vmatprep.mubr.f32.mxu1 %v5488_v0 }
  0xcf   : > { %1091 = vmatmul.mubr.f32.gmra.mrb[12].mxu0 %v3998_v35 }
  0xd0   : > { %1096 = vmatprep.mubr.f32.mxu0 %v5488_v0 }
  0xd1   : > { %637 = vmatmul.mubr.f32.gmra.mrb[32].mxu1 %v4048_v1 }
  0xd2   : > { %642 = vmatprep.mubr.f32.mxu1 %v5488_v0 }
  0xd3   : > { %1097 = vmatmul.mubr.f32.gmra.mrb[14].mxu0 %v4003_v40 }
  0xd4   : > { %1102 = vmatprep.mubr.f32.mxu0 %v5488_v0 }
  0xd5   : > { %643 = vmatmul.mubr.f32.gmra.mrb[34].mxu1 %v4053_v9 }
  0xd6   : > { %648 = vmatprep.mubr.f32.mxu1 %v5488_v0 }
  0xd7   : > { %1103 = vmatmul.mubr.f32.gmra.mrb[16].mxu0 %v4008_v42 }
  0xd8   : > { %1108 = vmatprep.mubr.f32.mxu0 %v5488_v0 }
  0xd9   : > { %649 = vmatmul.mubr.f32.gmra.mrb[36].mxu1 %v4058_v17 }
  0xda   : > { %654 = vmatprep.mubr.f32.mxu1 %v5488_v0 }
  0xdb   : > { %1109 = vmatmul.mubr.f32.gmra.mrb[18].mxu0 %v4013_v43 }
  0xdc   : > { %1114 = vmatprep.mubr.f32.mxu0 %v5488_v0 }
  0xdd   : > { %655 = vmatmul.mubr.f32.gmra.mrb[38].mxu1 %v4063_v25 }
  0xde   : > { %660 = vmatprep.mubr.f32.mxu1 %v5488_v0 }
  0xdf   : > { %1115 = vmatmul.mubr.f32.gmra.mrb[20].mxu0 %v4018_v44 }
  0xe0   : > { %1120 = vmatprep.mubr.f32.mxu0 %v5488_v0 }
  0xe1   : > { %661 = vmatmul.mubr.f32.gmra.mrb[40].mxu1 %v4068_v33 }
  0xe2   : > { %666 = vmatprep.mubr.f32.mxu1 %v5488_v0 }
  0xe3   : > { %1121 = vmatmul.mubr.f32.gmra.mrb[22].mxu0 %v4023_v45 }
  0xe4   : > { %1126 = vmatprep.mubr.f32.mxu0 %v5488_v0 }
  0xe5   : > { %667 = vmatmul.mubr.f32.gmra.mrb[42].mxu1 %v4073_v49 }
  0xe6   : > { %672 = vmatprep.mubr.f32.mxu1 %v5488_v0 }
  0xe7   : > { %1127 = vmatmul.mubr.f32.gmra.mrb[24].mxu0 %v4028_v46 }
  0xe8   : > { %1132 = vmatprep.mubr.f32.mxu0 %v5488_v0 }
  0xe9   : > { %673 = vmatmul.mubr.f32.gmra.mrb[44].mxu1 %v4078_v58 }
  0xea   : > { %678 = vmatprep.mubr.f32.mxu1 %v5488_v0 }
  0xeb   : > { %1133 = vmatmul.mubr.f32.gmra.mrb[26].mxu0 %v4033_v47 }
  0xec   : > { %1138 = vmatprep.mubr.f32.mxu0 %v5488_v0 }
  0xed   : > { %679 = vmatmul.mubr.f32.gmra.mrb[46].mxu1 %v4083_v59 }
  0xee   : > { %684 = vmatprep.mubr.f32.mxu1 %v5488_v0 }
  0xef   : > { %1139 = vmatmul.mubr.f32.gmra.mrb[28].mxu0 %v4038_v48 }
  0xf0   : > { %1144 = vmatprep.mubr.f32.mxu0 %v5488_v0 }
  0xf1   : > { %685 = vmatmul.mubr.f32.gmra.mrb[48].mxu1 %v4091_v61 }
  0xf2   : > { %690 = vmatprep.mubr.f32.mxu1 %v5488_v0 }
  0xf3   : > { %1145 = vmatmul.mubr.f32.gmra.mrb[30].mxu0 %v4043_v55 }
  0xf4   : > { %1150 = vmatprep.mubr.f32.mxu0 %v5488_v0 }
  0xf5   : > { %691 = vmatmul.mubr.f32.gmra.mrb[50].mxu1 %v4098_v8 }
  0xf6   : > { %696 = vmatprep.mubr.f32.mxu1 %v5488_v0 }
  0xf7   : > { %1151 = vmatmul.mubr.f32.gmra.mrb[32].mxu0 %v4048_v1 }
  0xf8   : > { %1156 = vmatprep.mubr.f32.mxu0 %v5488_v0 }
  0xf9   : > { %697 = vmatmul.mubr.f32.gmra.mrb[52].mxu1 %v4106_v10 }
  0xfa   : > { %702 = vmatprep.mubr.f32.mxu1 %v5488_v0 }
  0xfb   : > { %1157 = vmatmul.mubr.f32.gmra.mrb[34].mxu0 %v4053_v9 }
  0xfc   : > { %1162 = vmatprep.mubr.f32.mxu0 %v5488_v0 }
  0xfd   : > { %703 = vmatmul.mubr.f32.gmra.mrb[54].mxu1 %v4113_v15 }
  0xfe   : > { %708 = vmatprep.mubr.f32.mxu1 %v5488_v0 }
  0xff   : > { %1163 = vmatmul.mubr.f32.gmra.mrb[36].mxu0 %v4058_v17 }
 0x100   : > { %1168 = vmatprep.mubr.f32.mxu0 %v5488_v0 }
 0x101   : > { %709 = vmatmul.mubr.f32.gmra.mrb[56].mxu1 %v4121_v16 }
 0x102   : > { %714 = vmatprep.mubr.f32.mxu1 %v5488_v0 }
 0x103   : > { %1169 = vmatmul.mubr.f32.gmra.mrb[38].mxu0 %v4063_v25 }
 0x104   : > { %1174 = vmatprep.mubr.f32.mxu0 %v5488_v0 }
 0x105   : > { %715 = vmatmul.mubr.f32.gmra.mrb[58].mxu1 %v4128_v22 }
 0x106   : > { %720 = vmatprep.mubr.f32.mxu1 %v5488_v0 }
 0x107   : > { %1175 = vmatmul.mubr.f32.gmra.mrb[40].mxu0 %v4068_v33 }
 0x108   : > { %1180 = vmatprep.mubr.f32.mxu0 %v5488_v0 }
 0x109   : > { %721 = vmatmul.mubr.f32.gmra.mrb[60].mxu1 %v4136_v23 }
 0x10a   : > { %726 = vmatprep.mubr.f32.mxu1 %v5488_v0 }
 0x10b   : > { %1181 = vmatmul.mubr.f32.gmra.mrb[42].mxu0 %v4073_v49 }
 0x10c   : > { %1186 = vmatprep.mubr.f32.mxu0 %v5488_v0 }
 0x10d   : > { %727 = vmatmul.mubr.f32.gmra.mrb[62].mxu1 %v4143_v29 }
 0x10e   : > { %797 = vmatprep.mubr.f32.mxu1 %v5488_v0 }
 0x10f   : > { %1187 = vmatmul.mubr.f32.gmra.mrb[44].mxu0 %v4078_v58 }
 0x110   : > { %1192 = vmatprep.mubr.f32.mxu0 %v5488_v0 }
 0x111   : > { %798 = vmatmul.mubr.f32.vlgmr.msra.gmra.mrb[64].mxu1 %v3968_v56  ;;  %v3060_v56 = vpack.c.bf16 %v352_v2, %v344_v62  ;;  %v424_v62 = vld [vmem:[#allocation5 + $0x3b0] sm:$0xff] }
 0x112   : > { %803 = vmatprep.mubr.f32.mxu1 %v5488_v0  ;;  %3053 = vmatpush1.bf16.msra.mxu1 %v3052_v36  ;;  %v400_v36 = vld [vmem:[#allocation5 + $0x2f0] sm:$0xff] }
 0x113   : > { %3055 = vmatprep.subr.bf16.mxu1 %v3054_v38  ;;  %v1805_v38 = vld [vmem:[#allocation7 + $0x168] sm:$0xff]  ;;  %1193 = vmatmul.mubr.f32.gmra.mrb[46].mxu0 %v4083_v59 }
 0x114   : > { %v3149_v50 = vpack.c.bf16 %v1805_v38, %v1804_v37  ;;  %1198 = vmatprep.mubr.f32.mxu0 %v5488_v0 }
 0x115   : > { %804 = vmatmul.mubr.f32.gmra.mrb[66].mxu1 %v3973_v63  ;;  %v3064_v63 = vpack.c.bf16 %v368_v11, %v360_v5  ;;  %v1808_v11 = vld [vmem:[#allocation7 + $0x180] sm:$0xff] }
 0x116   : > { %809 = vmatprep.mubr.f32.mxu1 %v5488_v0  ;;  %3057 = vmatpush1.bf16.msra.mxu1 %v3056_v54  ;;  %v425_v54 = vld [vmem:[#allocation5 + $0x3b8] sm:$0xff]  ;;  %v3155_v13 = vpack.c.bf16 %v1809_v12, %v1808_v11  ;;  %v3542_v11 = vld [vmem:[%s3955_s14 + $0x8] sm:$0xff] }
 0x117   : > { %3059 = vmatprep.subr.bf16.mxu1 %v3058_v57  ;;  %3150 = vmatpush1.bf16.msra.mxu0 %v3149_v50  ;;  %v433_v57 = vld [vmem:[#allocation5 + $0x3f8] sm:$0xff] }
 0x118   : > { %3151 = vmatprep.subr.bf16.mxu0 %v5486_v60  ;;  %v3078_v2 = vpack.c.bf16 %v433_v57, %v425_v54  ;;  %1199 = vmatmul.mubr.f32.gmra.mrb[48].mxu0 %v4091_v61 }
 0x119   : > { %810 = vmatmul.mubr.f32.gmra.mrb[68].mxu1 %v3978_v7  ;;  %v3068_v7 = vpack.c.bf16 %v384_v27, %v376_v26  ;;  %1204 = vmatprep.mubr.f32.mxu0 %v5488_v0 }
 0x11a   : > { %815 = vmatprep.mubr.f32.mxu1 %v5488_v0  ;;  %3061 = vmatpush1.bf16.msra.mxu1 %v3060_v56  ;;  %v1807_v56 = vld [vmem:[#allocation7 + $0x178] sm:$0xff] }
 0x11b   : > { %3063 = vmatprep.subr.bf16.mxu1 %v3062_v6  ;;  %v3152_v5 = vpack.c.bf16 %v1807_v56, %v1806_v4  ;;  %v3080_v6 = vpack.c.bf16 %v432_v3, %v424_v62  ;;  %v1763_v62 = vld [vmem:[#allocation7 + $0x18] sm:$0xff]  ;;  %v1765_v56 = vld [vmem:[#allocation7 + $0x28] sm:$0xff] }
 0x11c   : > { %1205 = vmatmul.mubr.f32.gmra.mrb[50].mxu0 %v4098_v8 }
 0x11d   : > { %816 = vmatmul.mubr.f32.gmra.mrb[70].mxu1 %v3983_v14  ;;  %v3072_v14 = vpack.c.bf16 %v400_v36, %v392_v32  ;;  %3153 = vmatpush1.bf16.msra.mxu0 %v3152_v5 }
 0x11e   : > { %821 = vmatprep.mubr.f32.mxu1 %v5488_v0  ;;  %3065 = vmatpush1.bf16.msra.mxu1 %v3064_v63 }
 0x11f   : > { %3067 = vmatprep.subr.bf16.mxu1 %v3066_v24  ;;  %3154 = vmatprep.subr.bf16.mxu0 %v5486_v60 }
 0x120   : > { %1210 = vmatprep.mubr.f32.mxu0 %v5488_v0 }
 0x121   : > { %822 = vmatmul.mubr.f32.gmra.mrb[72].mxu1 %v3988_v21  ;;  %v3076_v21 = vpack.c.bf16 %v416_v53, %v408_v52  ;;  %3156 = vmatpush1.bf16.msra.mxu0 %v3155_v13  ;;  %v1761_v53 = vld [vmem:[#allocation7 + $0x8] sm:$0xff]  ;;  %v1766_v13 = vld [vmem:[#allocation7 + $0x30] sm:$0xff] }
 0x122   : > { %827 = vmatprep.mubr.f32.mxu1 %v5488_v0  ;;  %3069 = vmatpush1.bf16.msra.mxu1 %v3068_v7  ;;  %v1823_v7 = vld [vmem:[#allocation7 + $0x1f8] sm:$0xff] }
 0x123   : > { %3071 = vmatprep.subr.bf16.mxu1 %v3070_v34  ;;  %3157 = vmatprep.subr.bf16.mxu0 %v5486_v60 }
 0x124   : > { %1211 = vmatmul.mubr.f32.gmra.mrb[52].mxu0 %v4106_v10 }
 0x125   : > { %828 = vmatmul.mubr.f32.gmra.mrb[74].mxu1 %v3993_v28  ;;  %3159 = vmatpush1.bf16.msra.mxu0 %v3158_v20 }
 0x126   : > { %833 = vmatprep.mubr.f32.mxu1 %v5488_v0  ;;  %3073 = vmatpush1.bf16.msra.mxu1 %v3072_v14 }
 0x127   : > { %3075 = vmatprep.subr.bf16.mxu1 %v3074_v51  ;;  %3160 = vmatprep.subr.bf16.mxu0 %v5486_v60 }
 0x128   : > { %1216 = vmatprep.mubr.f32.mxu0 %v5488_v0 }
 0x129   : > { %834 = vmatmul.mubr.f32.gmra.mrb[76].mxu1 %v3998_v35  ;;  %1217 = vmatmul.mubr.f32.gmra.mrb[54].mxu0 %v4113_v15 }
 0x12a   : > { %839 = vmatprep.mubr.f32.mxu1 %v5488_v0  ;;  %3077 = vmatpush1.bf16.msra.mxu1 %v3076_v21  ;;  %v1762_v21 = vld [vmem:[#allocation7 + $0x10] sm:$0xff] }
 0x12b   : > { %3079 = vmatprep.subr.bf16.mxu1 %v3078_v2  ;;  %1222 = vmatprep.mubr.f32.mxu0 %v5488_v0  ;;  %v3086_v4 = vpack.c.bf16 %v1763_v62, %v1762_v21 }
 0x12d   : > { %840 = vmatmul.mubr.f32.gmra.mrb[78].mxu1 %v4003_v40  ;;  %1223 = vmatmul.mubr.f32.gmra.mrb[56].mxu0 %v4121_v16 }
 0x12e   : > { %845 = vmatprep.mubr.f32.mxu1 %v5488_v0  ;;  %3081 = vmatpush1.bf16.msra.mxu1 %v3080_v6 }
 0x12f   : > { %3082 = vmatprep.subr.bf16.mxu1 %v5486_v60  ;;  %1228 = vmatprep.mubr.f32.mxu0 %v5488_v0 }
 0x131   : > { %846 = vmatmul.mubr.f32.gmra.mrb[80].mxu1 %v4008_v42  ;;  %v1812_v42 = vld [vmem:[#allocation7 + $0x1a0] sm:$0xff]  ;;  %1229 = vmatmul.mubr.f32.gmra.mrb[58].mxu0 %v4128_v22 }
 0x132   : > { %851 = vmatprep.mubr.f32.mxu1 %v5488_v0  ;;  %1234 = vmatprep.mubr.f32.mxu0 %v5488_v0 }
 0x135   : > { %852 = vmatmul.mubr.f32.gmra.mrb[82].mxu1 %v4013_v43  ;;  %v1813_v43 = vld [vmem:[#allocation7 + $0x1a8] sm:$0xff]  ;;  %1235 = vmatmul.mubr.f32.gmra.mrb[60].mxu0 %v4136_v23 }
 0x136   : > { %857 = vmatprep.mubr.f32.mxu1 %v5488_v0  ;;  %v3161_v63 = vpack.c.bf16 %v1813_v43, %v1812_v42  ;;  %1240 = vmatprep.mubr.f32.mxu0 %v5488_v0  ;;  %v3543_v42 = vld [vmem:[%s3955_s14 + $0x10] sm:$0xff]  ;;  %v3092_v43 = vpack.c.bf16 %v1767_v18, %v1766_v13 }
 0x138   : > { %3162 = vmatpush1.bf16.msra.mxu0 %v3161_v63  ;;  %v1768_v63 = vld [vmem:[#allocation7 + $0x40] sm:$0xff] }
 0x139   : > { %858 = vmatmul.mubr.f32.gmra.mrb[84].mxu1 %v4018_v44  ;;  %3163 = vmatprep.subr.bf16.mxu0 %v5486_v60  ;;  %v1814_v44 = vld [vmem:[#allocation7 + $0x1b0] sm:$0xff] }
 0x13a   : > { %863 = vmatprep.mubr.f32.mxu1 %v5488_v0  ;;  %1241 = vmatmul.mubr.f32.gmra.mrb[62].mxu0 %v4143_v29 }
 0x13d   : > { %864 = vmatmul.mubr.f32.gmra.mrb[86].mxu1 %v4023_v45  ;;  %v1815_v45 = vld [vmem:[#allocation7 + $0x1b8] sm:$0xff] }
 0x13e   : > { %869 = vmatprep.mubr.f32.mxu1 %v5488_v0  ;;  %v3164_v24 = vpack.c.bf16 %v1815_v45, %v1814_v44  ;;  %v1769_v44 = vld [vmem:[#allocation7 + $0x48] sm:$0xff] }
 0x140   : > { %3165 = vmatpush1.bf16.msra.mxu0 %v3164_v24 }
 0x141   : > { %870 = vmatmul.mubr.f32.gmra.mrb[88].mxu1 %v4028_v46  ;;  %3166 = vmatprep.subr.bf16.mxu0 %v5486_v60  ;;  %v1816_v46 = vld [vmem:[#allocation7 + $0x1c0] sm:$0xff] }
 0x142   : > { %875 = vmatprep.mubr.f32.mxu1 %v5488_v0 }
 0x145   : > { %876 = vmatmul.mubr.f32.gmra.mrb[90].mxu1 %v4033_v47  ;;  %v1817_v47 = vld [vmem:[#allocation7 + $0x1c8] sm:$0xff] }
 0x146   : > { %881 = vmatprep.mubr.f32.mxu1 %v5488_v0  ;;  %v3167_v26 = vpack.c.bf16 %v1817_v47, %v1816_v46  ;;  %v3544_v46 = vld [vmem:[%s3955_s14 + $0x18] sm:$0xff]  ;;  %v3095_v47 = vpack.c.bf16 %v1769_v44, %v1768_v63  ;;  %v1781_v63 = vld [vmem:[#allocation7 + $0xa8] sm:$0xff] }
 0x148   : > { %3168 = vmatpush1.bf16.msra.mxu0 %v3167_v26  ;;  %v1770_v26 = vld [vmem:[#allocation7 + $0x50] sm:$0xff] }
 0x149   : > { %882 = vmatmul.mubr.f32.gmra.mrb[92].mxu1 %v4038_v48  ;;  %3169 = vmatprep.subr.bf16.mxu0 %v5486_v60  ;;  %v1818_v48 = vld [vmem:[#allocation7 + $0x1d0] sm:$0xff] }
 0x14a   : > { %887 = vmatprep.mubr.f32.mxu1 %v5488_v0 }
 0x14d   : > { %888 = vmatmul.mubr.f32.gmra.mrb[94].mxu1 %v4043_v55  ;;  %v1819_v55 = vld [vmem:[#allocation7 + $0x1d8] sm:$0xff] }
 0x14e   : > { %893 = vmatprep.mubr.f32.mxu1 %v5488_v0  ;;  %v3170_v27 = vpack.c.bf16 %v1819_v55, %v1818_v48  ;;  %v1771_v48 = vld [vmem:[#allocation7 + $0x58] sm:$0xff] }
 0x150   : > { %3171 = vmatpush1.bf16.msra.mxu0 %v3170_v27 }
 0x151   : > { %894 = vmatmul.mubr.f32.gmra.mrb[96].mxu1 %v4048_v1  ;;  %3172 = vmatprep.subr.bf16.mxu0 %v5486_v60  ;;  %v1820_v1 = vld [vmem:[#allocation7 + $0x1e0] sm:$0xff] }
 0x152   : > { %899 = vmatprep.mubr.f32.mxu1 %v5488_v0 }
 0x155   : > { %900 = vmatmul.mubr.f32.gmra.mrb[98].mxu1 %v4053_v9  ;;  %v1821_v9 = vld [vmem:[#allocation7 + $0x1e8] sm:$0xff] }
 0x156   : > { %905 = vmatprep.mubr.f32.mxu1 %v5488_v0  ;;  %v3173_v30 = vpack.c.bf16 %v1821_v9, %v1820_v1  ;;  %v3545_v1 = vld [vmem:[%s3955_s14 + $0x20] sm:$0xff]  ;;  %v3098_v9 = vpack.c.bf16 %v1771_v48, %v1770_v26  ;;  %v1782_v48 = vld [vmem:[#allocation7 + $0xb0] sm:$0xff] }
 0x158   : > { %3174 = vmatpush1.bf16.msra.mxu0 %v3173_v30  ;;  %v1772_v30 = vld [vmem:[#allocation7 + $0x60] sm:$0xff] }
 0x159   : > { %906 = vmatmul.mubr.f32.gmra.mrb[100].mxu1 %v4058_v17  ;;  %3175 = vmatprep.subr.bf16.mxu0 %v5486_v60 }
 0x15a   : > { %911 = vmatprep.mubr.f32.mxu1 %v5488_v0 }
 0x15d   : > { %912 = vmatmul.mubr.f32.gmra.mrb[102].mxu1 %v4063_v25 }
 0x15e   : > { %917 = vmatprep.mubr.f32.mxu1 %v5488_v0 }
 0x161   : > { %918 = vmatmul.mubr.f32.gmra.mrb[104].mxu1 %v4068_v33  ;;  %v3176_v33 = vpack.c.bf16 %v1823_v7, %v1822_v31  ;;  %v1773_v31 = vld [vmem:[#allocation7 + $0x68] sm:$0xff] }
 0x162   : > { %923 = vmatprep.mubr.f32.mxu1 %v5488_v0 }
 0x163   : > { %3177 = vmatpush1.bf16.msra.mxu0 %v3176_v33 }
 0x164   : > { %v4246_v17 = vpop.f32.mrb[0].mxu1  ;;  %3178 = vmatprep.subr.bf16.mxu0 %v5486_v60 }
 0x165   : > { %v4249_v25 = vpop.f32.mrb[1].mxu1  ;;  %924 = vmatmul.mubr.f32.gmra.mrb[106].mxu1 %v4073_v49 }
 0x166   : > { %929 = vmatprep.mubr.f32.mxu1 %v5488_v0 }
 0x168   : > { %v4254_v32 = vpop.f32.mrb[2].mxu1 }
 0x169   : > { %v4256_v34 = vpop.f32.mrb[3].mxu1  ;;  %930 = vmatmul.mubr.f32.gmra.mrb[108].mxu1 %v4078_v58 }
 0x16a   : > { %935 = vmatprep.mubr.f32.mxu1 %v5488_v0 }
 0x16c   : > { %v4262_v49 = vpop.f32.mrb[4].mxu1 }
 0x16d   : > { %v4264_v36 = vpop.f32.mrb[5].mxu1  ;;  %936 = vmatmul.mubr.f32.gmra.mrb[110].mxu1 %v4083_v59 }
 0x16e   : > { %941 = vmatprep.mubr.f32.mxu1 %v5488_v0 }
 0x170   : > { %v4268_v37 = vpop.f32.mrb[6].mxu1 }
 0x171   : > { %v4270_v38 = vpop.f32.mrb[7].mxu1  ;;  %942 = vmatmul.mubr.f32.gmra.mrb[112].mxu1 %v4091_v61 }
 0x172   : > { %947 = vmatprep.mubr.f32.mxu1 %v5488_v0 }
 0x174   : > { %v4274_v58 = vpop.f32.mrb[8].mxu1 }
 0x175   : > { %v4276_v39 = vpop.f32.mrb[9].mxu1  ;;  %948 = vmatmul.mubr.f32.gmra.mrb[114].mxu1 %v4098_v8 }
 0x176   : > { %953 = vmatprep.mubr.f32.mxu1 %v5488_v0 }
 0x178   : > { %v4280_v41 = vpop.f32.mrb[10].mxu1 }
 0x179   : > { %v4282_v59 = vpop.f32.mrb[11].mxu1  ;;  %954 = vmatmul.mubr.f32.gmra.mrb[116].mxu1 %v4106_v10 }
 0x17a   : > { %959 = vmatprep.mubr.f32.mxu1 %v5488_v0 }
 0x17c   : > { %v4286_v50 = vpop.f32.mrb[12].mxu1 }
 0x17d   : > { %v4288_v61 = vpop.f32.mrb[13].mxu1  ;;  %960 = vmatmul.mubr.f32.gmra.mrb[118].mxu1 %v4113_v15 }
 0x17e   : > { %965 = vmatprep.mubr.f32.mxu1 %v5488_v0 }
 0x180   : > { %v4292_v14 = vpop.f32.mrb[14].mxu1 }
 0x181   : > { %v4294_v8 = vpop.f32.mrb[15].mxu1  ;;  %966 = vmatmul.mubr.f32.gmra.mrb[120].mxu1 %v4121_v16  ;;  %v1760_v16 = vld [vmem:[#allocation7] sm:$0xff] }
 0x182   : > { %971 = vmatprep.mubr.f32.mxu1 %v5488_v0 }
 0x184   : > { %v4298_v51 = vpop.f32.mrb[16].mxu1 }
 0x185   : > { %v4300_v10 = vpop.f32.mrb[17].mxu1  ;;  %972 = vmatmul.mubr.f32.gmra.mrb[122].mxu1 %v4128_v22  ;;  %v3083_v22 = vpack.c.bf16 %v1761_v53, %v1760_v16  ;;  %v3101_v16 = vpack.c.bf16 %v1773_v31, %v1772_v30  ;;  %v1774_v53 = vld [vmem:[#allocation7 + $0x70] sm:$0xff] }
 0x186   : > { %977 = vmatprep.mubr.f32.mxu1 %v5488_v0  ;;  %v3548_v31 = vld [vmem:[%s3955_s14 + $0x50] sm:$0xff] }
 0x188   : > { %v4304_v15 = vpop.f32.mrb[18].mxu1 }
 0x189   : > { %v4306_v52 = vpop.f32.mrb[19].mxu1  ;;  %978 = vmatmul.mubr.f32.gmra.mrb[124].mxu1 %v4136_v23  ;;  %v3541_v23 = vld [vmem:[%s3955_s14] sm:$0xff] }
 0x18a   : > { %983 = vmatprep.mubr.f32.mxu1 %v5488_v0 }
 0x18c   : > { %v4310_v54 = vpop.f32.mrb[20].mxu1 }
 0x18d   : > { %v4312_v57 = vpop.f32.mrb[21].mxu1  ;;  %984 = vmatmul.mubr.f32.gmra.mrb[126].mxu1 %v4143_v29  ;;  %v1764_v29 = vld [vmem:[#allocation7 + $0x20] sm:$0xff] }
 0x18e   : > { %1311 = vmatprep.mubr.f32.mxu1 %v5488_v0  ;;  %v3089_v12 = vpack.c.bf16 %v1765_v56, %v1764_v29 }
 0x190   : > { %v4316_v2 = vpop.f32.mrb[22].mxu1 }
 0x191   : > { %v4318_v3 = vpop.f32.mrb[23].mxu1  ;;  %1312 = vmatmul.mubr.f32.vlgmr.msra.gmra.mrb[128].mxu1 %v3541_v23 }
 0x192   : > { %1317 = vmatprep.mubr.f32.mxu1 %v5488_v0  ;;  %3084 = vmatpush1.bf16.msra.mxu1 %v3083_v22  ;;  %v1775_v22 = vld [vmem:[#allocation7 + $0x78] sm:$0xff] }
 0x193   : > { %3085 = vmatprep.subr.bf16.mxu1 %v5486_v60  ;;  %v3104_v23 = vpack.c.bf16 %v1775_v22, %v1774_v53  ;;  %v1784_v53 = vld [vmem:[#allocation7 + $0xc0] sm:$0xff]  ;;  %v1785_v22 = vld [vmem:[#allocation7 + $0xc8] sm:$0xff] }
 0x194   : > { %v4323_v5 = vpop.f32.mrb[24].mxu1 }
 0x195   : > { %v4325_v6 = vpop.f32.mrb[25].mxu1  ;;  %1318 = vmatmul.mubr.f32.gmra.mrb[130].mxu1 %v3542_v11 }
 0x196   : > { %1323 = vmatprep.mubr.f32.mxu1 %v5488_v0  ;;  %3087 = vmatpush1.bf16.msra.mxu1 %v3086_v4  ;;  %v1777_v4 = vld [vmem:[#allocation7 + $0x88] sm:$0xff] }
 0x197   : > { %3088 = vmatprep.subr.bf16.mxu1 %v5486_v60 }
 0x198   : > { %v4330_v19 = vpop.f32.mrb[26].mxu1 }
 0x199   : > { %v4332_v20 = vpop.f32.mrb[27].mxu1  ;;  %1324 = vmatmul.mubr.f32.gmra.mrb[132].mxu1 %v3543_v42  ;;  %v3546_v42 = vld [vmem:[%s3955_s14 + $0x40] sm:$0xff] }
 0x19a   : > { %1329 = vmatprep.mubr.f32.mxu1 %v5488_v0  ;;  %3090 = vmatpush1.bf16.msra.mxu1 %v3089_v12  ;;  %v1779_v12 = vld [vmem:[#allocation7 + $0x98] sm:$0xff] }
 0x19b   : > { %3091 = vmatprep.subr.bf16.mxu1 %v5486_v60 }
 0x19c   : > { %v4337_v45 = vpop.f32.mrb[28].mxu1 }
 0x19d   : > { %v4339_v24 = vpop.f32.mrb[29].mxu1  ;;  %1330 = vmatmul.mubr.f32.gmra.mrb[134].mxu1 %v3544_v46 }
 0x19e   : > { %1335 = vmatprep.mubr.f32.mxu1 %v5488_v0  ;;  %3093 = vmatpush1.bf16.msra.mxu1 %v3092_v43 }
 0x19f   : > { %3094 = vmatprep.subr.bf16.mxu1 %v5486_v60 }
 0x1a0   : > { %v4344_v55 = vpop.f32.mrb[30].mxu1 }
 0x1a1   : > { %v4346_v27 = vpop.f32.mrb[31].mxu1  ;;  %1336 = vmatmul.mubr.f32.gmra.mrb[136].mxu1 %v3545_v1  ;;  %v1783_v1 = vld [vmem:[#allocation7 + $0xb8] sm:$0xff] }
 0x1a2   : > { %1341 = vmatprep.mubr.f32.mxu1 %v5488_v0  ;;  %3096 = vmatpush1.bf16.msra.mxu1 %v3095_v47  ;;  %v3547_v47 = vld [vmem:[%s3955_s14 + $0x48] sm:$0xff] }
 0x1a3   : > { %3097 = vmatprep.subr.bf16.mxu1 %v5486_v60 }
 0x1a4   : > { %v4351_v7 = vpop.f32.mrb[32].mxu1 }
 0x1a5   : > { %v4353_v33 = vpop.f32.mrb[33].mxu1  ;;  %1342 = vmatmul.mubr.f32.gmra.mrb[138].mxu1 %v3993_v28  ;;  %v1776_v28 = vld [vmem:[#allocation7 + $0x80] sm:$0xff] }
 0x1a6   : > { %1347 = vmatprep.mubr.f32.mxu1 %v5488_v0  ;;  %3099 = vmatpush1.bf16.msra.mxu1 %v3098_v9  ;;  %v3107_v11 = vpack.c.bf16 %v1777_v4, %v1776_v28  ;;  %v3549_v4 = vld [vmem:[%s3955_s14 + $0x58] sm:$0xff] }
 0x1a7   : > { %3100 = vmatprep.subr.bf16.mxu1 %v5486_v60 }
 0x1a8   : > { %v4358_v21 = vpop.f32.mrb[34].mxu1 }
 0x1a9   : > { %v4360_v62 = vpop.f32.mrb[35].mxu1  ;;  %1348 = vmatmul.mubr.f32.gmra.mrb[140].mxu1 %v3998_v35  ;;  %v1778_v35 = vld [vmem:[#allocation7 + $0x90] sm:$0xff] }
 0x1aa   : > { %1353 = vmatprep.mubr.f32.mxu1 %v5488_v0  ;;  %3102 = vmatpush1.bf16.msra.mxu1 %v3101_v16  ;;  %v3110_v43 = vpack.c.bf16 %v1779_v12, %v1778_v35  ;;  %v3116_v16 = vpack.c.bf16 %v1783_v1, %v1782_v48  ;;  %v3119_v35 = vpack.c.bf16 %v1785_v22, %v1784_v53 }
 0x1ab   : > { %3103 = vmatprep.subr.bf16.mxu1 %v5486_v60 }
 0x1ac   : > { %v4365_v29 = vpop.f32.mrb[36].mxu1 }
 0x1ad   : > { %v4367_v56 = vpop.f32.mrb[37].mxu1  ;;  %1354 = vmatmul.mubr.f32.gmra.mrb[142].mxu1 %v4003_v40  ;;  %v1780_v40 = vld [vmem:[#allocation7 + $0xa0] sm:$0xff] }
 0x1ae   : > { %1359 = vmatprep.mubr.f32.mxu1 %v5488_v0  ;;  %3105 = vmatpush1.bf16.msra.mxu1 %v3104_v23  ;;  %v3113_v26 = vpack.c.bf16 %v1781_v63, %v1780_v40 }
 0x1af   : > { %3106 = vmatprep.subr.bf16.mxu1 %v5486_v60 }
 0x1b0   : > { %v4372_v13 = vpop.f32.mrb[38].mxu1 }
 0x1b1   : > { %v4374_v18 = vpop.f32.mrb[39].mxu1  ;;  %1360 = vmatmul.mubr.f32.gmra.mrb[144].mxu1 %v3546_v42  ;;  %v1786_v42 = vld [vmem:[#allocation7 + $0xd0] sm:$0xff] }
 0x1b2   : > { %1365 = vmatprep.mubr.f32.mxu1 %v5488_v0  ;;  %3108 = vmatpush1.bf16.msra.mxu1 %v3107_v11  ;;  %v4398_v11 = vpop.f32.mrb[0].mxu0 }
 0x1b3   : > { %3109 = vmatprep.subr.bf16.mxu1 %v5486_v60  ;;  %5508 = vst [vmem:[#allocation18_spill] sm:$0xff] %v4398_v11  ;;  %v4401_v12 = vpop.f32.mrb[1].mxu0 }
 0x1b4   : > { %v4379_v44 = vpop.f32.mrb[40].mxu1  ;;  %5509 = vst [vmem:[#allocation19_spill] sm:$0xff] %v4401_v12 }
 0x1b5   : > { %5502 = vst [vmem:[#allocation12_spill] sm:$0xff] %v4379_v44  ;;  %v4381_v46 = vpop.f32.mrb[41].mxu1  ;;  %1366 = vmatmul.mubr.f32.gmra.mrb[146].mxu1 %v3547_v47  ;;  %v3550_v47 = vld [vmem:[%s3955_s14 + $0x60] sm:$0xff]  ;;  %v5552_v44 = vmov 0.0|0.0  }
 0x1b6   : > { %5503 = vst [vmem:[#allocation13_spill] sm:$0xff] %v4381_v46  ;;  %1371 = vmatprep.mubr.f32.mxu1 %v5488_v0  ;;  %3111 = vmatpush1.bf16.msra.mxu1 %v3110_v43  ;;  %v1787_v43 = vld [vmem:[#allocation7 + $0xd8] sm:$0xff]  ;;  %v3566_v46 = vld [vmem:[%s3955_s14 + $0xe0] sm:$0xff] }
 0x1b7   : > { %3112 = vmatprep.subr.bf16.mxu1 %v5486_v60  ;;  %v3122_v48 = vpack.c.bf16 %v1787_v43, %v1786_v42  ;;  %v1791_v42 = vld [vmem:[#allocation7 + $0xf8] sm:$0xff] }
 0x1b8   : > { %v4386_v9 = vpop.f32.mrb[42].mxu1 }
 0x1b9   : > { %5504 = vst [vmem:[#allocation14_spill] sm:$0xff] %v4386_v9  ;;  %v4388_v30 = vpop.f32.mrb[43].mxu1  ;;  %1372 = vmatmul.mubr.f32.gmra.mrb[148].mxu1 %v3548_v31  ;;  %v1788_v31 = vld [vmem:[#allocation7 + $0xe0] sm:$0xff]  ;;  %v1827_v9 = vld [vmem:[#allocation7 + $0x218] sm:$0xff] }
 0x1ba   : > { %5505 = vst [vmem:[#allocation15_spill] sm:$0xff] %v4388_v30  ;;  %1377 = vmatprep.mubr.f32.mxu1 %v5488_v0  ;;  %3114 = vmatpush1.bf16.msra.mxu1 %v3113_v26  ;;  %v4409_v26 = vpop.f32.mrb[2].mxu0  ;;  %v3561_v30 = vld [vmem:[%s3955_s14 + $0xb8] sm:$0xff] }
 0x1bb   : > { %3115 = vmatprep.subr.bf16.mxu1 %v5486_v60  ;;  %5512 = vst [vmem:[#allocation22_spill] sm:$0xff] %v4409_v26  ;;  %v4412_v1 = vpop.f32.mrb[3].mxu0 }
 0x1bc   : > { %v4393_v23 = vpop.f32.mrb[44].mxu1  ;;  %5513 = vst [vmem:[#allocation23_spill] sm:$0xff] %v4412_v1  ;;  %v4421_v26 = vpop.f32.mrb[4].mxu0  ;;  %v1825_v1 = vld [vmem:[#allocation7 + $0x208] sm:$0xff] }
 0x1bd   : > { %5506 = vst [vmem:[#allocation16_spill] sm:$0xff] %v4393_v23  ;;  %v4395_v28 = vpop.f32.mrb[45].mxu1  ;;  %1378 = vmatmul.mubr.f32.gmra.mrb[150].mxu1 %v3549_v4  ;;  %v3551_v4 = vld [vmem:[%s3955_s14 + $0x68] sm:$0xff]  ;;  %5516 = vst [vmem:[#allocation26_spill] sm:$0xff] %v4421_v26  ;;  %v4424_v43 = vpop.f32.mrb[5].mxu0 }
 0x1be   : > { %5507 = vst [vmem:[#allocation17_spill] sm:$0xff] %v4395_v28  ;;  %1383 = vmatprep.mubr.f32.mxu1 %v5488_v0  ;;  %3117 = vmatpush1.bf16.msra.mxu1 %v3116_v16  ;;  %v1789_v16 = vld [vmem:[#allocation7 + $0xe8] sm:$0xff]  ;;  %5517 = vst [vmem:[#allocation27_spill] sm:$0xff] %v4424_v43  ;;  %v3560_v28 = vld [vmem:[%s3955_s14 + $0xb0] sm:$0xff] }
 0x1bf   : > { %3118 = vmatprep.subr.bf16.mxu1 %v5486_v60 }
 0x1c0   : > { %v4404_v40 = vpop.f32.mrb[46].mxu1 }
 0x1c1   : > { %5510 = vst [vmem:[#allocation20_spill] sm:$0xff] %v4404_v40  ;;  %v4406_v63 = vpop.f32.mrb[47].mxu1  ;;  %1384 = vmatmul.mubr.f32.gmra.mrb[152].mxu1 %v3550_v47  ;;  %v3125_v47 = vpack.c.bf16 %v1789_v16, %v1788_v31  ;;  %v4432_v31 = vpop.f32.mrb[6].mxu0 }
 0x1c2   : > { %5511 = vst [vmem:[#allocation21_spill] sm:$0xff] %v4406_v63  ;;  %1389 = vmatprep.mubr.f32.mxu1 %v5488_v0  ;;  %3120 = vmatpush1.bf16.msra.mxu1 %v3119_v35  ;;  %v1790_v35 = vld [vmem:[#allocation7 + $0xf0] sm:$0xff]  ;;  %5520 = vst [vmem:[#allocation30_spill] sm:$0xff] %v4432_v31  ;;  %v4435_v16 = vpop.f32.mrb[7].mxu0 }
 0x1c3   : > { %3121 = vmatprep.subr.bf16.mxu1 %v5486_v60  ;;  %5521 = vst [vmem:[#allocation31_spill] sm:$0xff] %v4435_v16 }
 0x1c4   : > { %v4415_v53 = vpop.f32.mrb[48].mxu1 }
 0x1c5   : > { %5514 = vst [vmem:[#allocation24_spill] sm:$0xff] %v4415_v53  ;;  %v4417_v22 = vpop.f32.mrb[49].mxu1  ;;  %1390 = vmatmul.mubr.f32.gmra.mrb[154].mxu1 %v3551_v4 }
 0x1c6   : > { %5515 = vst [vmem:[#allocation25_spill] sm:$0xff] %v4417_v22  ;;  %1395 = vmatprep.mubr.f32.mxu1 %v5488_v0  ;;  %3123 = vmatpush1.bf16.msra.mxu1 %v3122_v48  ;;  %v3552_v22 = vld [vmem:[%s3955_s14 + $0x70] sm:$0xff]  ;;  %v3128_v48 = vpack.c.bf16 %v1791_v42, %v1790_v35 }
 0x1c7   : > { %3124 = vmatprep.subr.bf16.mxu1 %v5486_v60 }
 0x1c8   : > { %v4426_v40 = vpop.f32.mrb[50].mxu1 }
 0x1c9   : > { %5518 = vst [vmem:[#allocation28_spill] sm:$0xff] %v4426_v40  ;;  %v4428_v53 = vpop.f32.mrb[51].mxu1  ;;  %1396 = vmatmul.mubr.f32.gmra.mrb[156].mxu1 %v3552_v22  ;;  %v3553_v40 = vld [vmem:[%s3955_s14 + $0x78] sm:$0xff]  ;;  %v4443_v22 = vpop.f32.mrb[8].mxu0 }
 0x1ca   : > { %5519 = vst [vmem:[#allocation29_spill] sm:$0xff] %v4428_v53  ;;  %1401 = vmatprep.mubr.f32.mxu1 %v5488_v0  ;;  %3126 = vmatpush1.bf16.msra.mxu1 %v3125_v47  ;;  %5524 = vst [vmem:[#allocation34_spill] sm:$0xff] %v4443_v22  ;;  %v4445_v47 = vpop.f32.mrb[9].mxu0  ;;  %v3555_v22 = vld [vmem:[%s3955_s14 + $0x88] sm:$0xff] }
 0x1cb   : > { %3127 = vmatprep.subr.bf16.mxu1 %v5486_v60  ;;  %5525 = vst [vmem:[#allocation35_spill] sm:$0xff] %v4445_v47  ;;  %v3554_v60 = vld [vmem:[%s3955_s14 + $0x80] sm:$0xff] }
 0x1cc   : > { %v4437_v4 = vpop.f32.mrb[52].mxu1 }
 0x1cd   : > { %5522 = vst [vmem:[#allocation32_spill] sm:$0xff] %v4437_v4  ;;  %v4439_v26 = vpop.f32.mrb[53].mxu1  ;;  %1402 = vmatmul.mubr.f32.gmra.mrb[158].mxu1 %v3553_v40  ;;  %v4453_v4 = vpop.f32.mrb[10].mxu0 }
 0x1ce   : > { %5523 = vst [vmem:[#allocation33_spill] sm:$0xff] %v4439_v26  ;;  %1407 = vmatprep.mubr.f32.mxu1 %v5488_v0  ;;  %3129 = vmatpush1.bf16.msra.mxu1 %v3128_v48  ;;  %5528 = vst [vmem:[#allocation38_spill] sm:$0xff] %v4453_v4  ;;  %v4455_v31 = vpop.f32.mrb[11].mxu0  ;;  %v3556_v4 = vld [vmem:[%s3955_s14 + $0x90] sm:$0xff] }
 0x1cf   : > { %5529 = vst [vmem:[#allocation39_spill] sm:$0xff] %v4455_v31 }
 0x1d0   : > { %v4447_v35 = vpop.f32.mrb[54].mxu1 }
 0x1d1   : > { %5526 = vst [vmem:[#allocation36_spill] sm:$0xff] %v4447_v35  ;;  %v4449_v42 = vpop.f32.mrb[55].mxu1  ;;  %1408 = vmatmul.mubr.f32.gmra.mrb[160].mxu1 %v3554_v60  ;;  %v4463_v35 = vpop.f32.mrb[12].mxu0 }
 0x1d2   : > { %5527 = vst [vmem:[#allocation37_spill] sm:$0xff] %v4449_v42  ;;  %1413 = vmatprep.mubr.f32.mxu1 %v5488_v0  ;;  %5532 = vst [vmem:[#allocation42_spill] sm:$0xff] %v4463_v35  ;;  %v436_v42 = vlaneseq  ;;  %v4465_v47 = vpop.f32.mrb[13].mxu0 }
 0x1d3   : > { %5533 = vst [vmem:[#allocation43_spill] sm:$0xff] %v4465_v47  ;;  %v3557_v47 = vld [vmem:[%s3955_s14 + $0x98] sm:$0xff] }
 0x1d4   : > { %v4457_v40 = vpop.f32.mrb[56].mxu1 }
 0x1d5   : > { %5530 = vst [vmem:[#allocation40_spill] sm:$0xff] %v4457_v40  ;;  %v4459_v48 = vpop.f32.mrb[57].mxu1  ;;  %1414 = vmatmul.mubr.f32.gmra.mrb[162].mxu1 %v3555_v22  ;;  %v4473_v40 = vpop.f32.mrb[14].mxu0 }
 0x1d6   : > { %5531 = vst [vmem:[#allocation41_spill] sm:$0xff] %v4459_v48  ;;  %1419 = vmatprep.mubr.f32.mxu1 %v5488_v0  ;;  %5536 = vst [vmem:[#allocation46_spill] sm:$0xff] %v4473_v40  ;;  %v4475_v48 = vshrl.u32 %v436_v42, 7  ;;  %v4477_v22 = vpop.f32.mrb[15].mxu0  ;;  %v4494_v42 = vld [vmem:[%s5479_s2] sm:$0xff] }
 0x1d7   : > { %5538 = vst [vmem:[#allocation48_spill] sm:$0xff] %v4477_v22  ;;  %v5545_v22 = vmov 0.0  }
 0x1d8   : > { %v4467_v60 = vpop.f32.mrb[58].mxu1  ;;  %5537 = vst [vmem:[#allocation47_spill] sm:$0xff] %v4475_v48 }
 0x1d9   : > { %5534 = vst [vmem:[#allocation44_spill] sm:$0xff] %v4467_v60  ;;  %v4469_v26 = vpop.f32.mrb[59].mxu1  ;;  %1420 = vmatmul.mubr.f32.gmra.mrb[164].mxu1 %v3556_v4  ;;  %v446_v60 = vsub.s32 2, %v4475_v48  ;;  %v450_v4 = vsub.s32 3, %v4475_v48 }
 0x1da   : > { %5535 = vst [vmem:[#allocation45_spill] sm:$0xff] %v4469_v26  ;;  %1425 = vmatprep.mubr.f32.mxu1 %v5488_v0  ;;  %v4487_v26 = vpop.f32.mrb[16].mxu0 }
 0x1db   : > { %5541 = vst [vmem:[#allocation51_spill] sm:$0xff] %v4487_v26  ;;  %v4489_v40 = vpop.f32.mrb[17].mxu0  ;;  %v4506_v26 = vrot.slane %v4494_v42, %v450_v4 }
 0x1dc   : > { %v4479_v31 = vpop.f32.mrb[60].mxu1  ;;  %5542 = vst [vmem:[#allocation52_spill] sm:$0xff] %v4489_v40  ;;  %v4508_v40 = vpop.f32.mrb[18].mxu0 }
 0x1dd   : > { %5539 = vst [vmem:[#allocation49_spill] sm:$0xff] %v4479_v31  ;;  %v4481_v35 = vpop.f32.mrb[61].mxu1  ;;  %1426 = vmatmul.mubr.f32.gmra.mrb[166].mxu1 %v3557_v47  ;;  %v3558_v47 = vld [vmem:[%s3955_s14 + $0xa0] sm:$0xff]  ;;  %5546 = vst [vmem:[#allocation55_spill] sm:$0xff] %v4508_v40  ;;  %v4510_v16 = vpop.f32.mrb[19].mxu0 }
 0x1de   : > { %5540 = vst [vmem:[#allocation50_spill] sm:$0xff] %v4481_v35  ;;  %1431 = vmatprep.mubr.f32.mxu1 %v5488_v0  ;;  %v4502_v0 = vrot.slane %v4494_v42, %v446_v60  ;;  %5547 = vst [vmem:[#allocation56_spill] sm:$0xff] %v4510_v16  ;;  %v4516_v11 = vpop.f32.mrb[20].mxu0 }
 0x1df   : > { %5548 = vst [vmem:[#allocation57_spill] sm:$0xff] %v4516_v11  ;;  %v4518_v23 = vpop.f32.mrb[21].mxu0 }
 0x1e0   : > { %v4496_v31 = vpop.f32.mrb[62].mxu1  ;;  %5549 = vst [vmem:[#allocation58_spill] sm:$0xff] %v4518_v23 }
 0x1e1   : > { %5543 = vst [vmem:[#allocation53_spill] sm:$0xff] %v4496_v31  ;;  %v4498_v35 = vpop.f32.mrb[63].mxu1  ;;  %1432 = vmatmul.mubr.f32.gmra.mrb[168].mxu1 %v3558_v47  ;;  %v1824_v47 = vld [vmem:[#allocation7 + $0x200] sm:$0xff] }
 0x1e2   : > { %5544 = vst [vmem:[#allocation54_spill] sm:$0xff] %v4498_v35  ;;  %1437 = vmatprep.mubr.f32.mxu1 %v5545_v22  ;;  %v3559_v35 = vld [vmem:[%s3955_s14 + $0xa8] sm:$0xff]  ;;  %v3179_v40 = vpack.c.bf16 %v1825_v1, %v1824_v47 }
 0x1e4   : > { %v799_v53 = vpop.f32.mrb[64].mxu1 }
 0x1e5   : > { %v800_v43 = vadd.f32 %v799_v53, %v4502_v0  ;;  %v801_v31 = vpop.f32.mrb[65].mxu1  ;;  %1438 = vmatmul.mubr.f32.gmra.mrb[170].mxu1 %v3559_v35  ;;  %v1826_v35 = vld [vmem:[#allocation7 + $0x210] sm:$0xff] }
 0x1e6   : > { %v802_v60 = vadd.f32 %v801_v31, %v4506_v26  ;;  %1443 = vmatprep.mubr.f32.mxu1 %v5545_v22 }
 0x1e7   : > { %v1506_v16 = vmax.f32 %v800_v43, 0.0  ;;  %v3182_v43 = vpack.c.bf16 %v1827_v9, %v1826_v35 }
 0x1e8   : > { %v1507_v4 = vmax.f32 %v802_v60, 0.0  ;;  %v805_v63 = vpop.f32.mrb[66].mxu1  ;;  %v4524_v60 = vpop.f32.mrb[22].mxu0 }
 0x1e9   : > { %v806_v53 = vadd.f32 %v805_v63, %v4502_v0  ;;  %v807_v12 = vpop.f32.mrb[67].mxu1  ;;  %1444 = vmatmul.mubr.f32.gmra.mrb[172].mxu1 %v3560_v28  ;;  %5550 = vst [vmem:[#allocation59_spill] sm:$0xff] %v4524_v60  ;;  %v4526_v11 = vpop.f32.mrb[23].mxu0 }
 0x1ea   : > { %v808_v31 = vadd.f32 %v807_v12, %v4506_v26  ;;  %2184 = vmatprep.mubr.f32.mxu0 %v1507_v4  ;;  %1449 = vmatprep.mubr.f32.mxu1 %v5545_v22  ;;  %5551 = vst [vmem:[#allocation60_spill] sm:$0xff] %v4526_v11  ;;  %v1828_v12 = vld [vmem:[#allocation7 + $0x220] sm:$0xff]  ;;  %v1829_v4 = vld [vmem:[#allocation7 + $0x228] sm:$0xff]  ;;  %v4533_v9 = vpop.f32.mrb[24].mxu0 }
 0x1eb   : > { %2185 = vmatmul.mubr.f32.vlgmr.msra.gmra.mrb[64].mxu0 %v1506_v16  ;;  %v1514_v63 = vmax.f32 %v806_v53, 0.0  ;;  %5553 = vst [vmem:[#allocation61_spill] sm:$0xff] %v4533_v9  ;;  %v3185_v35 = vpack.c.bf16 %v1829_v4, %v1828_v12  ;;  %v3562_v11 = vld [vmem:[%s3955_s14 + $0xc0] sm:$0xff] }
 0x1ec   : > { %v1515_v1 = vmax.f32 %v808_v31, 0.0  ;;  %v811_v47 = vpop.f32.mrb[68].mxu1  ;;  %3180 = vmatpush1.bf16.msra.mxu0 %v3179_v40  ;;  %v4535_v31 = vpop.f32.mrb[25].mxu0 }
 0x1ed   : > { %v812_v28 = vadd.f32 %v811_v47, %v4502_v0  ;;  %v813_v23 = vpop.f32.mrb[69].mxu1  ;;  %1450 = vmatmul.mubr.f32.gmra.mrb[174].mxu1 %v3561_v30  ;;  %3181 = vmatprep.subr.bf16.mxu0 %v5552_v44  ;;  %5554 = vst [vmem:[#allocation62_spill] sm:$0xff] %v4535_v31  ;;  %v3563_v31 = vld [vmem:[%s3955_s14 + $0xc8] sm:$0xff] }
 0x1ee   : > { %v814_v16 = vadd.f32 %v813_v23, %v4506_v26  ;;  %2189 = vmatprep.mubr.f32.mxu0 %v1515_v1  ;;  %1455 = vmatprep.mubr.f32.mxu1 %v5545_v22  ;;  %v1830_v23 = vld [vmem:[#allocation7 + $0x230] sm:$0xff]  ;;  %v1831_v1 = vld [vmem:[#allocation7 + $0x238] sm:$0xff] }
 0x1ef   : > { %2190 = vmatmul.mubr.f32.gmra.mrb[66].mxu0 %v1514_v63  ;;  %v1522_v30 = vmax.f32 %v812_v28, 0.0  ;;  %v3188_v4 = vpack.c.bf16 %v1831_v1, %v1830_v23 }
 0x1f0   : > { %v1523_v40 = vmax.f32 %v814_v16, 0.0  ;;  %v817_v53 = vpop.f32.mrb[70].mxu1  ;;  %3183 = vmatpush1.bf16.msra.mxu0 %v3182_v43  ;;  %v4542_v43 = vpop.f32.mrb[26].mxu0 }
 0x1f1   : > { %v818_v47 = vadd.f32 %v817_v53, %v4502_v0  ;;  %v819_v60 = vpop.f32.mrb[71].mxu1  ;;  %1456 = vmatmul.mubr.f32.gmra.mrb[176].mxu1 %v3562_v11  ;;  %3184 = vmatprep.subr.bf16.mxu0 %v5552_v44  ;;  %5555 = vst [vmem:[#allocation63_spill] sm:$0xff] %v4542_v43  ;;  %v4544_v16 = vpop.f32.mrb[27].mxu0 }
 0x1f2   : > { %v820_v63 = vadd.f32 %v819_v60, %v4506_v26  ;;  %2194 = vmatprep.mubr.f32.mxu0 %v1523_v40  ;;  %1461 = vmatprep.mubr.f32.mxu1 %v5545_v22  ;;  %5556 = vst [vmem:[#allocation64_spill] sm:$0xff] %v4544_v16  ;;  %v1832_v60 = vld [vmem:[#allocation7 + $0x240] sm:$0xff]  ;;  %v1833_v40 = vld [vmem:[#allocation7 + $0x248] sm:$0xff]  ;;  %v3564_v16 = vld [vmem:[%s3955_s14 + $0xd0] sm:$0xff] }
 0x1f3   : > { %2195 = vmatmul.mubr.f32.gmra.mrb[68].mxu0 %v1522_v30  ;;  %v1530_v11 = vmax.f32 %v818_v47, 0.0  ;;  %v3191_v1 = vpack.c.bf16 %v1833_v40, %v1832_v60 }
 0x1f4   : > { %v1531_v12 = vmax.f32 %v820_v63, 0.0  ;;  %v823_v28 = vpop.f32.mrb[72].mxu1  ;;  %3186 = vmatpush1.bf16.msra.mxu0 %v3185_v35  ;;  %v4551_v35 = vpop.f32.mrb[28].mxu0 }
 0x1f5   : > { %v824_v53 = vadd.f32 %v823_v28, %v4502_v0  ;;  %v825_v9 = vpop.f32.mrb[73].mxu1  ;;  %1462 = vmatmul.mubr.f32.gmra.mrb[178].mxu1 %v3563_v31  ;;  %3187 = vmatprep.subr.bf16.mxu0 %v5552_v44  ;;  %5557 = vst [vmem:[#allocation65_spill] sm:$0xff] %v4551_v35  ;;  %v4553_v63 = vpop.f32.mrb[29].mxu0 }
 0x1f6   : > { %v826_v30 = vadd.f32 %v825_v9, %v4506_v26  ;;  %2199 = vmatprep.mubr.f32.mxu0 %v1531_v12  ;;  %1467 = vmatprep.mubr.f32.mxu1 %v5545_v22  ;;  %5558 = vst [vmem:[#allocation66_spill] sm:$0xff] %v4553_v63  ;;  %v1834_v9 = vld [vmem:[#allocation7 + $0x250] sm:$0xff]  ;;  %v1835_v12 = vld [vmem:[#allocation7 + $0x258] sm:$0xff] }
 0x1f7   : > { %2200 = vmatmul.mubr.f32.gmra.mrb[70].mxu0 %v1530_v11  ;;  %v1538_v31 = vmax.f32 %v824_v53, 0.0  ;;  %v3194_v40 = vpack.c.bf16 %v1835_v12, %v1834_v9  ;;  %v3565_v63 = vld [vmem:[%s3955_s14 + $0xd8] sm:$0xff] }
 0x1f8   : > { %v1539_v23 = vmax.f32 %v826_v30, 0.0  ;;  %v829_v47 = vpop.f32.mrb[74].mxu1  ;;  %3189 = vmatpush1.bf16.msra.mxu0 %v3188_v4  ;;  %v4560_v4 = vpop.f32.mrb[30].mxu0 }
 0x1f9   : > { %v830_v28 = vadd.f32 %v829_v47, %v4502_v0  ;;  %v831_v43 = vpop.f32.mrb[75].mxu1  ;;  %1468 = vmatmul.mubr.f32.gmra.mrb[180].mxu1 %v3564_v16  ;;  %3190 = vmatprep.subr.bf16.mxu0 %v5552_v44  ;;  %5559 = vst [vmem:[#allocation67_spill] sm:$0xff] %v4560_v4  ;;  %v4562_v30 = vpop.f32.mrb[31].mxu0 }
 0x1fa   : > { %v832_v11 = vadd.f32 %v831_v43, %v4506_v26  ;;  %2204 = vmatprep.mubr.f32.mxu0 %v1539_v23  ;;  %1473 = vmatprep.mubr.f32.mxu1 %v5545_v22  ;;  %5560 = vst [vmem:[#allocation68_spill] sm:$0xff] %v4562_v30  ;;  %v1836_v43 = vld [vmem:[#allocation7 + $0x260] sm:$0xff]  ;;  %v1837_v23 = vld [vmem:[#allocation7 + $0x268] sm:$0xff] }
 0x1fb   : > { %2205 = vmatmul.mubr.f32.gmra.mrb[72].mxu0 %v1538_v31  ;;  %v1546_v16 = vmax.f32 %v830_v28, 0.0  ;;  %v442_v28 = vsub.s32 1, %v4475_v48 }
 0x1fc   : > { %v1547_v60 = vmax.f32 %v832_v11, 0.0  ;;  %v835_v53 = vpop.f32.mrb[76].mxu1  ;;  %3192 = vmatpush1.bf16.msra.mxu0 %v3191_v1  ;;  %v4569_v1 = vpop.f32.mrb[32].mxu0  ;;  %v3197_v11 = vpack.c.bf16 %v1837_v23, %v1836_v43 }
 0x1fd   : > { %v836_v47 = vadd.f32 %v835_v53, %v4502_v0  ;;  %v837_v35 = vpop.f32.mrb[77].mxu1  ;;  %1474 = vmatmul.mubr.f32.gmra.mrb[182].mxu1 %v3565_v63  ;;  %3193 = vmatprep.subr.bf16.mxu0 %v5552_v44  ;;  %5561 = vst [vmem:[#allocation69_spill] sm:$0xff] %v4569_v1  ;;  %v4572_v63 = vpop.f32.mrb[33].mxu0 }
 0x1fe   : > { %v838_v31 = vadd.f32 %v837_v35, %v4506_v26  ;;  %2209 = vmatprep.mubr.f32.mxu0 %v1547_v60  ;;  %1479 = vmatprep.mubr.f32.mxu1 %v5545_v22  ;;  %5562 = vst [vmem:[#allocation70_spill] sm:$0xff] %v4572_v63  ;;  %v1838_v35 = vld [vmem:[#allocation7 + $0x270] sm:$0xff]  ;;  %v1839_v60 = vld [vmem:[#allocation7 + $0x278] sm:$0xff]  ;;  %v4580_v43 = vpop.f32.mrb[34].mxu0  ;;  %v3567_v63 = vld [vmem:[%s3955_s14 + $0xe8] sm:$0xff] }
 0x1ff   : > { %2210 = vmatmul.mubr.f32.gmra.mrb[74].mxu0 %v1546_v16  ;;  %v1554_v53 = vmax.f32 %v836_v47, 0.0  ;;  %5563 = vst [vmem:[#allocation71_spill] sm:$0xff] %v4580_v43  ;;  %v4583_v47 = vrot.slane %v4494_v42, %v442_v28 }
 0x200   : > { %v1555_v9 = vmax.f32 %v838_v31, 0.0  ;;  %v841_v12 = vpop.f32.mrb[78].mxu1  ;;  %3195 = vmatpush1.bf16.msra.mxu0 %v3194_v40  ;;  %v438_v40 = vsub.s32 0, %v4475_v48  ;;  %v3200_v31 = vpack.c.bf16 %v1839_v60, %v1838_v35  ;;  %v1841_v48 = vld [vmem:[#allocation7 + $0x288] sm:$0xff] }
 0x201   : > { %v842_v4 = vadd.f32 %v841_v12, %v4502_v0  ;;  %v843_v30 = vpop.f32.mrb[79].mxu1  ;;  %1480 = vmatmul.mubr.f32.gmra.mrb[184].mxu1 %v3566_v46  ;;  %3196 = vmatprep.subr.bf16.mxu0 %v5552_v44  ;;  %v4585_v12 = vpop.f32.mrb[35].mxu0  ;;  %v545_v35 = vadd.f32 %v4249_v25, %v4583_v47 }
 0x202   : > { %v844_v16 = vadd.f32 %v843_v30, %v4506_v26  ;;  %2214 = vmatprep.mubr.f32.mxu0 %v1555_v9  ;;  %1485 = vmatprep.mubr.f32.mxu1 %v5545_v22  ;;  %5564 = vst [vmem:[#allocation72_spill] sm:$0xff] %v4585_v12  ;;  %v3568_v12 = vld [vmem:[%s3955_s14 + $0xf0] sm:$0xff] }
 0x203   : > { %2215 = vmatmul.mubr.f32.gmra.mrb[76].mxu0 %v1554_v53  ;;  %v1562_v1 = vmax.f32 %v842_v4, 0.0  ;;  %v1840_v53 = vld [vmem:[#allocation7 + $0x280] sm:$0xff]  ;;  %v4595_v4 = vpop.f32.mrb[36].mxu0 }
 0x204   : > { %v1563_v23 = vmax.f32 %v844_v16, 0.0  ;;  %v847_v46 = vpop.f32.mrb[80].mxu1  ;;  %3198 = vmatpush1.bf16.msra.mxu0 %v3197_v11  ;;  %v4593_v11 = vrot.slane %v4494_v42, %v438_v40  ;;  %5565 = vst [vmem:[#allocation73_spill] sm:$0xff] %v4595_v4  ;;  %v3203_v16 = vpack.c.bf16 %v1841_v48, %v1840_v53  ;;  %v1842_v42 = vld [vmem:[#allocation7 + $0x290] sm:$0xff]  ;;  %v3569_v4 = vld [vmem:[%s3955_s14 + $0xf8] sm:$0xff]  ;;  %s3661_s14 = sshll.u32 %s3738_s8, 4  ;;  %s3662_s14 = int_to_ptr.vmem [resolvable:$false] %s3661_s14 }
 0x205   : > { %v848_v30 = vadd.f32 %v847_v46, %v4502_v0  ;;  %v849_v9 = vpop.f32.mrb[81].mxu1  ;;  %1486 = vmatmul.mubr.f32.gmra.mrb[186].mxu1 %v3567_v63  ;;  %3199 = vmatprep.subr.bf16.mxu0 %v5552_v44  ;;  %v4599_v46 = vpop.f32.mrb[37].mxu0  ;;  %s3663_s24 = scalar_lea.vmem %s3662_s14, 8192  ;;  %p3664_p5 = scmp.lt.s32.totalorder %s5432_s30, %s3662_s14 }
 0x206   : > { %v850_v28 = vadd.f32 %v849_v9, %v4506_v26  ;;  %2219 = vmatprep.mubr.f32.mxu0 %v1563_v23  ;;  %1491 = vmatprep.mubr.f32.mxu1 %v5545_v22  ;;  %v543_v25 = vadd.f32 %v4246_v17, %v4593_v11  ;;  %v4608_v48 = vpop.f32.mrb[38].mxu0  ;;  %v1844_v17 = vld [vmem:[#allocation7 + $0x2a0] sm:$0xff]  ;;  %p3665_p9 = scmp.lt.s32.totalorder %s3663_s24, %s3657_s6 }
 0x207   : > { %2220 = vmatmul.mubr.f32.gmra.mrb[78].mxu0 %v1562_v1  ;;  %v1570_v43 = vmax.f32 %v848_v30, 0.0  ;;  %v1843_v1 = vld [vmem:[#allocation7 + $0x298] sm:$0xff]  ;;  %5566 = vst [vmem:[#allocation74_spill] sm:$0xff] %v4608_v48 }
 0x208   : > { %v1571_v63 = vmax.f32 %v850_v28, 0.0  ;;  %v853_v60 = vpop.f32.mrb[82].mxu1  ;;  %3201 = vmatpush1.bf16.msra.mxu0 %v3200_v31  ;;  %v1505_v31 = vmax.f32 %v545_v35, 0.0  ;;  %v3206_v28 = vpack.c.bf16 %v1843_v1, %v1842_v42  ;;  %v557_v1 = vadd.f32 %v4264_v36, %v4583_v47  ;;  %p3666_p12 = por %p3665_p9, %p3664_p5 }
 0x209   : > { %v854_v23 = vadd.f32 %v853_v60, %v4502_v0  ;;  %v855_v9 = vpop.f32.mrb[83].mxu1  ;;  %1492 = vmatmul.mubr.f32.gmra.mrb[188].mxu1 %v3568_v12  ;;  %3202 = vmatprep.subr.bf16.mxu0 %v5552_v44  ;;  %v551_v12 = vadd.f32 %v4256_v34, %v4583_v47  ;;  %v4612_v60 = vpop.f32.mrb[39].mxu0  ;;  %v1504_v34 = vmax.f32 %v543_v25, 0.0 }
 0x20a   : > { %v856_v40 = vadd.f32 %v855_v9, %v4506_v26  ;;  %2224 = vmatprep.mubr.f32.mxu0 %v1571_v63  ;;  %1497 = vmatprep.mubr.f32.mxu1 %v5545_v22  ;;  %v4620_v42 = vpop.f32.mrb[40].mxu0  ;;  %p3667_p2 = pnand %p3666_p12, %p3660_p3 }
 0x20b   : > { %2225 = vmatmul.mubr.f32.gmra.mrb[80].mxu0 %v1570_v43  ;;  %v1578_v9 = vmax.f32 %v854_v23, 0.0  ;;  %v1845_v43 = vld [vmem:[#allocation7 + $0x2a8] sm:$0xff]  ;;  %v1513_v23 = vmax.f32 %v551_v12, 0.0  ;;  %v4624_v48 = vpop.f32.mrb[41].mxu0 }
 0x20c   : > { %v1579_v30 = vmax.f32 %v856_v40, 0.0  ;;  %v859_v53 = vpop.f32.mrb[84].mxu1  ;;  %3204 = vmatpush1.bf16.msra.mxu0 %v3203_v16  ;;  %v549_v16 = vadd.f32 %v4254_v32, %v4593_v11  ;;  %v1846_v32 = vld [vmem:[#allocation7 + $0x2b0] sm:$0xff] }
 0x20d   : > { %v860_v63 = vadd.f32 %v859_v53, %v4502_v0  ;;  %v861_v22 = vpop.f32.mrb[85].mxu1  ;;  %1498 = vmatmul.mubr.f32.gmra.mrb[190].mxu1 %v3569_v4  ;;  %3205 = vmatprep.subr.bf16.mxu0 %v5552_v44  ;;  %v3209_v53 = vpack.c.bf16 %v1845_v43, %v1844_v17  ;;  %v563_v17 = vadd.f32 %v4270_v38, %v4583_v47 }
 0x20e   : > { %v862_v35 = vadd.f32 %v861_v22, %v4506_v26  ;;  %1959 = vmatprep.mubr.f32.mxu1 %v1505_v31  ;;  %2229 = vmatprep.mubr.f32.mxu0 %v1579_v30  ;;  %v1847_v30 = vld [vmem:[#allocation7 + $0x2b8] sm:$0xff]  ;;  %v1512_v36 = vmax.f32 %v549_v16, 0.0 }
 0x20f   : > { %2230 = vmatmul.mubr.f32.gmra.mrb[82].mxu0 %v1578_v9  ;;  %v1586_v22 = vmax.f32 %v860_v63, 0.0  ;;  %v4631_v9 = vpop.f32.mrb[42].mxu0  ;;  %v1521_v63 = vmax.f32 %v557_v1, 0.0 }
 0x210   : > { %v1587_v4 = vmax.f32 %v862_v35, 0.0  ;;  %v865_v40 = vpop.f32.mrb[86].mxu1  ;;  %3207 = vmatpush1.bf16.msra.mxu0 %v3206_v28  ;;  %v555_v28 = vadd.f32 %v4262_v49, %v4593_v11  ;;  %v1848_v49 = vld [vmem:[#allocation7 + $0x2c0] sm:$0xff] }
 0x211   : > { %v866_v31 = vadd.f32 %v865_v40, %v4502_v0  ;;  %v867_v25 = vpop.f32.mrb[87].mxu1  ;;  %1960 = vmatmul.mubr.f32.vlgmr.msra.gmra.mrb[192].mxu1 %v1504_v34  ;;  %3208 = vmatprep.subr.bf16.mxu0 %v5552_v44  ;;  %v3212_v34 = vpack.c.bf16 %v1847_v30, %v1846_v32  ;;  %v4635_v40 = vpop.f32.mrb[43].mxu0  ;;  %v569_v32 = vadd.f32 %v4276_v39, %v4583_v47 }
 0x212   : > { %v868_v12 = vadd.f32 %v867_v25, %v4506_v26  ;;  %1964 = vmatprep.mubr.f32.mxu1 %v1513_v23  ;;  %2234 = vmatprep.mubr.f32.mxu0 %v1587_v4  ;;  %v1849_v4 = vld [vmem:[#allocation7 + $0x2c8] sm:$0xff]  ;;  %v1520_v38 = vmax.f32 %v555_v28, 0.0 }
 0x213   : > { %2235 = vmatmul.mubr.f32.gmra.mrb[84].mxu0 %v1586_v22  ;;  %v1594_v25 = vmax.f32 %v866_v31, 0.0  ;;  %v4642_v22 = vpop.f32.mrb[44].mxu0  ;;  %v1529_v31 = vmax.f32 %v563_v17, 0.0 }
 0x214   : > { %v1595_v43 = vmax.f32 %v868_v12, 0.0  ;;  %v871_v35 = vpop.f32.mrb[88].mxu1  ;;  %3210 = vmatpush1.bf16.msra.mxu0 %v3209_v53  ;;  %v561_v53 = vadd.f32 %v4268_v37, %v4593_v11  ;;  %v1850_v37 = vld [vmem:[#allocation7 + $0x2d0] sm:$0xff] }
 0x215   : > { %v872_v23 = vadd.f32 %v871_v35, %v4502_v0  ;;  %v873_v16 = vpop.f32.mrb[89].mxu1  ;;  %1965 = vmatmul.mubr.f32.gmra.mrb[194].mxu1 %v1512_v36  ;;  %3211 = vmatprep.subr.bf16.mxu0 %v5552_v44  ;;  %v3215_v36 = vpack.c.bf16 %v1849_v4, %v1848_v49  ;;  %v4646_v35 = vpop.f32.mrb[45].mxu0  ;;  %v575_v49 = vadd.f32 %v4282_v59, %v4583_v47 }
 0x216   : > { %v874_v1 = vadd.f32 %v873_v16, %v4506_v26  ;;  %1969 = vmatprep.mubr.f32.mxu1 %v1521_v63  ;;  %2239 = vmatprep.mubr.f32.mxu0 %v1595_v43  ;;  %v1851_v43 = vld [vmem:[#allocation7 + $0x2d8] sm:$0xff]  ;;  %v1528_v39 = vmax.f32 %v561_v53, 0.0 }
 0x217   : > { %2240 = vmatmul.mubr.f32.gmra.mrb[86].mxu0 %v1594_v25  ;;  %v1602_v16 = vmax.f32 %v872_v23, 0.0  ;;  %v4653_v25 = vpop.f32.mrb[46].mxu0  ;;  %v1537_v23 = vmax.f32 %v569_v32, 0.0 }
 0x218   : > { %v1603_v30 = vmax.f32 %v874_v1, 0.0  ;;  %v877_v12 = vpop.f32.mrb[90].mxu1  ;;  %3213 = vmatpush1.bf16.msra.mxu0 %v3212_v34  ;;  %v567_v34 = vadd.f32 %v4274_v58, %v4593_v11  ;;  %v1852_v58 = vld [vmem:[#allocation7 + $0x2e0] sm:$0xff] }
 0x219   : > { %v878_v63 = vadd.f32 %v877_v12, %v4502_v0  ;;  %v879_v28 = vpop.f32.mrb[91].mxu1  ;;  %1970 = vmatmul.mubr.f32.gmra.mrb[196].mxu1 %v1520_v38  ;;  %3214 = vmatprep.subr.bf16.mxu0 %v5552_v44  ;;  %v3218_v38 = vpack.c.bf16 %v1851_v43, %v1850_v37  ;;  %v4657_v12 = vpop.f32.mrb[47].mxu0  ;;  %v581_v37 = vadd.f32 %v4288_v61, %v4583_v47 }
 0x21a   : > { %v880_v17 = vadd.f32 %v879_v28, %v4506_v26  ;;  %1974 = vmatprep.mubr.f32.mxu1 %v1529_v31  ;;  %2244 = vmatprep.mubr.f32.mxu0 %v1603_v30  ;;  %v1853_v30 = vld [vmem:[#allocation7 + $0x2e8] sm:$0xff]  ;;  %v1536_v59 = vmax.f32 %v567_v34, 0.0 }
 0x21b   : > { %2245 = vmatmul.mubr.f32.gmra.mrb[88].mxu0 %v1602_v16  ;;  %v1610_v28 = vmax.f32 %v878_v63, 0.0  ;;  %v4664_v16 = vpop.f32.mrb[48].mxu0  ;;  %v1545_v63 = vmax.f32 %v575_v49, 0.0 }
 0x21c   : > { %v1611_v4 = vmax.f32 %v880_v17, 0.0  ;;  %v883_v1 = vpop.f32.mrb[92].mxu1  ;;  %3216 = vmatpush1.bf16.msra.mxu0 %v3215_v36  ;;  %v573_v36 = vadd.f32 %v4280_v41, %v4593_v11  ;;  %v1854_v41 = vld [vmem:[#allocation7 + $0x2f0] sm:$0xff] }
 0x21d   : > { %v884_v31 = vadd.f32 %v883_v1, %v4502_v0  ;;  %v885_v53 = vpop.f32.mrb[93].mxu1  ;;  %1975 = vmatmul.mubr.f32.gmra.mrb[198].mxu1 %v1528_v39  ;;  %3217 = vmatprep.subr.bf16.mxu0 %v5552_v44  ;;  %v3221_v39 = vpack.c.bf16 %v1853_v30, %v1852_v58  ;;  %v4668_v1 = vpop.f32.mrb[49].mxu0  ;;  %v587_v58 = vadd.f32 %v4294_v8, %v4583_v47 }
 0x21e   : > { %v886_v32 = vadd.f32 %v885_v53, %v4506_v26  ;;  %1979 = vmatprep.mubr.f32.mxu1 %v1537_v23  ;;  %2249 = vmatprep.mubr.f32.mxu0 %v1611_v4  ;;  %v1855_v4 = vld [vmem:[#allocation7 + $0x2f8] sm:$0xff]  ;;  %v1544_v61 = vmax.f32 %v573_v36, 0.0  ;;  %v585_v8 = vadd.f32 %v4292_v14, %v4593_v11 }
 0x21f   : > { %2250 = vmatmul.mubr.f32.gmra.mrb[90].mxu0 %v1610_v28  ;;  %v1618_v53 = vmax.f32 %v884_v31, 0.0  ;;  %v4675_v28 = vpop.f32.mrb[50].mxu0  ;;  %v1553_v31 = vmax.f32 %v581_v37, 0.0 }
 0x220   : > { %v1619_v43 = vmax.f32 %v886_v32, 0.0  ;;  %v889_v17 = vpop.f32.mrb[94].mxu1  ;;  %3219 = vmatpush1.bf16.msra.mxu0 %v3218_v38  ;;  %v579_v38 = vadd.f32 %v4286_v50, %v4593_v11 }
 0x221   : > { %v890_v23 = vadd.f32 %v889_v17, %v4502_v0  ;;  %v891_v34 = vpop.f32.mrb[95].mxu1  ;;  %1980 = vmatmul.mubr.f32.gmra.mrb[200].mxu1 %v1536_v59  ;;  %3220 = vmatprep.subr.bf16.mxu0 %v5552_v44  ;;  %v3224_v59 = vpack.c.bf16 %v1855_v4, %v1854_v41  ;;  %v4679_v17 = vpop.f32.mrb[51].mxu0 }
 0x222   : > { %v892_v49 = vadd.f32 %v891_v34, %v4506_v26  ;;  %1984 = vmatprep.mubr.f32.mxu1 %v1545_v63  ;;  %2254 = vmatprep.mubr.f32.mxu0 %v1619_v43  ;;  %v1552_v37 = vmax.f32 %v579_v38, 0.0  ;;  %v4686_v43 = vpop.f32.mrb[52].mxu0  ;;  %v1560_v38 = vmax.f32 %v585_v8, 0.0 }
 0x223   : > { %2255 = vmatmul.mubr.f32.gmra.mrb[92].mxu0 %v1618_v53  ;;  %v1626_v34 = vmax.f32 %v890_v23, 0.0  ;;  %v593_v53 = vadd.f32 %v4300_v10, %v4583_v47  ;;  %v4690_v4 = vpop.f32.mrb[53].mxu0  ;;  %v591_v10 = vadd.f32 %v4298_v51, %v4593_v11 }
 0x224   : > { %v1627_v30 = vmax.f32 %v892_v49, 0.0  ;;  %v895_v32 = vpop.f32.mrb[96].mxu1  ;;  %3222 = vmatpush1.bf16.msra.mxu0 %v3221_v39  ;;  %v1561_v39 = vmax.f32 %v587_v58, 0.0  ;;  %v4697_v58 = vpop.f32.mrb[54].mxu0 }
 0x225   : > { %v896_v63 = vadd.f32 %v895_v32, %v4502_v0  ;;  %v897_v36 = vpop.f32.mrb[97].mxu1  ;;  %1985 = vmatmul.mubr.f32.gmra.mrb[202].mxu1 %v1544_v61  ;;  %3223 = vmatprep.subr.bf16.mxu0 %v5552_v44  ;;  %v599_v32 = vadd.f32 %v4306_v52, %v4583_v47  ;;  %v1568_v51 = vmax.f32 %v591_v10, 0.0 }
 0x226   : > { %v898_v50 = vadd.f32 %v897_v36, %v4506_v26  ;;  %1989 = vmatprep.mubr.f32.mxu1 %v1553_v31  ;;  %2259 = vmatprep.mubr.f32.mxu0 %v1627_v30  ;;  %v1569_v30 = vmax.f32 %v593_v53, 0.0 }
 0x227   : > { %2260 = vmatmul.mubr.f32.gmra.mrb[94].mxu0 %v1626_v34  ;;  %v1634_v49 = vmax.f32 %v896_v63, 0.0  ;;  %v4701_v63 = vpop.f32.mrb[55].mxu0  ;;  %v1577_v52 = vmax.f32 %v599_v32, 0.0 }
 0x228   : > { %v1635_v23 = vmax.f32 %v898_v50, 0.0  ;;  %v901_v41 = vpop.f32.mrb[98].mxu1  ;;  %3225 = vmatpush1.bf16.msra.mxu0 %v3224_v59  ;;  %v4707_v53 = vpop.f32.mrb[56].mxu0 }
 0x229   : > { %v902_v61 = vadd.f32 %v901_v41, %v4502_v0  ;;  %v903_v31 = vpop.f32.mrb[99].mxu1  ;;  %1990 = vmatmul.mubr.f32.gmra.mrb[204].mxu1 %v1552_v37  ;;  %3226 = vmatprep.subr.bf16.mxu0 %v5552_v44 }
 0x22a   : > { %v904_v14 = vadd.f32 %v903_v31, %v4506_v26  ;;  %1994 = vmatprep.mubr.f32.mxu1 %v1561_v39  ;;  %2264 = vmatprep.mubr.f32.mxu0 %v1635_v23  ;;  %v597_v39 = vadd.f32 %v4304_v15, %v4593_v11  ;;  %v605_v23 = vadd.f32 %v4312_v57, %v4583_v47 }
 0x22b   : > { %2265 = vmatmul.mubr.f32.gmra.mrb[96].mxu0 %v1634_v49  ;;  %v1642_v36 = vmax.f32 %v902_v61, 0.0  ;;  %v4711_v61 = vpop.f32.mrb[57].mxu0 }
 0x22c   : > { %v1643_v59 = vmax.f32 %v904_v14, 0.0  ;;  %v907_v34 = vpop.f32.mrb[100].mxu1  ;;  %v1576_v15 = vmax.f32 %v597_v39, 0.0  ;;  %v4717_v32 = vpop.f32.mrb[58].mxu0  ;;  %v1585_v57 = vmax.f32 %v605_v23, 0.0 }
 0x22d   : > { %v908_v50 = vadd.f32 %v907_v34, %v4502_v0  ;;  %v909_v37 = vpop.f32.mrb[101].mxu1  ;;  %1995 = vmatmul.mubr.f32.gmra.mrb[206].mxu1 %v1560_v38 }
 0x22e   : > { %v910_v8 = vadd.f32 %v909_v37, %v4506_v26  ;;  %1999 = vmatprep.mubr.f32.mxu1 %v1569_v30  ;;  %2269 = vmatprep.mubr.f32.mxu0 %v1643_v59  ;;  %v603_v30 = vadd.f32 %v4310_v54, %v4593_v11  ;;  %v611_v59 = vadd.f32 %v4318_v3, %v4583_v47 }
 0x22f   : > { %2270 = vmatmul.mubr.f32.gmra.mrb[98].mxu0 %v1642_v36  ;;  %v1650_v31 = vmax.f32 %v908_v50, 0.0  ;;  %v4721_v50 = vpop.f32.mrb[59].mxu0 }
 0x230   : > { %v1651_v41 = vmax.f32 %v910_v8, 0.0  ;;  %v913_v49 = vpop.f32.mrb[102].mxu1  ;;  %v1584_v54 = vmax.f32 %v603_v30, 0.0  ;;  %v4727_v23 = vpop.f32.mrb[60].mxu0  ;;  %v1593_v3 = vmax.f32 %v611_v59, 0.0 }
 0x231   : > { %v914_v14 = vadd.f32 %v913_v49, %v4502_v0  ;;  %v915_v38 = vpop.f32.mrb[103].mxu1  ;;  %2000 = vmatmul.mubr.f32.gmra.mrb[208].mxu1 %v1568_v51 }
 0x232   : > { %v916_v10 = vadd.f32 %v915_v38, %v4506_v26  ;;  %2004 = vmatprep.mubr.f32.mxu1 %v1577_v52  ;;  %2274 = vmatprep.mubr.f32.mxu0 %v1651_v41  ;;  %v609_v52 = vadd.f32 %v4316_v2, %v4593_v11  ;;  %v617_v41 = vadd.f32 %v4325_v6, %v4583_v47 }
 0x233   : > { %2275 = vmatmul.mubr.f32.gmra.mrb[100].mxu0 %v1650_v31  ;;  %v1658_v37 = vmax.f32 %v914_v14, 0.0  ;;  %v4731_v14 = vpop.f32.mrb[61].mxu0  ;;  %v623_v6 = vadd.f32 %v4332_v20, %v4583_v47 }
 0x234   : > { %v1659_v34 = vmax.f32 %v916_v10, 0.0  ;;  %v919_v36 = vpop.f32.mrb[104].mxu1  ;;  %v1592_v2 = vmax.f32 %v609_v52, 0.0  ;;  %v1601_v59 = vmax.f32 %v617_v41, 0.0  ;;  %v629_v41 = vadd.f32 %v4339_v24, %v4583_v47 }
 0x235   : > { %v920_v8 = vadd.f32 %v919_v36, %v4502_v0  ;;  %v921_v51 = vpop.f32.mrb[105].mxu1  ;;  %2005 = vmatmul.mubr.f32.gmra.mrb[210].mxu1 %v1576_v15  ;;  %v1609_v20 = vmax.f32 %v623_v6, 0.0  ;;  %v635_v24 = vadd.f32 %v4346_v27, %v4583_v47  ;;  %v641_v27 = vadd.f32 %v4353_v33, %v4583_v47 }
 0x236   : > { %v922_v39 = vadd.f32 %v921_v51, %v4506_v26  ;;  %2009 = vmatprep.mubr.f32.mxu1 %v1585_v57  ;;  %2279 = vmatprep.mubr.f32.mxu0 %v1659_v34  ;;  %v615_v57 = vadd.f32 %v4323_v5, %v4593_v11  ;;  %v647_v33 = vadd.f32 %v4360_v62, %v4583_v47 }
 0x237   : > { %2280 = vmatmul.mubr.f32.gmra.mrb[102].mxu0 %v1658_v37  ;;  %v1666_v38 = vmax.f32 %v920_v8, 0.0  ;;  %v4739_v37 = vpop.f32.mrb[62].mxu0  ;;  %v653_v62 = vadd.f32 %v4367_v56, %v4583_v47  ;;  %v659_v56 = vadd.f32 %v4374_v18, %v4583_v47 }
 0x238   : > { %v1667_v49 = vmax.f32 %v922_v39, 0.0  ;;  %v925_v31 = vpop.f32.mrb[106].mxu1  ;;  %v1600_v5 = vmax.f32 %v615_v57, 0.0  ;;  %v1617_v57 = vmax.f32 %v629_v41, 0.0 }
 0x239   : > { %v926_v10 = vadd.f32 %v925_v31, %v4502_v0  ;;  %v927_v15 = vpop.f32.mrb[107].mxu1  ;;  %2010 = vmatmul.mubr.f32.gmra.mrb[212].mxu1 %v1584_v54  ;;  %v4742_v54 = vpop.f32.mrb[63].mxu0 }
 0x23a   : > { %v928_v30 = vadd.f32 %v927_v15, %v4506_v26  ;;  %2014 = vmatprep.mubr.f32.mxu1 %v1593_v3  ;;  %2284 = vmatprep.mubr.f32.mxu0 %v1667_v49  ;;  %v621_v3 = vadd.f32 %v4330_v19, %v4593_v11  ;;  %v627_v19 = vadd.f32 %v4337_v45, %v4593_v11 }
 0x23b   : > { %2285 = vmatmul.mubr.f32.gmra.mrb[104].mxu0 %v1666_v38  ;;  %v1674_v8 = vmax.f32 %v926_v10, 0.0  ;;  %v633_v45 = vadd.f32 %v4344_v55, %v4593_v11  ;;  %v639_v55 = vadd.f32 %v4351_v7, %v4593_v11  ;;  %v645_v7 = vadd.f32 %v4358_v21, %v4593_v11 }
 0x23c   : > { %v1675_v34 = vmax.f32 %v928_v30, 0.0  ;;  %v931_v36 = vpop.f32.mrb[108].mxu1  ;;  %v651_v21 = vadd.f32 %v4365_v29, %v4593_v11  ;;  %v657_v29 = vadd.f32 %v4372_v13, %v4593_v11  ;;  %v5569_v13 = vld [vmem:[#allocation12_spill] sm:$0xff] }
 0x23d   : > { %v932_v51 = vadd.f32 %v931_v36, %v4502_v0  ;;  %v933_v39 = vpop.f32.mrb[109].mxu1  ;;  %2015 = vmatmul.mubr.f32.gmra.mrb[214].mxu1 %v1592_v2  ;;  %v1608_v2 = vmax.f32 %v621_v3, 0.0 }
 0x23e   : > { %v934_v52 = vadd.f32 %v933_v39, %v4506_v26  ;;  %2019 = vmatprep.mubr.f32.mxu1 %v1601_v59  ;;  %2289 = vmatprep.mubr.f32.mxu0 %v1675_v34  ;;  %v1616_v39 = vmax.f32 %v627_v19, 0.0 }
 0x23f   : > { %2290 = vmatmul.mubr.f32.gmra.mrb[106].mxu0 %v1674_v8  ;;  %v1682_v38 = vmax.f32 %v932_v51, 0.0 }
 0x240   : > { %v1683_v49 = vmax.f32 %v934_v52, 0.0  ;;  %v937_v31 = vpop.f32.mrb[110].mxu1  ;;  %v1625_v52 = vmax.f32 %v635_v24, 0.0 }
 0x241   : > { %v938_v10 = vadd.f32 %v937_v31, %v4502_v0  ;;  %v939_v15 = vpop.f32.mrb[111].mxu1  ;;  %2020 = vmatmul.mubr.f32.gmra.mrb[216].mxu1 %v1600_v5 }
 0x242   : > { %v940_v30 = vadd.f32 %v939_v15, %v4506_v26  ;;  %2024 = vmatprep.mubr.f32.mxu1 %v1609_v20  ;;  %2294 = vmatprep.mubr.f32.mxu0 %v1683_v49 }
 0x243   : > { %2295 = vmatmul.mubr.f32.gmra.mrb[108].mxu0 %v1682_v38  ;;  %v1690_v34 = vmax.f32 %v938_v10, 0.0  ;;  %v1624_v38 = vmax.f32 %v633_v45, 0.0  ;;  %v1633_v10 = vmax.f32 %v641_v27, 0.0  ;;  %v1649_v27 = vmax.f32 %v653_v62, 0.0 }
 0x244   : > { %v1691_v59 = vmax.f32 %v940_v30, 0.0  ;;  %v943_v6 = vpop.f32.mrb[112].mxu1 }
 0x245   : > { %v944_v36 = vadd.f32 %v943_v6, %v4502_v0  ;;  %v945_v8 = vpop.f32.mrb[113].mxu1  ;;  %2025 = vmatmul.mubr.f32.gmra.mrb[218].mxu1 %v1608_v2  ;;  %v1641_v6 = vmax.f32 %v647_v33, 0.0 }
 0x246   : > { %v946_v51 = vadd.f32 %v945_v8, %v4506_v26  ;;  %2029 = vmatprep.mubr.f32.mxu1 %v1617_v57  ;;  %2299 = vmatprep.mubr.f32.mxu0 %v1691_v59  ;;  %v1632_v59 = vmax.f32 %v639_v55, 0.0  ;;  %v1657_v55 = vmax.f32 %v659_v56, 0.0 }
 0x247   : > { %2300 = vmatmul.mubr.f32.gmra.mrb[110].mxu0 %v1690_v34  ;;  %v1698_v20 = vmax.f32 %v944_v36, 0.0 }
 0x248   : > { %v1699_v5 = vmax.f32 %v946_v51, 0.0  ;;  %v949_v3 = vpop.f32.mrb[114].mxu1 }
 0x249   : > { %v950_v41 = vadd.f32 %v949_v3, %v4502_v0  ;;  %v951_v49 = vpop.f32.mrb[115].mxu1  ;;  %2030 = vmatmul.mubr.f32.gmra.mrb[220].mxu1 %v1616_v39 }
 0x24a   : > { %v952_v31 = vadd.f32 %v951_v49, %v4506_v26  ;;  %2034 = vmatprep.mubr.f32.mxu1 %v1625_v52  ;;  %2304 = vmatprep.mubr.f32.mxu0 %v1699_v5  ;;  %v1640_v52 = vmax.f32 %v645_v7, 0.0  ;;  %v1656_v7 = vmax.f32 %v657_v29, 0.0 }
 0x24b   : > { %2305 = vmatmul.mubr.f32.gmra.mrb[112].mxu0 %v1698_v20  ;;  %v1706_v2 = vmax.f32 %v950_v41, 0.0 }
 0x24c   : > { %v1707_v15 = vmax.f32 %v952_v31, 0.0  ;;  %v955_v30 = vpop.f32.mrb[116].mxu1 }
 0x24d   : > { %v956_v19 = vadd.f32 %v955_v30, %v4502_v0  ;;  %v957_v57 = vpop.f32.mrb[117].mxu1  ;;  %2035 = vmatmul.mubr.f32.gmra.mrb[222].mxu1 %v1624_v38  ;;  %v1648_v38 = vmax.f32 %v651_v21, 0.0 }
 0x24e   : > { %v958_v24 = vadd.f32 %v957_v57, %v4506_v26  ;;  %2039 = vmatprep.mubr.f32.mxu1 %v1633_v10  ;;  %2309 = vmatprep.mubr.f32.mxu0 %v1707_v15  ;;  %v5567_v10 = vld [vmem:[#allocation13_spill] sm:$0xff]  ;;  %v5568_v57 = vld [vmem:[#allocation47_spill] sm:$0xff] }
 0x24f   : > { %2310 = vmatmul.mubr.f32.gmra.mrb[114].mxu0 %v1706_v2  ;;  %v1714_v8 = vmax.f32 %v956_v19, 0.0  ;;  %v665_v18 = vadd.f32 %v5567_v10, %v4583_v47 }
 0x250   : > { %v1715_v34 = vmax.f32 %v958_v24, 0.0  ;;  %v961_v36 = vpop.f32.mrb[118].mxu1  ;;  %v458_v24 = vsub.s32 5, %v5568_v57 }
 0x251   : > { %v962_v51 = vadd.f32 %v961_v36, %v4502_v0  ;;  %v963_v39 = vpop.f32.mrb[119].mxu1  ;;  %2040 = vmatmul.mubr.f32.gmra.mrb[224].mxu1 %v1632_v59  ;;  %v1665_v62 = vmax.f32 %v665_v18, 0.0 }
 0x252   : > { %v964_v45 = vadd.f32 %v963_v39, %v4506_v26  ;;  %2044 = vmatprep.mubr.f32.mxu1 %v1641_v6  ;;  %2314 = vmatprep.mubr.f32.mxu0 %v1715_v34  ;;  %v663_v6 = vadd.f32 %v5569_v13, %v4593_v11  ;;  %v5570_v34 = vld [vmem:[#allocation15_spill] sm:$0xff]  ;;  %v454_v39 = vsub.s32 4, %v5568_v57 }
 0x253   : > { %2315 = vmatmul.mubr.f32.gmra.mrb[116].mxu0 %v1714_v8  ;;  %v1722_v20 = vmax.f32 %v962_v51, 0.0  ;;  %v671_v36 = vadd.f32 %v5570_v34, %v4583_v47 }
 0x254   : > { %v1723_v5 = vmax.f32 %v964_v45, 0.0  ;;  %v967_v3 = vpop.f32.mrb[120].mxu1 }
 0x255   : > { %v968_v41 = vadd.f32 %v967_v3, %v4502_v0  ;;  %v969_v49 = vpop.f32.mrb[121].mxu1  ;;  %2045 = vmatmul.mubr.f32.gmra.mrb[226].mxu1 %v1640_v52  ;;  %v1664_v3 = vmax.f32 %v663_v6, 0.0  ;;  %v5575_v6 = vld [vmem:[#allocation21_spill] sm:$0xff] }
 0x256   : > { %v970_v31 = vadd.f32 %v969_v49, %v4506_v26  ;;  %2049 = vmatprep.mubr.f32.mxu1 %v1649_v27  ;;  %2319 = vmatprep.mubr.f32.mxu0 %v1723_v5  ;;  %v4797_v27 = vld [vmem:[%s5479_s2] sm:$0xff]  ;;  %v1673_v49 = vmax.f32 %v671_v36, 0.0  ;;  %v5576_v36 = vld [vmem:[#allocation18_spill] sm:$0xff] }
 0x257   : > { %2320 = vmatmul.mubr.f32.gmra.mrb[118].mxu0 %v1722_v20  ;;  %v1730_v30 = vmax.f32 %v968_v41, 0.0  ;;  %v4800_v56 = vrot.slane %v4797_v27, %v458_v24  ;;  %v5571_v20 = vld [vmem:[#allocation14_spill] sm:$0xff]  ;;  %v4808_v10 = vrot.slane %v4797_v27, %v454_v39  ;;  %v1857_v39 = vld [vmem:[#allocation7 + $0x308] sm:$0xff] }
 0x258   : > { %v1731_v33 = vmax.f32 %v970_v31, 0.0  ;;  %v973_v15 = vpop.f32.mrb[122].mxu1  ;;  %v669_v41 = vadd.f32 %v5571_v20, %v4593_v11  ;;  %v5572_v31 = vld [vmem:[#allocation17_spill] sm:$0xff]  ;;  %v5578_v20 = vld [vmem:[#allocation20_spill] sm:$0xff] }
 0x259   : > { %v974_v2 = vadd.f32 %v973_v15, %v4502_v0  ;;  %v975_v19 = vpop.f32.mrb[123].mxu1  ;;  %2050 = vmatmul.mubr.f32.gmra.mrb[228].mxu1 %v1648_v38  ;;  %v677_v38 = vadd.f32 %v5572_v31, %v4583_v47  ;;  %v5579_v31 = vld [vmem:[#allocation25_spill] sm:$0xff] }
 0x25a   : > { %v976_v59 = vadd.f32 %v975_v19, %v4506_v26  ;;  %2054 = vmatprep.mubr.f32.mxu1 %v1657_v55  ;;  %2324 = vmatprep.mubr.f32.mxu0 %v1731_v33  ;;  %v1672_v24 = vmax.f32 %v669_v41, 0.0  ;;  %v681_v41 = vadd.f32 %v5578_v20, %v4593_v11 }
 0x25b   : > { %2325 = vmatmul.mubr.f32.gmra.mrb[120].mxu0 %v1730_v30  ;;  %v1738_v45 = vmax.f32 %v974_v2, 0.0  ;;  %v5573_v30 = vld [vmem:[#allocation19_spill] sm:$0xff]  ;;  %v1681_v13 = vmax.f32 %v677_v38, 0.0  ;;  %v689_v38 = vadd.f32 %v5579_v31, %v4583_v47 }
 0x25c   : > { %v1739_v8 = vmax.f32 %v976_v59, 0.0  ;;  %v979_v51 = vpop.f32.mrb[124].mxu1  ;;  %v1059_v2 = vadd.f32 %v5573_v30, %v4800_v56  ;;  %v5574_v59 = vld [vmem:[#allocation16_spill] sm:$0xff]  ;;  %v1858_v30 = vld [vmem:[#allocation7 + $0x310] sm:$0xff] }
 0x25d   : > { %v980_v52 = vadd.f32 %v979_v51, %v4502_v0  ;;  %v981_v21 = vpop.f32.mrb[125].mxu1  ;;  %2055 = vmatmul.mubr.f32.gmra.mrb[230].mxu1 %v1656_v7  ;;  %v675_v7 = vadd.f32 %v5574_v59, %v4593_v11  ;;  %v5581_v59 = vld [vmem:[#allocation27_spill] sm:$0xff] }
 0x25e   : > { %v982_v5 = vadd.f32 %v981_v21, %v4506_v26  ;;  %2059 = vmatprep.mubr.f32.mxu1 %v1665_v62  ;;  %2329 = vmatprep.mubr.f32.mxu0 %v1739_v8  ;;  %v683_v62 = vadd.f32 %v5575_v6, %v4583_v47  ;;  %v1057_v8 = vadd.f32 %v5576_v36, %v4808_v10  ;;  %v5577_v21 = vld [vmem:[#allocation23_spill] sm:$0xff]  ;;  %v5582_v6 = vld [vmem:[#allocation24_spill] sm:$0xff]  ;;  %v5583_v36 = vld [vmem:[#allocation29_spill] sm:$0xff] }
 0x25f   : > { %2330 = vmatmul.mubr.f32.gmra.mrb[122].mxu0 %v1738_v45  ;;  %v1746_v18 = vmax.f32 %v980_v52, 0.0  ;;  %v1509_v52 = vmax.f32 %v1059_v2, 0.0  ;;  %v1859_v2 = vld [vmem:[#allocation7 + $0x318] sm:$0xff] }
 0x260   : > { %v1747_v29 = vmax.f32 %v982_v5, 0.0  ;;  %v985_v55 = vpop.f32.mrb[126].mxu1  ;;  %v1065_v5 = vadd.f32 %v5577_v21, %v4800_v56 }
 0x261   : > { %v986_v33 = vadd.f32 %v985_v55, %v4502_v0  ;;  %v987_v15 = vpop.f32.mrb[127].mxu1  ;;  %2060 = vmatmul.mubr.f32.gmra.mrb[232].mxu1 %v1664_v3  ;;  %v1680_v3 = vmax.f32 %v675_v7, 0.0  ;;  %v1071_v7 = vadd.f32 %v5581_v59, %v4800_v56 }
 0x262   : > { %v988_v19 = vadd.f32 %v987_v15, %v4506_v26  ;;  %2064 = vmatprep.mubr.f32.mxu1 %v1673_v49  ;;  %2334 = vmatprep.mubr.f32.mxu0 %v1747_v29  ;;  %v1856_v26 = vld [vmem:[#allocation7 + $0x300] sm:$0xff]  ;;  %v1689_v49 = vmax.f32 %v683_v62, 0.0  ;;  %v687_v62 = vadd.f32 %v5582_v6, %v4593_v11  ;;  %v1862_v6 = vld [vmem:[#allocation7 + $0x330] sm:$0xff] }
 0x263   : > { %2335 = vmatmul.mubr.f32.gmra.mrb[124].mxu0 %v1746_v18  ;;  %v1754_v51 = vmax.f32 %v986_v33, 0.0  ;;  %v3227_v29 = vpack.c.bf16 %v1857_v39, %v1856_v26  ;;  %v1508_v18 = vmax.f32 %v1057_v8, 0.0  ;;  %v5580_v33 = vld [vmem:[#allocation22_spill] sm:$0xff]  ;;  %v695_v8 = vadd.f32 %v5583_v36, %v4583_v47 }
 0x264   : > { %v1755_v34 = vmax.f32 %v988_v19, 0.0  ;;  %v4818_v0 = vpop.f32.mrb[128].mxu1  ;;  %v1063_v15 = vadd.f32 %v5580_v33, %v4808_v10 }
 0x265   : > { %2065 = vmatmul.mubr.f32.gmra.mrb[234].mxu1 %v1672_v24  ;;  %v4822_v45 = vpop.f32.mrb[129].mxu1  ;;  %v1517_v24 = vmax.f32 %v1065_v5, 0.0  ;;  %v1860_v5 = vld [vmem:[#allocation7 + $0x320] sm:$0xff]  ;;  %v1705_v33 = vmax.f32 %v695_v8, 0.0  ;;  %v5589_v8 = vld [vmem:[#allocation35_spill] sm:$0xff] }
 0x266   : > { %2069 = vmatprep.mubr.f32.mxu1 %v1681_v13  ;;  %2339 = vmatprep.mubr.f32.mxu0 %v1755_v34  ;;  %v1688_v13 = vmax.f32 %v681_v41, 0.0  ;;  %v1697_v34 = vmax.f32 %v689_v38, 0.0  ;;  %v1516_v39 = vmax.f32 %v1063_v15, 0.0  ;;  %v1525_v41 = vmax.f32 %v1071_v7, 0.0  ;;  %v5587_v15 = vld [vmem:[#allocation33_spill] sm:$0xff]  ;;  %v5588_v7 = vld [vmem:[#allocation30_spill] sm:$0xff] }
 0x267   : > { %2340 = vmatmul.mubr.f32.gmra.mrb[126].mxu0 %v1754_v51  ;;  %v3230_v51 = vpack.c.bf16 %v1859_v2, %v1858_v30  ;;  %v1696_v38 = vmax.f32 %v687_v62, 0.0  ;;  %v701_v30 = vadd.f32 %v5587_v15, %v4583_v47  ;;  %v1863_v62 = vld [vmem:[#allocation7 + $0x338] sm:$0xff] }
 0x268   : > { %2409 = vmatprep.mubr.f32.mxu0 %v1509_v52  ;;  %v4830_v55 = vpop.f32.mrb[130].mxu1  ;;  %v5584_v52 = vld [vmem:[#allocation26_spill] sm:$0xff] }
 0x269   : > { %2070 = vmatmul.mubr.f32.gmra.mrb[236].mxu1 %v1680_v3  ;;  %v4834_v19 = vpop.f32.mrb[131].mxu1  ;;  %v1069_v21 = vadd.f32 %v5584_v52, %v4808_v10  ;;  %v1861_v3 = vld [vmem:[#allocation7 + $0x328] sm:$0xff]  ;;  %v5590_v52 = vld [vmem:[#allocation32_spill] sm:$0xff] }
 0x26a   : > { %2074 = vmatprep.mubr.f32.mxu1 %v1689_v49  ;;  %v5585_v49 = vld [vmem:[#allocation31_spill] sm:$0xff]  ;;  %v3233_v2 = vpack.c.bf16 %v1861_v3, %v1860_v5  ;;  %v699_v5 = vadd.f32 %v5590_v52, %v4593_v11  ;;  %v5591_v3 = vld [vmem:[#allocation37_spill] sm:$0xff] }
 0x26b   : > { %2410 = vmatmul.mubr.f32.vlgmr.msra.gmra.mrb[64].mxu0 %v1508_v18  ;;  %v1077_v31 = vadd.f32 %v5585_v49, %v4800_v56  ;;  %v1524_v59 = vmax.f32 %v1069_v21, 0.0  ;;  %v1713_v21 = vmax.f32 %v701_v30, 0.0  ;;  %v3236_v49 = vpack.c.bf16 %v1863_v62, %v1862_v6  ;;  %v5595_v6 = vld [vmem:[#allocation36_spill] sm:$0xff] }
 0x26c   : > { %2414 = vmatprep.mubr.f32.mxu0 %v1517_v24  ;;  %3228 = vmatpush1.bf16.msra.mxu0 %v3227_v29  ;;  %v4842_v26 = vpop.f32.mrb[132].mxu1  ;;  %v5586_v29 = vld [vmem:[#allocation28_spill] sm:$0xff]  ;;  %v705_v62 = vadd.f32 %v5595_v6, %v4593_v11 }
 0x26d   : > { %2075 = vmatmul.mubr.f32.gmra.mrb[238].mxu1 %v1688_v13  ;;  %3229 = vmatprep.subr.bf16.mxu0 %v5552_v44  ;;  %v4847_v20 = vpop.f32.mrb[133].mxu1  ;;  %v693_v18 = vadd.f32 %v5586_v29, %v4593_v11  ;;  %v1075_v13 = vadd.f32 %v5588_v7, %v4808_v10  ;;  %v1533_v36 = vmax.f32 %v1077_v31, 0.0  ;;  %v5593_v31 = vld [vmem:[#allocation34_spill] sm:$0xff] }
 0x26e   : > { %2079 = vmatprep.mubr.f32.mxu1 %v1697_v34  ;;  %v1081_v15 = vadd.f32 %v5593_v31, %v4808_v10 }
 0x26f   : > { %2415 = vmatmul.mubr.f32.gmra.mrb[66].mxu0 %v1516_v39  ;;  %v1083_v39 = vadd.f32 %v5589_v8, %v4800_v56  ;;  %v1532_v29 = vmax.f32 %v1075_v13, 0.0 }
 0x270   : > { %2419 = vmatprep.mubr.f32.mxu0 %v1525_v41  ;;  %3231 = vmatpush1.bf16.msra.mxu0 %v3230_v51  ;;  %v4855_v24 = vpop.f32.mrb[134].mxu1  ;;  %v1704_v51 = vmax.f32 %v693_v18, 0.0  ;;  %v707_v41 = vadd.f32 %v5591_v3, %v4583_v47  ;;  %v1864_v18 = vld [vmem:[#allocation7 + $0x340] sm:$0xff]  ;;  %v1540_v31 = vmax.f32 %v1081_v15, 0.0 }
 0x271   : > { %2080 = vmatmul.mubr.f32.gmra.mrb[240].mxu1 %v1696_v38  ;;  %3232 = vmatprep.subr.bf16.mxu0 %v5552_v44  ;;  %v4860_v34 = vpop.f32.mrb[135].mxu1  ;;  %v1541_v30 = vmax.f32 %v1083_v39, 0.0  ;;  %v5598_v39 = vld [vmem:[#allocation38_spill] sm:$0xff] }
 0x272   : > { %2084 = vmatprep.mubr.f32.mxu1 %v1705_v33  ;;  %v1865_v33 = vld [vmem:[#allocation7 + $0x348] sm:$0xff]  ;;  %v1721_v13 = vmax.f32 %v707_v41, 0.0 }
 0x273   : > { %2420 = vmatmul.mubr.f32.gmra.mrb[68].mxu0 %v1524_v59  ;;  %v5594_v59 = vld [vmem:[#allocation39_spill] sm:$0xff]  ;;  %v3239_v52 = vpack.c.bf16 %v1865_v33, %v1864_v18  ;;  %v5601_v18 = vld [vmem:[#allocation40_spill] sm:$0xff] }
 0x274   : > { %2424 = vmatprep.mubr.f32.mxu0 %v1533_v36  ;;  %3234 = vmatpush1.bf16.msra.mxu0 %v3233_v2  ;;  %v4868_v38 = vpop.f32.mrb[136].mxu1  ;;  %v1089_v8 = vadd.f32 %v5594_v59, %v4800_v56  ;;  %v1712_v2 = vmax.f32 %v699_v5, 0.0  ;;  %v5596_v36 = vld [vmem:[#allocation41_spill] sm:$0xff]  ;;  %v1866_v5 = vld [vmem:[#allocation7 + $0x350] sm:$0xff]  ;;  %v711_v33 = vadd.f32 %v5601_v18, %v4593_v11 }
 0x275   : > { %5592 = vst [vmem:[#allocation13_spill] sm:$0xff] %v4868_v38  ;;  %2085 = vmatmul.mubr.f32.gmra.mrb[242].mxu1 %v1704_v51  ;;  %3235 = vmatprep.subr.bf16.mxu0 %v5552_v44  ;;  %v4873_v7 = vpop.f32.mrb[137].mxu1  ;;  %v713_v51 = vadd.f32 %v5596_v36, %v4583_v47  ;;  %v1087_v38 = vadd.f32 %v5598_v39, %v4808_v10 }
 0x276   : > { %2089 = vmatprep.mubr.f32.mxu1 %v1713_v21  ;;  %v1867_v21 = vld [vmem:[#allocation7 + $0x358] sm:$0xff]  ;;  %v1549_v41 = vmax.f32 %v1089_v8, 0.0  ;;  %v5604_v8 = vld [vmem:[#allocation42_spill] sm:$0xff] }
 0x277   : > { %2425 = vmatmul.mubr.f32.gmra.mrb[70].mxu0 %v1532_v29  ;;  %v5600_v29 = vld [vmem:[#allocation43_spill] sm:$0xff]  ;;  %v1729_v15 = vmax.f32 %v713_v51, 0.0  ;;  %v3242_v36 = vpack.c.bf16 %v1867_v21, %v1866_v5  ;;  %v5607_v5 = vld [vmem:[#allocation44_spill] sm:$0xff] }
 0x278   : > { %2429 = vmatprep.mubr.f32.mxu0 %v1541_v30  ;;  %3237 = vmatpush1.bf16.msra.mxu0 %v3236_v49  ;;  %v4881_v3 = vpop.f32.mrb[138].mxu1  ;;  %v1095_v6 = vadd.f32 %v5600_v29, %v4800_v56  ;;  %v1720_v49 = vmax.f32 %v705_v62, 0.0  ;;  %v5602_v30 = vld [vmem:[#allocation45_spill] sm:$0xff]  ;;  %v1868_v62 = vld [vmem:[#allocation7 + $0x360] sm:$0xff]  ;;  %v717_v21 = vadd.f32 %v5607_v5, %v4593_v11 }
 0x279   : > { %5597 = vst [vmem:[#allocation47_spill] sm:$0xff] %v4881_v3  ;;  %2090 = vmatmul.mubr.f32.gmra.mrb[244].mxu1 %v1712_v2  ;;  %3238 = vmatprep.subr.bf16.mxu0 %v5552_v44  ;;  %v4886_v59 = vpop.f32.mrb[139].mxu1  ;;  %v719_v2 = vadd.f32 %v5602_v30, %v4583_v47  ;;  %v1548_v3 = vmax.f32 %v1087_v38, 0.0 }
 0x27a   : > { %5599 = vst [vmem:[#allocation12_spill] sm:$0xff] %v4886_v59  ;;  %2094 = vmatprep.mubr.f32.mxu1 %v1721_v13  ;;  %v1093_v59 = vadd.f32 %v5604_v8, %v4808_v10  ;;  %v1869_v13 = vld [vmem:[#allocation7 + $0x368] sm:$0xff]  ;;  %v1557_v51 = vmax.f32 %v1095_v6, 0.0  ;;  %v5610_v6 = vld [vmem:[#allocation46_spill] sm:$0xff] }
 0x27b   : > { %2430 = vmatmul.mubr.f32.gmra.mrb[72].mxu0 %v1540_v31  ;;  %v5606_v31 = vld [vmem:[#allocation48_spill] sm:$0xff]  ;;  %v1737_v38 = vmax.f32 %v719_v2, 0.0  ;;  %v3245_v30 = vpack.c.bf16 %v1869_v13, %v1868_v62  ;;  %v5613_v62 = vld [vmem:[#allocation49_spill] sm:$0xff] }
 0x27c   : > { %2434 = vmatprep.mubr.f32.mxu0 %v1549_v41  ;;  %3240 = vmatpush1.bf16.msra.mxu0 %v3239_v52  ;;  %v4894_v39 = vpop.f32.mrb[140].mxu1  ;;  %v1101_v18 = vadd.f32 %v5606_v31, %v4800_v56  ;;  %v1728_v52 = vmax.f32 %v711_v33, 0.0  ;;  %v5608_v41 = vld [vmem:[#allocation50_spill] sm:$0xff]  ;;  %v5612_v2 = vld [vmem:[#allocation52_spill] sm:$0xff]  ;;  %v723_v13 = vadd.f32 %v5613_v62, %v4593_v11 }
 0x27d   : > { %5603 = vst [vmem:[#allocation15_spill] sm:$0xff] %v4894_v39  ;;  %2095 = vmatmul.mubr.f32.gmra.mrb[246].mxu1 %v1720_v49  ;;  %3241 = vmatprep.subr.bf16.mxu0 %v5552_v44  ;;  %v4899_v29 = vpop.f32.mrb[141].mxu1  ;;  %v725_v49 = vadd.f32 %v5608_v41, %v4583_v47  ;;  %v1556_v39 = vmax.f32 %v1093_v59, 0.0  ;;  %v1870_v33 = vld [vmem:[#allocation7 + $0x370] sm:$0xff]  ;;  %v1107_v5 = vadd.f32 %v5612_v2, %v4800_v56 }
 0x27e   : > { %5605 = vst [vmem:[#allocation14_spill] sm:$0xff] %v4899_v29  ;;  %2099 = vmatprep.mubr.f32.mxu1 %v1729_v15  ;;  %v1099_v29 = vadd.f32 %v5610_v6, %v4808_v10  ;;  %v1871_v15 = vld [vmem:[#allocation7 + $0x378] sm:$0xff] }
 0x27f   : > { %2435 = vmatmul.mubr.f32.gmra.mrb[74].mxu0 %v1548_v3  ;;  %v1565_v3 = vmax.f32 %v1101_v18, 0.0  ;;  %v1745_v59 = vmax.f32 %v725_v49, 0.0  ;;  %v3248_v41 = vpack.c.bf16 %v1871_v15, %v1870_v33  ;;  %v5615_v18 = vld [vmem:[#allocation51_spill] sm:$0xff]  ;;  %v5616_v49 = vld [vmem:[#allocation56_spill] sm:$0xff]  ;;  %v5617_v33 = vld [vmem:[#allocation53_spill] sm:$0xff] }
 0x280   : > { %2439 = vmatprep.mubr.f32.mxu0 %v1557_v51  ;;  %3243 = vmatpush1.bf16.msra.mxu0 %v3242_v36  ;;  %v4907_v8 = vpop.f32.mrb[142].mxu1  ;;  %v1736_v36 = vmax.f32 %v717_v21, 0.0  ;;  %v5614_v51 = vld [vmem:[#allocation54_spill] sm:$0xff]  ;;  %v1872_v21 = vld [vmem:[#allocation7 + $0x380] sm:$0xff]  ;;  %v729_v15 = vadd.f32 %v5617_v33, %v4593_v11  ;;  %v1877_v33 = vld [vmem:[#allocation7 + $0x3a8] sm:$0xff] }
 0x281   : > { %5609 = vst [vmem:[#allocation17_spill] sm:$0xff] %v4907_v8  ;;  %2100 = vmatmul.mubr.f32.gmra.mrb[248].mxu1 %v1728_v52  ;;  %3244 = vmatprep.subr.bf16.mxu0 %v5552_v44  ;;  %v4912_v31 = vpop.f32.mrb[143].mxu1  ;;  %v731_v52 = vadd.f32 %v5614_v51, %v4583_v47  ;;  %v1564_v8 = vmax.f32 %v1099_v29, 0.0  ;;  %v1113_v47 = vadd.f32 %v5616_v49, %v4800_v56  ;;  %v5618_v51 = vld [vmem:[#allocation55_spill] sm:$0xff]  ;;  %v5619_v11 = vld [vmem:[#allocation58_spill] sm:$0xff] }
 0x282   : > { %5611 = vst [vmem:[#allocation19_spill] sm:$0xff] %v4912_v31  ;;  %2104 = vmatprep.mubr.f32.mxu1 %v1737_v38  ;;  %v1105_v31 = vadd.f32 %v5615_v18, %v4808_v10  ;;  %v1873_v38 = vld [vmem:[#allocation7 + $0x388] sm:$0xff]  ;;  %v1111_v18 = vadd.f32 %v5618_v51, %v4808_v10 }
 0x283   : > { %2440 = vmatmul.mubr.f32.gmra.mrb[76].mxu0 %v1556_v39  ;;  %v1573_v39 = vmax.f32 %v1107_v5, 0.0  ;;  %v1753_v29 = vmax.f32 %v731_v52, 0.0  ;;  %v1874_v5 = vld [vmem:[#allocation7 + $0x390] sm:$0xff]  ;;  %v1581_v49 = vmax.f32 %v1113_v47, 0.0  ;;  %v1752_v52 = vmax.f32 %v729_v15, 0.0  ;;  %v1876_v47 = vld [vmem:[#allocation7 + $0x3a0] sm:$0xff] }
 0x284   : > { %2444 = vmatprep.mubr.f32.mxu0 %v1565_v3  ;;  %3246 = vmatpush1.bf16.msra.mxu0 %v3245_v30  ;;  %v4920_v6 = vpop.f32.mrb[144].mxu1  ;;  %v1744_v30 = vmax.f32 %v723_v13, 0.0  ;;  %v3251_v3 = vpack.c.bf16 %v1873_v38, %v1872_v21  ;;  %v1572_v62 = vmax.f32 %v1105_v31, 0.0  ;;  %v1580_v21 = vmax.f32 %v1111_v18, 0.0  ;;  %v5621_v38 = vld [vmem:[#allocation57_spill] sm:$0xff]  ;;  %v5622_v15 = vld [vmem:[#allocation60_spill] sm:$0xff] }
 0x285   : > { %2105 = vmatmul.mubr.f32.gmra.mrb[250].mxu1 %v1736_v36  ;;  %3247 = vmatprep.subr.bf16.mxu0 %v5552_v44  ;;  %v4925_v2 = vpop.f32.mrb[145].mxu1 }
 0x286   : > { %2109 = vmatprep.mubr.f32.mxu1 %v1745_v59  ;;  %v1875_v59 = vld [vmem:[#allocation7 + $0x398] sm:$0xff] }
 0x287   : > { %2445 = vmatmul.mubr.f32.gmra.mrb[78].mxu0 %v1564_v8  ;;  %v1119_v8 = vadd.f32 %v5619_v11, %v4800_v56  ;;  %v3254_v31 = vpack.c.bf16 %v1875_v59, %v1874_v5  ;;  %v5624_v5 = vld [vmem:[#allocation59_spill] sm:$0xff]  ;;  %v1878_v11 = vld [vmem:[#allocation7 + $0x3b0] sm:$0xff] }
 0x288   : > { %2449 = vmatprep.mubr.f32.mxu0 %v1573_v39  ;;  %3249 = vmatpush1.bf16.msra.mxu0 %v3248_v41  ;;  %v4931_v36 = vpop.f32.mrb[146].mxu1  ;;  %v1117_v39 = vadd.f32 %v5621_v38, %v4808_v10  ;;  %v1123_v59 = vadd.f32 %v5624_v5, %v4808_v10  ;;  %v5625_v38 = vld [vmem:[#allocation62_spill] sm:$0xff]  ;;  %v1880_v5 = vld [vmem:[#allocation7 + $0x3c0] sm:$0xff] }
 0x289   : > { %2110 = vmatmul.mubr.f32.gmra.mrb[252].mxu1 %v1744_v30  ;;  %3250 = vmatprep.subr.bf16.mxu0 %v5552_v44  ;;  %v4936_v13 = vpop.f32.mrb[147].mxu1  ;;  %v1589_v51 = vmax.f32 %v1119_v8, 0.0 }
 0x28a   : > { %2114 = vmatprep.mubr.f32.mxu1 %v1753_v29  ;;  %v1125_v29 = vadd.f32 %v5622_v15, %v4800_v56  ;;  %v1588_v18 = vmax.f32 %v1117_v39, 0.0  ;;  %v1131_v15 = vadd.f32 %v5625_v38, %v4800_v56  ;;  %v1596_v39 = vmax.f32 %v1123_v59, 0.0 }
 0x28b   : > { %2450 = vmatmul.mubr.f32.gmra.mrb[80].mxu0 %v1572_v62  ;;  %v3257_v62 = vpack.c.bf16 %v1877_v33, %v1876_v47  ;;  %v5627_v47 = vld [vmem:[#allocation61_spill] sm:$0xff] }
 0x28c   : > { %2454 = vmatprep.mubr.f32.mxu0 %v1581_v49  ;;  %3252 = vmatpush1.bf16.msra.mxu0 %v3251_v3  ;;  %v4940_v41 = vpop.f32.mrb[148].mxu1  ;;  %v1597_v8 = vmax.f32 %v1125_v29, 0.0  ;;  %v1129_v33 = vadd.f32 %v5627_v47, %v4808_v10  ;;  %v1605_v29 = vmax.f32 %v1131_v15, 0.0  ;;  %v1882_v47 = vld [vmem:[#allocation7 + $0x3d0] sm:$0xff] }
 0x28d   : > { %5620 = vst [vmem:[#allocation16_spill] sm:$0xff] %v4940_v41  ;;  %2115 = vmatmul.mubr.f32.gmra.mrb[254].mxu1 %v1752_v52  ;;  %3253 = vmatprep.subr.bf16.mxu0 %v5552_v44  ;;  %v4945_v30 = vpop.f32.mrb[149].mxu1  ;;  %v1879_v52 = vld [vmem:[#allocation7 + $0x3b8] sm:$0xff]  ;;  %v5629_v41 = vld [vmem:[#allocation64_spill] sm:$0xff] }
 0x28e   : > { %v1137_v38 = vadd.f32 %v5629_v41, %v4800_v56  ;;  %v1604_v59 = vmax.f32 %v1129_v33, 0.0  ;;  %v5635_v33 = vld [vmem:[#allocation65_spill] sm:$0xff] }
 0x28f   : > { %2455 = vmatmul.mubr.f32.gmra.mrb[82].mxu0 %v1580_v21  ;;  %v3260_v21 = vpack.c.bf16 %v1879_v52, %v1878_v11  ;;  %v5631_v11 = vld [vmem:[#allocation63_spill] sm:$0xff] }
 0x290   : > { %2459 = vmatprep.mubr.f32.mxu0 %v1589_v51  ;;  %3255 = vmatpush1.bf16.msra.mxu0 %v3254_v31  ;;  %v4949_v3 = vpop.f32.mrb[150].mxu1  ;;  %v1135_v52 = vadd.f32 %v5631_v11, %v4808_v10  ;;  %v1613_v15 = vmax.f32 %v1137_v38, 0.0  ;;  %v1884_v11 = vld [vmem:[#allocation7 + $0x3e0] sm:$0xff] }
 0x291   : > { %5623 = vst [vmem:[#allocation21_spill] sm:$0xff] %v4949_v3  ;;  %v4953_v49 = vpop.f32.mrb[151].mxu1  ;;  %3256 = vmatprep.subr.bf16.mxu0 %v5552_v44  ;;  %v1881_v3 = vld [vmem:[#allocation7 + $0x3c8] sm:$0xff] }
 0x293   : > { %2460 = vmatmul.mubr.f32.gmra.mrb[84].mxu0 %v1588_v18 }
 0x294   : > { %2464 = vmatprep.mubr.f32.mxu0 %v1597_v8  ;;  %v4958_v31 = vpop.f32.mrb[152].mxu1  ;;  %3258 = vmatpush1.bf16.msra.mxu0 %v3257_v62  ;;  %v3263_v62 = vpack.c.bf16 %v1881_v3, %v1880_v5  ;;  %v1141_v5 = vadd.f32 %v5635_v33, %v4808_v10  ;;  %v1886_v33 = vld [vmem:[#allocation7 + $0x3f0] sm:$0xff] }
 0x295   : > { %5626 = vst [vmem:[#allocation18_spill] sm:$0xff] %v4958_v31  ;;  %v4962_v51 = vpop.f32.mrb[153].mxu1  ;;  %3259 = vmatprep.subr.bf16.mxu0 %v5552_v44  ;;  %v1883_v31 = vld [vmem:[#allocation7 + $0x3d8] sm:$0xff] }
 0x296   : > { %5628 = vst [vmem:[#allocation23_spill] sm:$0xff] %v4962_v51  ;;  %v5633_v51 = vld [vmem:[#allocation66_spill] sm:$0xff]  ;;  %v3266_v3 = vpack.c.bf16 %v1883_v31, %v1882_v47 }
 0x297   : > { %2465 = vmatmul.mubr.f32.gmra.mrb[86].mxu0 %v1596_v39  ;;  %v1143_v41 = vadd.f32 %v5633_v51, %v4800_v56 }
 0x298   : > { %2469 = vmatprep.mubr.f32.mxu0 %v1605_v29  ;;  %v4967_v18 = vpop.f32.mrb[154].mxu1  ;;  %3261 = vmatpush1.bf16.msra.mxu0 %v3260_v21  ;;  %v1612_v21 = vmax.f32 %v1135_v52, 0.0  ;;  %v5639_v52 = vld [vmem:[#allocation67_spill] sm:$0xff] }
 0x299   : > { %5630 = vst [vmem:[#allocation20_spill] sm:$0xff] %v4967_v18  ;;  %v4971_v8 = vpop.f32.mrb[155].mxu1  ;;  %3262 = vmatprep.subr.bf16.mxu0 %v5552_v44  ;;  %v1885_v18 = vld [vmem:[#allocation7 + $0x3e8] sm:$0xff]  ;;  %v1621_v38 = vmax.f32 %v1143_v41, 0.0  ;;  %v1147_v47 = vadd.f32 %v5639_v52, %v4808_v10 }
 0x29a   : > { %5632 = vst [vmem:[#allocation25_spill] sm:$0xff] %v4971_v8  ;;  %v5637_v8 = vld [vmem:[#allocation68_spill] sm:$0xff]  ;;  %v3269_v31 = vpack.c.bf16 %v1885_v18, %v1884_v11 }
 0x29b   : > { %2470 = vmatmul.mubr.f32.gmra.mrb[88].mxu0 %v1604_v59  ;;  %v1149_v51 = vadd.f32 %v5637_v8, %v4800_v56 }
 0x29c   : > { %2474 = vmatprep.mubr.f32.mxu0 %v1613_v15  ;;  %v4976_v39 = vpop.f32.mrb[156].mxu1  ;;  %3264 = vmatpush1.bf16.msra.mxu0 %v3263_v62  ;;  %v1620_v62 = vmax.f32 %v1141_v5, 0.0  ;;  %v5641_v5 = vld [vmem:[#allocation69_spill] sm:$0xff] }
 0x29d   : > { %5634 = vst [vmem:[#allocation22_spill] sm:$0xff] %v4976_v39  ;;  %v4980_v29 = vpop.f32.mrb[157].mxu1  ;;  %3265 = vmatprep.subr.bf16.mxu0 %v5552_v44  ;;  %v1887_v39 = vld [vmem:[#allocation7 + $0x3f8] sm:$0xff]  ;;  %v1629_v41 = vmax.f32 %v1149_v51, 0.0  ;;  %v1153_v11 = vadd.f32 %v5641_v5, %v4808_v10  ;;  %v5642_v51 = vld [vmem:[#allocation72_spill] sm:$0xff] }
 0x29e   : > { %5636 = vst [vmem:[#allocation27_spill] sm:$0xff] %v4980_v29  ;;  %v5640_v29 = vld [vmem:[#allocation70_spill] sm:$0xff]  ;;  %v3272_v18 = vpack.c.bf16 %v1887_v39, %v1886_v33  ;;  %v5643_v39 = vld [vmem:[#allocation71_spill] sm:$0xff] }
 0x29f   : > { %2475 = vmatmul.mubr.f32.gmra.mrb[90].mxu0 %v1612_v21  ;;  %v1155_v8 = vadd.f32 %v5640_v29, %v4800_v56 }
 0x2a0   : > { %2479 = vmatprep.mubr.f32.mxu0 %v1621_v38  ;;  %v4985_v59 = vpop.f32.mrb[158].mxu1  ;;  %3267 = vmatpush1.bf16.msra.mxu0 %v3266_v3  ;;  %v1628_v3 = vmax.f32 %v1147_v47, 0.0 }
 0x2a1   : > { %5638 = vst [vmem:[#allocation24_spill] sm:$0xff] %v4985_v59  ;;  %v4989_v15 = vpop.f32.mrb[159].mxu1  ;;  %3268 = vmatprep.subr.bf16.mxu0 %v5552_v44  ;;  %v1637_v52 = vmax.f32 %v1155_v8, 0.0  ;;  %v1161_v59 = vadd.f32 %v5642_v51, %v4800_v56 }
 0x2a3   : > { %2480 = vmatmul.mubr.f32.gmra.mrb[92].mxu0 %v1620_v62  ;;  %v1636_v62 = vmax.f32 %v1153_v11, 0.0  ;;  %v1645_v33 = vmax.f32 %v1161_v59, 0.0  ;;  %v1173_v11 = vadd.f32 %v4612_v60, %v4800_v56  ;;  %v1177_v60 = vadd.f32 %v4620_v42, %v4808_v10 }
 0x2a4   : > { %2484 = vmatprep.mubr.f32.mxu0 %v1629_v41  ;;  %v4994_v21 = vpop.f32.mrb[160].mxu1  ;;  %3270 = vmatpush1.bf16.msra.mxu0 %v3269_v31  ;;  %v1159_v31 = vadd.f32 %v5643_v39, %v4808_v10  ;;  %v1167_v41 = vadd.f32 %v4599_v46, %v4800_v56  ;;  %v5645_v46 = vld [vmem:[#allocation74_spill] sm:$0xff]  ;;  %v1191_v42 = vadd.f32 %v4646_v35, %v4800_v56 }
 0x2a5   : > { %v4998_v38 = vpop.f32.mrb[161].mxu1  ;;  %3271 = vmatprep.subr.bf16.mxu0 %v5552_v44  ;;  %v1195_v35 = vadd.f32 %v4653_v25, %v4808_v10  ;;  %v1209_v25 = vadd.f32 %v4679_v17, %v4800_v56  ;;  %v1213_v17 = vadd.f32 %v4686_v43, %v4808_v10  ;;  %v1227_v43 = vadd.f32 %v4711_v61, %v4800_v56 }
 0x2a6   : > { %v1644_v8 = vmax.f32 %v1159_v31, 0.0  ;;  %v1661_v31 = vmax.f32 %v1173_v11, 0.0 }
 0x2a7   : > { %2485 = vmatmul.mubr.f32.gmra.mrb[94].mxu0 %v1628_v3  ;;  %v5644_v3 = vld [vmem:[#allocation73_spill] sm:$0xff] }
 0x2a8   : > { %2489 = vmatprep.mubr.f32.mxu0 %v1637_v52  ;;  %v5003_v29 = vpop.f32.mrb[162].mxu1  ;;  %3273 = vmatpush1.bf16.msra.mxu0 %v3272_v18  ;;  %v1165_v5 = vadd.f32 %v5644_v3, %v4808_v10  ;;  %v1653_v18 = vmax.f32 %v1167_v41, 0.0 }
 0x2a9   : > { %v5007_v47 = vpop.f32.mrb[163].mxu1 }
 0x2aa   : > { %v1652_v51 = vmax.f32 %v1165_v5, 0.0 }
 0x2ab   : > { %2490 = vmatmul.mubr.f32.gmra.mrb[96].mxu0 %v1636_v62  ;;  %v1171_v62 = vadd.f32 %v5645_v46, %v4808_v10  ;;  %v1668_v46 = vmax.f32 %v1177_v60, 0.0  ;;  %v1685_v60 = vmax.f32 %v1191_v42, 0.0  ;;  %v1692_v42 = vmax.f32 %v1195_v35, 0.0 }
 0x2ac   : > { %2494 = vmatprep.mubr.f32.mxu0 %v1645_v33  ;;  %v5011_v44 = vpop.f32.mrb[164].mxu1  ;;  %v1179_v33 = vadd.f32 %v4624_v48, %v4800_v56  ;;  %v1183_v48 = vadd.f32 %v4631_v9, %v4808_v10  ;;  %v1197_v9 = vadd.f32 %v4657_v12, %v4800_v56  ;;  %v1201_v12 = vadd.f32 %v4664_v16, %v4808_v10 }
 0x2ad   : > { %v5015_v52 = vpop.f32.mrb[165].mxu1  ;;  %v1660_v3 = vmax.f32 %v1171_v62, 0.0  ;;  %v1709_v35 = vmax.f32 %v1209_v25, 0.0  ;;  %v1215_v16 = vadd.f32 %v4690_v4, %v4800_v56  ;;  %v1716_v25 = vmax.f32 %v1213_v17, 0.0 }
 0x2ae   : > { %v1669_v5 = vmax.f32 %v1179_v33, 0.0  ;;  %v1676_v33 = vmax.f32 %v1183_v48, 0.0  ;;  %v1693_v48 = vmax.f32 %v1197_v9, 0.0  ;;  %v1700_v9 = vmax.f32 %v1201_v12, 0.0 }
 0x2af   : > { %2495 = vmatmul.mubr.f32.gmra.mrb[98].mxu0 %v1644_v8  ;;  %v1717_v12 = vmax.f32 %v1215_v16, 0.0  ;;  %v1219_v4 = vadd.f32 %v4697_v58, %v4808_v10  ;;  %v1733_v17 = vmax.f32 %v1227_v43, 0.0  ;;  %v1233_v58 = vadd.f32 %v4721_v50, %v4800_v56 }
 0x2b0   : > { %2499 = vmatprep.mubr.f32.mxu0 %v1653_v18  ;;  %v5019_v59 = vpop.f32.mrb[166].mxu1  ;;  %v1185_v18 = vadd.f32 %v4635_v40, %v4800_v56  ;;  %v1189_v40 = vadd.f32 %v4642_v22, %v4808_v10  ;;  %v1203_v22 = vadd.f32 %v4668_v1, %v4800_v56  ;;  %v1207_v1 = vadd.f32 %v4675_v28, %v4808_v10 }
 0x2b1   : > { %v5023_v39 = vpop.f32.mrb[167].mxu1  ;;  %v1221_v28 = vadd.f32 %v4701_v63, %v4800_v56  ;;  %v1724_v16 = vmax.f32 %v1219_v4, 0.0  ;;  %v1225_v63 = vadd.f32 %v4707_v53, %v4808_v10  ;;  %v1239_v53 = vadd.f32 %v4731_v14, %v4800_v56 }
 0x2b2   : > { %v1677_v62 = vmax.f32 %v1185_v18, 0.0  ;;  %v1684_v18 = vmax.f32 %v1189_v40, 0.0  ;;  %v1701_v40 = vmax.f32 %v1203_v22, 0.0  ;;  %v1708_v22 = vmax.f32 %v1207_v1, 0.0 }
 0x2b3   : > { %2500 = vmatmul.mubr.f32.gmra.mrb[100].mxu0 %v1652_v51  ;;  %v1725_v1 = vmax.f32 %v1221_v28, 0.0  ;;  %v1732_v61 = vmax.f32 %v1225_v63, 0.0  ;;  %v1237_v63 = vadd.f32 %v4727_v23, %v4808_v10  ;;  %v1243_v23 = vadd.f32 %v4739_v37, %v4808_v10 }
 0x2b4   : > { %2504 = vmatprep.mubr.f32.mxu0 %v1661_v31  ;;  %v5027_v41 = vpop.f32.mrb[168].mxu1 }
 0x2b5   : > { %v5031_v8 = vpop.f32.mrb[169].mxu1 }
 0x2b7   : > { %2505 = vmatmul.mubr.f32.gmra.mrb[102].mxu0 %v1660_v3 }
 0x2b8   : > { %2509 = vmatprep.mubr.f32.mxu0 %v1669_v5  ;;  %v5035_v11 = vpop.f32.mrb[170].mxu1 }
 0x2b9   : > { %v5039_v51 = vpop.f32.mrb[171].mxu1 }
 0x2bb   : > { %2510 = vmatmul.mubr.f32.gmra.mrb[104].mxu0 %v1668_v46 }
 0x2bc   : > { %2514 = vmatprep.mubr.f32.mxu0 %v1677_v62  ;;  %v5043_v31 = vpop.f32.mrb[172].mxu1 }
 0x2bd   : > { %v5047_v3 = vpop.f32.mrb[173].mxu1 }
 0x2bf   : > { %2515 = vmatmul.mubr.f32.gmra.mrb[106].mxu0 %v1676_v33 }
 0x2c0   : > { %2519 = vmatprep.mubr.f32.mxu0 %v1685_v60  ;;  %v5051_v5 = vpop.f32.mrb[174].mxu1 }
 0x2c1   : > { %v5055_v46 = vpop.f32.mrb[175].mxu1 }
 0x2c3   : > { %2520 = vmatmul.mubr.f32.gmra.mrb[108].mxu0 %v1684_v18 }
 0x2c4   : > { %2524 = vmatprep.mubr.f32.mxu0 %v1693_v48  ;;  %v5059_v62 = vpop.f32.mrb[176].mxu1 }
 0x2c5   : > { %v5063_v33 = vpop.f32.mrb[177].mxu1 }
 0x2c7   : > { %2525 = vmatmul.mubr.f32.gmra.mrb[110].mxu0 %v1692_v42 }
 0x2c8   : > { %2529 = vmatprep.mubr.f32.mxu0 %v1701_v40  ;;  %v5067_v60 = vpop.f32.mrb[178].mxu1 }
 0x2c9   : > { %v5071_v18 = vpop.f32.mrb[179].mxu1 }
 0x2cb   : > { %2530 = vmatmul.mubr.f32.gmra.mrb[112].mxu0 %v1700_v9 }
 0x2cc   : > { %2534 = vmatprep.mubr.f32.mxu0 %v1709_v35  ;;  %v5075_v48 = vpop.f32.mrb[180].mxu1 }
 0x2cd   : > { %v5079_v42 = vpop.f32.mrb[181].mxu1 }
 0x2cf   : > { %2535 = vmatmul.mubr.f32.gmra.mrb[114].mxu0 %v1708_v22 }
 0x2d0   : > { %2539 = vmatprep.mubr.f32.mxu0 %v1717_v12  ;;  %v5083_v40 = vpop.f32.mrb[182].mxu1  ;;  %v466_v12 = vsub.s32 7, %v5568_v57 }
 0x2d1   : > { %v5087_v9 = vpop.f32.mrb[183].mxu1 }
 0x2d2   : > { %v5109_v43 = vrot.slane %v4797_v27, %v466_v12 }
 0x2d3   : > { %2540 = vmatmul.mubr.f32.gmra.mrb[116].mxu0 %v1716_v25  ;;  %v1231_v25 = vadd.f32 %v4717_v32, %v4808_v10 }
 0x2d4   : > { %2544 = vmatprep.mubr.f32.mxu0 %v1725_v1  ;;  %v5091_v35 = vpop.f32.mrb[184].mxu1  ;;  %v1741_v1 = vmax.f32 %v1233_v58, 0.0  ;;  %v1245_v58 = vadd.f32 %v4742_v54, %v4800_v56  ;;  %v1316_v14 = vadd.f32 %v4822_v45, %v5109_v43  ;;  %v1322_v54 = vadd.f32 %v4834_v19, %v5109_v43 }
 0x2d5   : > { %v5095_v22 = vpop.f32.mrb[185].mxu1  ;;  %v1328_v37 = vadd.f32 %v4847_v20, %v5109_v43 }
 0x2d7   : > { %2545 = vmatmul.mubr.f32.gmra.mrb[118].mxu0 %v1724_v16  ;;  %v462_v16 = vsub.s32 6, %v5568_v57  ;;  %v1748_v57 = vmax.f32 %v1237_v63, 0.0 }
 0x2d8   : > { %2549 = vmatprep.mubr.f32.mxu0 %v1733_v17  ;;  %v5100_v28 = vpop.f32.mrb[186].mxu1  ;;  %v1740_v17 = vmax.f32 %v1231_v25, 0.0 }
 0x2d9   : > { %5646 = vst [vmem:[#allocation29_spill] sm:$0xff] %v5100_v28  ;;  %v5104_v4 = vpop.f32.mrb[187].mxu1  ;;  %v1749_v28 = vmax.f32 %v1239_v53, 0.0  ;;  %v1511_v53 = vmax.f32 %v1316_v14, 0.0 }
 0x2db   : > { %2550 = vmatmul.mubr.f32.gmra.mrb[120].mxu0 %v1732_v61  ;;  %v5125_v61 = vrot.slane %v4797_v27, %v462_v16  ;;  %v1756_v27 = vmax.f32 %v1243_v23, 0.0  ;;  %v1519_v16 = vmax.f32 %v1322_v54, 0.0 }
 0x2dc   : > { %2554 = vmatprep.mubr.f32.mxu0 %v1741_v1  ;;  %v5111_v50 = vpop.f32.mrb[188].mxu1  ;;  %v1757_v1 = vmax.f32 %v1245_v58, 0.0  ;;  %v1527_v58 = vmax.f32 %v1328_v37, 0.0 }
 0x2dd   : > { %v5116_v32 = vpop.f32.mrb[189].mxu1  ;;  %v1314_v45 = vadd.f32 %v4818_v0, %v5125_v61  ;;  %v1320_v19 = vadd.f32 %v4830_v55, %v5125_v61  ;;  %v1334_v0 = vadd.f32 %v4860_v34, %v5109_v43  ;;  %v1326_v20 = vadd.f32 %v4842_v26, %v5125_v61 }
 0x2de   : > { %v1332_v34 = vadd.f32 %v4855_v24, %v5125_v61 }
 0x2df   : > { %2555 = vmatmul.mubr.f32.gmra.mrb[122].mxu0 %v1740_v17  ;;  %v1510_v17 = vmax.f32 %v1314_v45, 0.0  ;;  %v1526_v54 = vmax.f32 %v1326_v20, 0.0  ;;  %v5650_v20 = vld [vmem:[#allocation47_spill] sm:$0xff] }
 0x2e0   : > { %2559 = vmatprep.mubr.f32.mxu0 %v1749_v28  ;;  %v5122_v12 = vpop.f32.mrb[190].mxu1  ;;  %v1534_v37 = vmax.f32 %v1332_v34, 0.0 }
 0x2e1   : > { %v5129_v25 = vpop.f32.mrb[191].mxu1 }
 0x2e3   : > { %2560 = vmatmul.mubr.f32.gmra.mrb[124].mxu0 %v1748_v57  ;;  %v1518_v57 = vmax.f32 %v1320_v19, 0.0 }
 0x2e4   : > { %v5133_v56 = vpop.f32.mrb[192].mxu1  ;;  %2564 = vmatprep.mubr.f32.mxu0 %v1757_v1  ;;  %v1535_v1 = vmax.f32 %v1334_v0, 0.0 }
 0x2e5   : > { %v1963_v28 = vpop.f32.mrb[193].mxu1 }
 0x2e6   : > { %v5647_v28 = vld [vmem:[#allocation12_spill] sm:$0xff] }
 0x2e7   : > { %2565 = vmatmul.mubr.f32.gmra.mrb[126].mxu0 %v1756_v27 }
 0x2e8   : > { %v5139_v10 = vpop.f32.mrb[194].mxu1  ;;  %2634 = vmatprep.mubr.f32.mxu0 %v1511_v53  ;;  %v1340_v53 = vadd.f32 %v4873_v7, %v5109_v43 }
 0x2e9   : > { %v1968_v63 = vpop.f32.mrb[195].mxu1 }
 0x2ea   : > { %v1543_v27 = vmax.f32 %v1340_v53, 0.0 }
 0x2eb   : > { %2635 = vmatmul.mubr.f32.vlgmr.msra.gmra.mrb[64].mxu0 %v1510_v17  ;;  %v5648_v17 = vld [vmem:[#allocation13_spill] sm:$0xff] }
 0x2ec   : > { %v5145_v14 = vpop.f32.mrb[196].mxu1  ;;  %2639 = vmatprep.mubr.f32.mxu0 %v1519_v16  ;;  %v1346_v16 = vadd.f32 %v5647_v28, %v5109_v43  ;;  %v1338_v7 = vadd.f32 %v5648_v17, %v5125_v61 }
 0x2ed   : > { %v1973_v23 = vpop.f32.mrb[197].mxu1 }
 0x2ee   : > { %v1551_v63 = vmax.f32 %v1346_v16, 0.0  ;;  %v1344_v23 = vadd.f32 %v5650_v20, %v5125_v61  ;;  %v5652_v16 = vld [vmem:[#allocation15_spill] sm:$0xff] }
 0x2ef   : > { %2640 = vmatmul.mubr.f32.gmra.mrb[66].mxu0 %v1518_v57  ;;  %v1542_v57 = vmax.f32 %v1338_v7, 0.0  ;;  %v1364_v7 = vadd.f32 %v4925_v2, %v5109_v43  ;;  %v1362_v2 = vadd.f32 %v4920_v6, %v5125_v61 }
 0x2f0   : > { %v5151_v55 = vpop.f32.mrb[198].mxu1  ;;  %2644 = vmatprep.mubr.f32.mxu0 %v1527_v58  ;;  %v5649_v58 = vld [vmem:[#allocation14_spill] sm:$0xff]  ;;  %v1550_v28 = vmax.f32 %v1344_v23, 0.0  ;;  %v1370_v23 = vadd.f32 %v4936_v13, %v5109_v43  ;;  %v1368_v13 = vadd.f32 %v4931_v36, %v5125_v61 }
 0x2f1   : > { %v1978_v45 = vpop.f32.mrb[199].mxu1  ;;  %v1352_v0 = vadd.f32 %v5649_v58, %v5109_v43 }
 0x2f3   : > { %2645 = vmatmul.mubr.f32.gmra.mrb[68].mxu0 %v1526_v54  ;;  %v5651_v54 = vld [vmem:[#allocation19_spill] sm:$0xff] }
 0x2f4   : > { %v5157_v26 = vpop.f32.mrb[200].mxu1  ;;  %2649 = vmatprep.mubr.f32.mxu0 %v1535_v1  ;;  %v1559_v1 = vmax.f32 %v1352_v0, 0.0  ;;  %v1358_v34 = vadd.f32 %v5651_v54, %v5109_v43  ;;  %v5653_v0 = vld [vmem:[#allocation17_spill] sm:$0xff] }
 0x2f5   : > { %v1983_v19 = vpop.f32.mrb[201].mxu1 }
 0x2f7   : > { %2650 = vmatmul.mubr.f32.gmra.mrb[70].mxu0 %v1534_v37  ;;  %v1350_v37 = vadd.f32 %v5652_v16, %v5125_v61 }
 0x2f8   : > { %v5163_v24 = vpop.f32.mrb[202].mxu1  ;;  %2654 = vmatprep.mubr.f32.mxu0 %v1543_v27  ;;  %v1567_v27 = vmax.f32 %v1358_v34, 0.0 }
 0x2f9   : > { %v1988_v53 = vpop.f32.mrb[203].mxu1  ;;  %v1558_v58 = vmax.f32 %v1350_v37, 0.0  ;;  %v1574_v37 = vmax.f32 %v1362_v2, 0.0  ;;  %v5656_v2 = vld [vmem:[#allocation21_spill] sm:$0xff] }
 0x2fb   : > { %2655 = vmatmul.mubr.f32.gmra.mrb[72].mxu0 %v1542_v57  ;;  %v1356_v57 = vadd.f32 %v5653_v0, %v5125_v61  ;;  %v5654_v0 = vld [vmem:[#allocation16_spill] sm:$0xff] }
 0x2fc   : > { %v5169_v45 = vpop.f32.mrb[204].mxu1  ;;  %2659 = vmatprep.mubr.f32.mxu0 %v1551_v63  ;;  %v1575_v63 = vmax.f32 %v1364_v7, 0.0  ;;  %v1382_v7 = vadd.f32 %v4953_v49, %v5109_v43  ;;  %v1380_v49 = vadd.f32 %v5656_v2, %v5125_v61 }
 0x2fd   : > { %v1993_v17 = vpop.f32.mrb[205].mxu1  ;;  %v1566_v54 = vmax.f32 %v1356_v57, 0.0 }
 0x2ff   : > { %2660 = vmatmul.mubr.f32.gmra.mrb[74].mxu0 %v1550_v28  ;;  %v1376_v28 = vadd.f32 %v4945_v30, %v5109_v43  ;;  %v1374_v30 = vadd.f32 %v5654_v0, %v5125_v61 }
 0x300   : > { %v5175_v19 = vpop.f32.mrb[206].mxu1  ;;  %2664 = vmatprep.mubr.f32.mxu0 %v1559_v1  ;;  %v1583_v1 = vmax.f32 %v1370_v23, 0.0 }
 0x301   : > { %v1998_v20 = vpop.f32.mrb[207].mxu1 }
 0x302   : > { %v1599_v20 = vmax.f32 %v1382_v7, 0.0  ;;  %v5658_v7 = vld [vmem:[#allocation18_spill] sm:$0xff] }
 0x303   : > { %2665 = vmatmul.mubr.f32.gmra.mrb[76].mxu0 %v1558_v58  ;;  %v1582_v58 = vmax.f32 %v1368_v13, 0.0 }
 0x304   : > { %v5181_v53 = vpop.f32.mrb[208].mxu1  ;;  %2669 = vmatprep.mubr.f32.mxu0 %v1567_v27  ;;  %v1591_v27 = vmax.f32 %v1376_v28, 0.0  ;;  %v5657_v28 = vld [vmem:[#allocation25_spill] sm:$0xff] }
 0x305   : > { %v2003_v34 = vpop.f32.mrb[209].mxu1 }
 0x307   : > { %2670 = vmatmul.mubr.f32.gmra.mrb[78].mxu0 %v1566_v54  ;;  %v1590_v54 = vmax.f32 %v1374_v30, 0.0  ;;  %v5659_v30 = vld [vmem:[#allocation27_spill] sm:$0xff] }
 0x308   : > { %v5187_v16 = vpop.f32.mrb[210].mxu1  ;;  %2674 = vmatprep.mubr.f32.mxu0 %v1575_v63  ;;  %v5655_v63 = vld [vmem:[#allocation23_spill] sm:$0xff] }
 0x309   : > { %v2008_v17 = vpop.f32.mrb[211].mxu1  ;;  %v1388_v23 = vadd.f32 %v5655_v63, %v5109_v43 }
 0x30a   : > { %v1598_v17 = vmax.f32 %v1380_v49, 0.0  ;;  %v1406_v49 = vadd.f32 %v4989_v15, %v5109_v43 }
 0x30b   : > { %2675 = vmatmul.mubr.f32.gmra.mrb[80].mxu0 %v1574_v37  ;;  %v1394_v37 = vadd.f32 %v5657_v28, %v5109_v43 }
 0x30c   : > { %v5193_v6 = vpop.f32.mrb[212].mxu1  ;;  %2679 = vmatprep.mubr.f32.mxu0 %v1583_v1  ;;  %v1607_v1 = vmax.f32 %v1388_v23, 0.0 }
 0x30d   : > { %v2013_v57 = vpop.f32.mrb[213].mxu1 }
 0x30e   : > { %v1400_v57 = vadd.f32 %v5659_v30, %v5109_v43 }
 0x30f   : > { %2680 = vmatmul.mubr.f32.gmra.mrb[82].mxu0 %v1582_v58  ;;  %v1386_v58 = vadd.f32 %v5658_v7, %v5125_v61 }
 0x310   : > { %v5199_v36 = vpop.f32.mrb[214].mxu1  ;;  %2684 = vmatprep.mubr.f32.mxu0 %v1591_v27  ;;  %v1615_v27 = vmax.f32 %v1394_v37, 0.0 }
 0x311   : > { %v2018_v34 = vpop.f32.mrb[215].mxu1  ;;  %v1606_v23 = vmax.f32 %v1386_v58, 0.0  ;;  %v1412_v58 = vadd.f32 %v4998_v38, %v5109_v43  ;;  %v1410_v38 = vadd.f32 %v4994_v21, %v5125_v61 }
 0x313   : > { %2685 = vmatmul.mubr.f32.gmra.mrb[84].mxu0 %v1590_v54  ;;  %v5660_v54 = vld [vmem:[#allocation20_spill] sm:$0xff] }
 0x314   : > { %v5205_v13 = vpop.f32.mrb[216].mxu1  ;;  %2689 = vmatprep.mubr.f32.mxu0 %v1599_v20  ;;  %v1392_v2 = vadd.f32 %v5660_v54, %v5125_v61  ;;  %v1623_v20 = vmax.f32 %v1400_v57, 0.0 }
 0x315   : > { %v2023_v0 = vpop.f32.mrb[217].mxu1 }
 0x316   : > { %v1614_v37 = vmax.f32 %v1392_v2, 0.0  ;;  %v1418_v2 = vadd.f32 %v5007_v47, %v5109_v43  ;;  %v1416_v47 = vadd.f32 %v5003_v29, %v5125_v61 }
 0x317   : > { %2690 = vmatmul.mubr.f32.gmra.mrb[86].mxu0 %v1598_v17  ;;  %v5661_v17 = vld [vmem:[#allocation22_spill] sm:$0xff] }
 0x318   : > { %v5211_v63 = vpop.f32.mrb[218].mxu1  ;;  %2694 = vmatprep.mubr.f32.mxu0 %v1607_v1  ;;  %v1398_v7 = vadd.f32 %v5661_v17, %v5125_v61  ;;  %v1631_v1 = vmax.f32 %v1406_v49, 0.0  ;;  %v1424_v17 = vadd.f32 %v5015_v52, %v5109_v43  ;;  %v1422_v52 = vadd.f32 %v5011_v44, %v5125_v61 }
 0x319   : > { %v2028_v34 = vpop.f32.mrb[219].mxu1 }
 0x31a   : > { %v1622_v57 = vmax.f32 %v1398_v7, 0.0 }
 0x31b   : > { %2695 = vmatmul.mubr.f32.gmra.mrb[88].mxu0 %v1606_v23  ;;  %v5662_v23 = vld [vmem:[#allocation24_spill] sm:$0xff] }
 0x31c   : > { %v5217_v28 = vpop.f32.mrb[220].mxu1  ;;  %2699 = vmatprep.mubr.f32.mxu0 %v1615_v27  ;;  %v1404_v15 = vadd.f32 %v5662_v23, %v5125_v61  ;;  %v1639_v27 = vmax.f32 %v1412_v58, 0.0  ;;  %v1646_v23 = vmax.f32 %v1416_v47, 0.0  ;;  %v1448_v47 = vadd.f32 %v5047_v3, %v5109_v43 }
 0x31d   : > { %v2033_v0 = vpop.f32.mrb[221].mxu1  ;;  %v1446_v3 = vadd.f32 %v5043_v31, %v5125_v61 }
 0x31e   : > { %v1630_v49 = vmax.f32 %v1404_v15, 0.0  ;;  %v1638_v0 = vmax.f32 %v1410_v38, 0.0 }
 0x31f   : > { %2700 = vmatmul.mubr.f32.gmra.mrb[90].mxu0 %v1614_v37 }
 0x320   : > { %v5223_v30 = vpop.f32.mrb[222].mxu1  ;;  %2704 = vmatprep.mubr.f32.mxu0 %v1623_v20  ;;  %v1647_v20 = vmax.f32 %v1418_v2, 0.0  ;;  %v1654_v2 = vmax.f32 %v1422_v52, 0.0 }
 0x321   : > { %v2038_v54 = vpop.f32.mrb[223].mxu1 }
 0x323   : > { %2705 = vmatmul.mubr.f32.gmra.mrb[92].mxu0 %v1622_v57  ;;  %v1430_v57 = vadd.f32 %v5023_v39, %v5109_v43  ;;  %v1428_v39 = vadd.f32 %v5019_v59, %v5125_v61 }
 0x324   : > { %v5229_v34 = vpop.f32.mrb[224].mxu1  ;;  %2709 = vmatprep.mubr.f32.mxu0 %v1631_v1  ;;  %v1655_v1 = vmax.f32 %v1424_v17, 0.0 }
 0x325   : > { %v2043_v37 = vpop.f32.mrb[225].mxu1  ;;  %v1663_v54 = vmax.f32 %v1430_v57, 0.0  ;;  %v1687_v57 = vmax.f32 %v1448_v47, 0.0 }
 0x326   : > { %v1442_v37 = vadd.f32 %v5039_v51, %v5109_v43  ;;  %v1440_v51 = vadd.f32 %v5035_v11, %v5125_v61 }
 0x327   : > { %2710 = vmatmul.mubr.f32.gmra.mrb[94].mxu0 %v1630_v49 }
 0x328   : > { %v5235_v7 = vpop.f32.mrb[226].mxu1  ;;  %2714 = vmatprep.mubr.f32.mxu0 %v1639_v27  ;;  %v1436_v27 = vadd.f32 %v5031_v8, %v5109_v43  ;;  %v1434_v8 = vadd.f32 %v5027_v41, %v5125_v61  ;;  %v1678_v52 = vmax.f32 %v1440_v51, 0.0  ;;  %v1478_v51 = vadd.f32 %v5087_v9, %v5109_v43 }
 0x329   : > { %v2048_v58 = vpop.f32.mrb[227].mxu1  ;;  %v1476_v9 = vadd.f32 %v5083_v40, %v5125_v61 }
 0x32a   : > { %v1671_v38 = vmax.f32 %v1436_v27, 0.0  ;;  %v1670_v58 = vmax.f32 %v1434_v8, 0.0  ;;  %v1460_v27 = vadd.f32 %v5063_v33, %v5109_v43  ;;  %v1458_v33 = vadd.f32 %v5059_v62, %v5125_v61 }
 0x32b   : > { %2715 = vmatmul.mubr.f32.gmra.mrb[96].mxu0 %v1638_v0  ;;  %v1679_v0 = vmax.f32 %v1442_v37, 0.0 }
 0x32c   : > { %v5241_v21 = vpop.f32.mrb[228].mxu1  ;;  %2719 = vmatprep.mubr.f32.mxu0 %v1647_v20  ;;  %v1662_v20 = vmax.f32 %v1428_v39, 0.0 }
 0x32d   : > { %v2053_v15 = vpop.f32.mrb[229].mxu1 }
 0x32f   : > { %2720 = vmatmul.mubr.f32.gmra.mrb[98].mxu0 %v1646_v23  ;;  %v1454_v23 = vadd.f32 %v5055_v46, %v5109_v43  ;;  %v1452_v46 = vadd.f32 %v5051_v5, %v5125_v61 }
 0x330   : > { %v5247_v29 = vpop.f32.mrb[230].mxu1  ;;  %2724 = vmatprep.mubr.f32.mxu0 %v1655_v1 }
 0x331   : > { %v2058_v49 = vpop.f32.mrb[231].mxu1  ;;  %v1694_v37 = vmax.f32 %v1452_v46, 0.0 }
 0x332   : > { %v1703_v49 = vmax.f32 %v1460_v27, 0.0  ;;  %v1490_v27 = vadd.f32 %v5104_v4, %v5109_v43 }
 0x333   : > { %2725 = vmatmul.mubr.f32.gmra.mrb[100].mxu0 %v1654_v2  ;;  %v1686_v2 = vmax.f32 %v1446_v3, 0.0 }
 0x334   : > { %v5253_v44 = vpop.f32.mrb[232].mxu1  ;;  %2729 = vmatprep.mubr.f32.mxu0 %v1663_v54  ;;  %v1695_v54 = vmax.f32 %v1454_v23, 0.0  ;;  %v1727_v23 = vmax.f32 %v1478_v51, 0.0  ;;  %v1500_v51 = vadd.f32 %v5122_v12, %v5125_v61 }
 0x335   : > { %v2063_v17 = vpop.f32.mrb[233].mxu1 }
 0x336   : > { %v1472_v17 = vadd.f32 %v5079_v42, %v5109_v43  ;;  %v1470_v42 = vadd.f32 %v5075_v48, %v5125_v61 }
 0x337   : > { %2730 = vmatmul.mubr.f32.gmra.mrb[102].mxu0 %v1662_v20 }
 0x338   : > { %v5259_v59 = vpop.f32.mrb[234].mxu1  ;;  %2734 = vmatprep.mubr.f32.mxu0 %v1671_v38  ;;  %v1466_v38 = vadd.f32 %v5071_v18, %v5109_v43  ;;  %v1464_v18 = vadd.f32 %v5067_v60, %v5125_v61  ;;  %v1718_v3 = vmax.f32 %v1470_v42, 0.0 }
 0x339   : > { %v2068_v1 = vpop.f32.mrb[235].mxu1 }
 0x33a   : > { %v1711_v8 = vmax.f32 %v1466_v38, 0.0  ;;  %v1710_v1 = vmax.f32 %v1464_v18, 0.0 }
 0x33b   : > { %2735 = vmatmul.mubr.f32.gmra.mrb[104].mxu0 %v1670_v58  ;;  %v1719_v58 = vmax.f32 %v1472_v17, 0.0 }
 0x33c   : > { %v5265_v41 = vpop.f32.mrb[236].mxu1  ;;  %2739 = vmatprep.mubr.f32.mxu0 %v1679_v0  ;;  %v1702_v0 = vmax.f32 %v1458_v33, 0.0 }
 0x33d   : > { %v2073_v15 = vpop.f32.mrb[237].mxu1 }
 0x33f   : > { %2740 = vmatmul.mubr.f32.gmra.mrb[106].mxu0 %v1678_v52  ;;  %v1484_v52 = vadd.f32 %v5095_v22, %v5109_v43  ;;  %v1482_v22 = vadd.f32 %v5091_v35, %v5125_v61 }
 0x340   : > { %v5271_v11 = vpop.f32.mrb[238].mxu1  ;;  %2744 = vmatprep.mubr.f32.mxu0 %v1687_v57 }
 0x341   : > { %v2078_v39 = vpop.f32.mrb[239].mxu1  ;;  %v1734_v38 = vmax.f32 %v1482_v22, 0.0 }
 0x342   : > { %v1743_v39 = vmax.f32 %v1490_v27, 0.0 }
 0x343   : > { %2745 = vmatmul.mubr.f32.gmra.mrb[108].mxu0 %v1686_v2  ;;  %v1726_v2 = vmax.f32 %v1476_v9, 0.0 }
 0x344   : > { %v5277_v31 = vpop.f32.mrb[240].mxu1  ;;  %2749 = vmatprep.mubr.f32.mxu0 %v1695_v54  ;;  %v1735_v54 = vmax.f32 %v1484_v52, 0.0 }
 0x345   : > { %v2083_v20 = vpop.f32.mrb[241].mxu1 }
 0x347   : > { %2750 = vmatmul.mubr.f32.gmra.mrb[110].mxu0 %v1694_v37  ;;  %v5663_v37 = vld [vmem:[#allocation29_spill] sm:$0xff] }
 0x348   : > { %v5283_v5 = vpop.f32.mrb[242].mxu1  ;;  %2754 = vmatprep.mubr.f32.mxu0 %v1703_v49  ;;  %v1496_v49 = vadd.f32 %v5116_v32, %v5109_v43  ;;  %v1488_v4 = vadd.f32 %v5663_v37, %v5125_v61  ;;  %v1494_v32 = vadd.f32 %v5111_v50, %v5125_v61  ;;  %v5324_v50 = vld [vmem:[%s5481_s4] ss:$0 sm:$0xff] }
 0x349   : > { %v2088_v47 = vpop.f32.mrb[243].mxu1  ;;  %v1967_v52 = vadd.f32 %v5324_v50, %v5139_v10  ;;  %v1977_v10 = vadd.f32 %v5324_v50, %v5151_v55 }
 0x34a   : > { %v1751_v20 = vmax.f32 %v1496_v49, 0.0  ;;  %v1742_v17 = vmax.f32 %v1488_v4, 0.0 }
 0x34b   : > { %2755 = vmatmul.mubr.f32.gmra.mrb[112].mxu0 %v1702_v0 }
 0x34c   : > { %v5289_v62 = vpop.f32.mrb[244].mxu1  ;;  %2759 = vmatprep.mubr.f32.mxu0 %v1711_v8  ;;  %v1502_v8 = vadd.f32 %v5129_v25, %v5109_v43  ;;  %v1758_v43 = vmax.f32 %v1500_v51, 0.0  ;;  %v1962_v25 = vadd.f32 %v5324_v50, %v5133_v56  ;;  %v1972_v56 = vadd.f32 %v5324_v50, %v5145_v14 }
 0x34d   : > { %v2093_v57 = vpop.f32.mrb[245].mxu1 }
 0x34e   : > { %v1759_v18 = vmax.f32 %v1502_v8, 0.0 }
 0x34f   : > { %2760 = vmatmul.mubr.f32.gmra.mrb[114].mxu0 %v1710_v1 }
 0x350   : > { %v5295_v60 = vpop.f32.mrb[246].mxu1  ;;  %2764 = vmatprep.mubr.f32.mxu0 %v1719_v58  ;;  %v1750_v58 = vmax.f32 %v1494_v32, 0.0 }
 0x351   : > { %v2098_v15 = vpop.f32.mrb[247].mxu1 }
 0x353   : > { %2765 = vmatmul.mubr.f32.gmra.mrb[116].mxu0 %v1718_v3 }
 0x354   : > { %v5301_v48 = vpop.f32.mrb[248].mxu1  ;;  %2769 = vmatprep.mubr.f32.mxu0 %v1727_v23 }
 0x355   : > { %v2103_v46 = vpop.f32.mrb[249].mxu1 }
 0x356   : > { %v1982_v46 = vadd.f32 %v5324_v50, %v5157_v26 }
 0x357   : > { %2770 = vmatmul.mubr.f32.gmra.mrb[118].mxu0 %v1726_v2 }
 0x358   : > { %v5307_v40 = vpop.f32.mrb[250].mxu1  ;;  %2774 = vmatprep.mubr.f32.mxu0 %v1735_v54 }
 0x359   : > { %v2108_v33 = vpop.f32.mrb[251].mxu1 }
 0x35a   : > { %v1992_v33 = vadd.f32 %v5324_v50, %v5169_v45 }
 0x35b   : > { %2775 = vmatmul.mubr.f32.gmra.mrb[120].mxu0 %v1734_v38  ;;  %v1987_v38 = vadd.f32 %v5324_v50, %v5163_v24 }
 0x35c   : > { %v5313_v35 = vpop.f32.mrb[252].mxu1  ;;  %2779 = vmatprep.mubr.f32.mxu0 %v1743_v39 }
 0x35d   : > { %v2113_v0 = vpop.f32.mrb[253].mxu1 }
 0x35f   : > { %2780 = vmatmul.mubr.f32.gmra.mrb[122].mxu0 %v1742_v17  ;;  %v1997_v17 = vadd.f32 %v5324_v50, %v5175_v19 }
 0x360   : > { %v5317_v47 = vpop.f32.mrb[254].mxu1  ;;  %2784 = vmatprep.mubr.f32.mxu0 %v1751_v20 }
 0x361   : > { %v2118_v1 = vpop.f32.mrb[255].mxu1 }
 0x362   : > { %v2007_v1 = vadd.f32 %v5324_v50, %v5187_v16 }
 0x363   : > { %2785 = vmatmul.mubr.f32.gmra.mrb[124].mxu0 %v1750_v58 }
 0x364   : > { %2789 = vmatprep.mubr.f32.mxu0 %v1759_v18  ;;  %v2002_v18 = vadd.f32 %v5324_v50, %v5181_v53 }
 0x367   : > { %2790 = vmatmul.mubr.f32.gmra.mrb[126].mxu0 %v1758_v43 }
 0x3be   : > { %v2636_v42 = vpop.f32.mrb[64].mxu0 }
 0x3bf   : > { %v3275_v57 = vadd.f32 %v2636_v42, %v1962_v25  ;;  %v2638_v23 = vpop.f32.mrb[65].mxu0  ;;  %v2012_v42 = vadd.f32 %v5324_v50, %v5193_v6 }
 0x3c1   : > { %2795 = vst [vmem:[%s5332_s15] sm:$0xff] %v3275_v57 }
 0x3c2   : > { %v2641_v12 = vpop.f32.mrb[66].mxu0 }
 0x3c3   : > { %v3277_v61 = vadd.f32 %v2641_v12, %v1967_v52  ;;  %v2643_v3 = vpop.f32.mrb[67].mxu0  ;;  %v2017_v52 = vadd.f32 %v5324_v50, %v5199_v36 }
 0x3c4   : > { %v2022_v3 = vadd.f32 %v5324_v50, %v5205_v13 }
 0x3c5   : > { %2796 = vst [vmem:[%s5332_s15 + $0x8] sm:$0xff] %v3277_v61 }
 0x3c6   : > { %v2646_v9 = vpop.f32.mrb[68].mxu0 }
 0x3c7   : > { %v3279_v15 = vadd.f32 %v2646_v9, %v1972_v56  ;;  %v2648_v54 = vpop.f32.mrb[69].mxu0 }
 0x3c9   : > { %2797 = vst [vmem:[%s5332_s15 + $0x10] sm:$0xff] %v3279_v15  ;;  %v2027_v15 = vadd.f32 %v5324_v50, %v5211_v63 }
 0x3ca   : > { %v2651_v27 = vpop.f32.mrb[70].mxu0 }
 0x3cb   : > { %v3281_v2 = vadd.f32 %v2651_v27, %v1977_v10  ;;  %v2653_v22 = vpop.f32.mrb[71].mxu0  ;;  %v2032_v27 = vadd.f32 %v5324_v50, %v5217_v28 }
 0x3cd   : > { %2798 = vst [vmem:[%s5332_s15 + $0x18] sm:$0xff] %v3281_v2 }
 0x3ce   : > { %v2656_v39 = vpop.f32.mrb[72].mxu0 }
 0x3cf   : > { %v3283_v14 = vadd.f32 %v2656_v39, %v1982_v46  ;;  %v2658_v49 = vpop.f32.mrb[73].mxu0  ;;  %v2037_v46 = vadd.f32 %v5324_v50, %v5223_v30 }
 0x3d0   : > { %v2042_v49 = vadd.f32 %v5324_v50, %v5229_v34 }
 0x3d1   : > { %2799 = vst [vmem:[%s5332_s15 + $0x20] sm:$0xff] %v3283_v14 }
 0x3d2   : > { %v2661_v37 = vpop.f32.mrb[74].mxu0 }
 0x3d3   : > { %v3285_v55 = vadd.f32 %v2661_v37, %v1987_v38  ;;  %v2663_v4 = vpop.f32.mrb[75].mxu0 }
 0x3d5   : > { %2800 = vst [vmem:[%s5332_s15 + $0x28] sm:$0xff] %v3285_v55  ;;  %v2047_v55 = vadd.f32 %v5324_v50, %v5235_v7 }
 0x3d6   : > { %v2666_v20 = vpop.f32.mrb[76].mxu0 }
 0x3d7   : > { %v3287_v26 = vadd.f32 %v2666_v20, %v1992_v33  ;;  %v2668_v8 = vpop.f32.mrb[77].mxu0  ;;  %v2052_v20 = vadd.f32 %v5324_v50, %v5241_v21 }
 0x3d9   : > { %2801 = vst [vmem:[%s5332_s15 + $0x30] sm:$0xff] %v3287_v26 }
 0x3da   : > { %v2671_v32 = vpop.f32.mrb[78].mxu0 }
 0x3db   : > { %v3289_v24 = vadd.f32 %v2671_v32, %v1997_v17  ;;  %v2673_v0 = vpop.f32.mrb[79].mxu0  ;;  %v2057_v17 = vadd.f32 %v5324_v50, %v5247_v29 }
 0x3dc   : > { %v2062_v0 = vadd.f32 %v5324_v50, %v5253_v44 }
 0x3dd   : > { %2802 = vst [vmem:[%s5332_s15 + $0x38] sm:$0xff] %v3289_v24 }
 0x3de   : > { %v2676_v58 = vpop.f32.mrb[80].mxu0 }
 0x3df   : > { %v3291_v45 = vadd.f32 %v2676_v58, %v2002_v18  ;;  %v2678_v51 = vpop.f32.mrb[81].mxu0 }
 0x3e1   : > { %2803 = vst [vmem:[%s5332_s15 + $0x40] sm:$0xff] %v3291_v45  ;;  %v2067_v45 = vadd.f32 %v5324_v50, %v5259_v59 }
 0x3e2   : > { %v2681_v43 = vpop.f32.mrb[82].mxu0 }
 0x3e3   : > { %v3293_v19 = vadd.f32 %v2681_v43, %v2007_v1  ;;  %v2683_v25 = vpop.f32.mrb[83].mxu0  ;;  %v2072_v43 = vadd.f32 %v5324_v50, %v5265_v41 }
 0x3e5   : > { %2804 = vst [vmem:[%s5332_s15 + $0x48] sm:$0xff] %v3293_v19 }
 0x3e6   : > { %v2686_v57 = vpop.f32.mrb[84].mxu0 }
 0x3e7   : > { %v3295_v53 = vadd.f32 %v2686_v57, %v2012_v42  ;;  %v2688_v23 = vpop.f32.mrb[85].mxu0  ;;  %v2077_v42 = vadd.f32 %v5324_v50, %v5271_v11 }
 0x3e8   : > { %v2082_v23 = vadd.f32 %v5324_v50, %v5277_v31 }
 0x3e9   : > { %2805 = vst [vmem:[%s5332_s15 + $0x50] sm:$0xff] %v3295_v53 }
 0x3ea   : > { %v2691_v12 = vpop.f32.mrb[86].mxu0 }
 0x3eb   : > { %v3297_v16 = vadd.f32 %v2691_v12, %v2017_v52  ;;  %v2693_v61 = vpop.f32.mrb[87].mxu0 }
 0x3ed   : > { %2806 = vst [vmem:[%s5332_s15 + $0x58] sm:$0xff] %v3297_v16  ;;  %v2087_v16 = vadd.f32 %v5324_v50, %v5283_v5 }
 0x3ee   : > { %v2696_v56 = vpop.f32.mrb[88].mxu0 }
 0x3ef   : > { %v3299_v6 = vadd.f32 %v2696_v56, %v2022_v3  ;;  %v2698_v9 = vpop.f32.mrb[89].mxu0  ;;  %v2092_v56 = vadd.f32 %v5324_v50, %v5289_v62 }
 0x3f1   : > { %2807 = vst [vmem:[%s5332_s15 + $0x60] sm:$0xff] %v3299_v6 }
 0x3f2   : > { %v2701_v54 = vpop.f32.mrb[90].mxu0 }
 0x3f3   : > { %v3301_v36 = vadd.f32 %v2701_v54, %v2027_v15  ;;  %v2703_v10 = vpop.f32.mrb[91].mxu0  ;;  %v2097_v15 = vadd.f32 %v5324_v50, %v5295_v60 }
 0x3f4   : > { %v2102_v10 = vadd.f32 %v5324_v50, %v5301_v48 }
 0x3f5   : > { %2808 = vst [vmem:[%s5332_s15 + $0x68] sm:$0xff] %v3301_v36 }
 0x3f6   : > { %v2706_v2 = vpop.f32.mrb[92].mxu0 }
 0x3f7   : > { %v3303_v13 = vadd.f32 %v2706_v2, %v2032_v27  ;;  %v2708_v22 = vpop.f32.mrb[93].mxu0 }
 0x3f9   : > { %2809 = vst [vmem:[%s5332_s15 + $0x70] sm:$0xff] %v3303_v13  ;;  %v2107_v13 = vadd.f32 %v5324_v50, %v5307_v40 }
 0x3fa   : > { %v2711_v39 = vpop.f32.mrb[94].mxu0 }
 0x3fb   : > { %v3305_v63 = vadd.f32 %v2711_v39, %v2037_v46  ;;  %v2713_v14 = vpop.f32.mrb[95].mxu0  ;;  %v2112_v39 = vadd.f32 %v5324_v50, %v5313_v35 }
 0x3fd   : > { %2810 = vst [vmem:[%s5332_s15 + $0x78] sm:$0xff] %v3305_v63 }
 0x3fe   : > { %v2716_v38 = vpop.f32.mrb[96].mxu0 }
 0x3ff   : > { %v3307_v28 = vadd.f32 %v2716_v38, %v2042_v49  ;;  %v2718_v37 = vpop.f32.mrb[97].mxu0  ;;  %v2117_v49 = vadd.f32 %v5324_v50, %v5317_v47 }
 0x401   : > { %2811 = vst [vmem:[%s5332_s15 + $0x80] sm:$0xff] %v3307_v28 }
 0x402   : > { %v2721_v4 = vpop.f32.mrb[98].mxu0 }
 0x403   : > { %v3309_v30 = vadd.f32 %v2721_v4, %v2047_v55  ;;  %v2723_v33 = vpop.f32.mrb[99].mxu0 }
 0x405   : > { %2812 = vst [vmem:[%s5332_s15 + $0x88] sm:$0xff] %v3309_v30 }
 0x406   : > { %v2726_v26 = vpop.f32.mrb[100].mxu0 }
 0x407   : > { %v3311_v34 = vadd.f32 %v2726_v26, %v2052_v20  ;;  %v2728_v8 = vpop.f32.mrb[101].mxu0 }
 0x409   : > { %2813 = vst [vmem:[%s5332_s15 + $0x90] sm:$0xff] %v3311_v34 }
 0x40a   : > { %v2731_v32 = vpop.f32.mrb[102].mxu0 }
 0x40b   : > { %v3313_v7 = vadd.f32 %v2731_v32, %v2057_v17  ;;  %v2733_v24 = vpop.f32.mrb[103].mxu0 }
 0x40d   : > { %2814 = vst [vmem:[%s5332_s15 + $0x98] sm:$0xff] %v3313_v7 }
 0x40e   : > { %v2736_v18 = vpop.f32.mrb[104].mxu0 }
 0x40f   : > { %v3315_v21 = vadd.f32 %v2736_v18, %v2062_v0  ;;  %v2738_v58 = vpop.f32.mrb[105].mxu0 }
 0x411   : > { %2815 = vst [vmem:[%s5332_s15 + $0xa0] sm:$0xff] %v3315_v21 }
 0x412   : > { %v2741_v51 = vpop.f32.mrb[106].mxu0 }
 0x413   : > { %v3317_v29 = vadd.f32 %v2741_v51, %v2067_v45  ;;  %v2743_v1 = vpop.f32.mrb[107].mxu0 }
 0x415   : > { %2816 = vst [vmem:[%s5332_s15 + $0xa8] sm:$0xff] %v3317_v29 }
 0x416   : > { %v2746_v19 = vpop.f32.mrb[108].mxu0 }
 0x417   : > { %v3319_v44 = vadd.f32 %v2746_v19, %v2072_v43  ;;  %v2748_v25 = vpop.f32.mrb[109].mxu0 }
 0x419   : > { %2817 = vst [vmem:[%s5332_s15 + $0xb0] sm:$0xff] %v3319_v44 }
 0x41a   : > { %v2751_v57 = vpop.f32.mrb[110].mxu0 }
 0x41b   : > { %v3321_v59 = vadd.f32 %v2751_v57, %v2077_v42  ;;  %v2753_v53 = vpop.f32.mrb[111].mxu0 }
 0x41d   : > { %2818 = vst [vmem:[%s5332_s15 + $0xb8] sm:$0xff] %v3321_v59 }
 0x41e   : > { %v2756_v52 = vpop.f32.mrb[112].mxu0 }
 0x41f   : > { %v3323_v41 = vadd.f32 %v2756_v52, %v2082_v23  ;;  %v2758_v12 = vpop.f32.mrb[113].mxu0 }
 0x421   : > { %2819 = vst [vmem:[%s5332_s15 + $0xc0] sm:$0xff] %v3323_v41 }
 0x422   : > { %v2761_v61 = vpop.f32.mrb[114].mxu0 }
 0x423   : > { %v3325_v11 = vadd.f32 %v2761_v61, %v2087_v16  ;;  %v2763_v3 = vpop.f32.mrb[115].mxu0 }
 0x425   : > { %2820 = vst [vmem:[%s5332_s15 + $0xc8] sm:$0xff] %v3325_v11 }
 0x426   : > { %v2766_v6 = vpop.f32.mrb[116].mxu0 }
 0x427   : > { %v3327_v31 = vadd.f32 %v2766_v6, %v2092_v56  ;;  %v2768_v9 = vpop.f32.mrb[117].mxu0 }
 0x429   : > { %2821 = vst [vmem:[%s5332_s15 + $0xd0] sm:$0xff] %v3327_v31 }
 0x42a   : > { %v2771_v54 = vpop.f32.mrb[118].mxu0 }
 0x42b   : > { %v3329_v5 = vadd.f32 %v2771_v54, %v2097_v15  ;;  %v2773_v36 = vpop.f32.mrb[119].mxu0 }
 0x42d   : > { %2822 = vst [vmem:[%s5332_s15 + $0xd8] sm:$0xff] %v3329_v5 }
 0x42e   : > { %v2776_v62 = vpop.f32.mrb[120].mxu0 }
 0x42f   : > { %v3331_v27 = vadd.f32 %v2776_v62, %v2102_v10  ;;  %v2778_v2 = vpop.f32.mrb[121].mxu0 }
 0x431   : > { %2823 = vst [vmem:[%s5332_s15 + $0xe0] sm:$0xff] %v3331_v27 }
 0x432   : > { %v2781_v60 = vpop.f32.mrb[122].mxu0 }
 0x433   : > { %v3333_v22 = vadd.f32 %v2781_v60, %v2107_v13  ;;  %v2783_v46 = vpop.f32.mrb[123].mxu0 }
 0x435   : > { %2824 = vst [vmem:[%s5332_s15 + $0xe8] sm:$0xff] %v3333_v22 }
 0x436   : > { %v2786_v48 = vpop.f32.mrb[124].mxu0 }
 0x437   : > { %v3335_v63 = vadd.f32 %v2786_v48, %v2112_v39  ;;  %v2788_v14 = vpop.f32.mrb[125].mxu0 }
 0x439   : > { %2825 = vst [vmem:[%s5332_s15 + $0xf0] sm:$0xff] %v3335_v63 }
 0x43a   : > { %v2791_v40 = vpop.f32.mrb[126].mxu0 }
 0x43b   : > { %v3337_v35 = vadd.f32 %v2791_v40, %v2117_v49  ;;  %v2793_v38 = vpop.f32.mrb[127].mxu0 }
 0x43d   : > { %2826 = vst [vmem:[%s5332_s15 + $0xf8] sm:$0xff] %v3337_v35 }
 0x43e   : > { %3670 = shalt.err (!%p3667_p2)
}
 0x43f   : > { %s3671_s26 = scalar_lea.hbm %s5430_s7, 4096  ;;  %s3675_s10 = scalar_lea.hbm %s5482_s5, 8192 }
 0x440   : > { %p3672_p13 = scmp.ne.s32.totalorder %s5430_s7, %s3671_s26  ;;  %p3676_p4 = scmp.lt.u32.totalorder %s5430_s7, %s5482_s5 }
 0x441   : > { %p3677_p7 = scmp.lt.u32.totalorder %s3675_s10, %s3671_s26  ;;  %p3679_p11 = scmp.lt.u32.totalorder %s3671_s26, %s5430_s7 }
 0x442   : > { %p3673_p6 = pnand %p3672_p13, %p5664_p0 }
 0x443   : > { %p3678_p8 = por %p3677_p7, %p3676_p4 }
 0x444   : > { %p3674_p10 = pneg %p3673_p6 }
 0x445   : > { %p3680_p1 = por %p3679_p11, %p3678_p8 }
 0x447   : > { %p3681_p3 = pnand %p3680_p1, %p3674_p10 }
 0x449   : > { %3684 = shalt.err (!%p3681_p3)
}
 0x44a   : > { %s3739_s9 = smov 128   ;;  %s3740_s11 = smov 8  }
 0x44b   : > { %3476 = dma.vmem_to_hbm [thread:$0]  (%p5664_p0), %s5432_s30, 4096, %s5430_s7, %s2828_s22, %s3739_s9, %s3739_s9, %s3740_s11  }
 0x44c PF: > { %s2856_s23 = sand.u32 1, %s3715_s18   ;;  %p5665_p5 = scmp.ne.s32.totalorder %s5493_s25, 0 }
 0x44d   : > { %p5666_p9 = scmp.ge.s32.totalorder %s3727_s21, 2  ;;  %s2857_s6 = scalar_lea.sflag [#allocation4], %s2856_s23 }
 0x44f   : > { %p3490_p12 = pnand %p5666_p9, %p5665_p5 }
 0x451   : > { %3710 = dma.done.wait (!%p3490_p12), %s2857_s6, 4096  }
 0x452   : > { %3712 = vsyncadd (!%p3490_p12), %s2857_s6, 4294963200  ;;  %p19_p2 = scmp.ge.s32.totalorder %s3884_s16, 4   ;;  %s5667_s18 = smov %s3719_s19 }
 0x453   : > { %s5668_s19 = smov %s3723_s20  ;;  %s5669_s20 = smov %s3893_s27 }
 0x454   : > { %s5670_s21 = smov %s3884_s16  ;;  %21 = sbr.rel (!%p19_p2) target bundleno = 6 (0x6), region = 93 }
 0x45b   :  { %2862 = vsyncpa [#allocation3], 1 }
 0x45c   :  { %2864 = vsyncpa [#allocation3 + $0x1], 1 }
 0x45d   :  { %2865 = vsyncpa [#allocation6], 1 }
 0x45e   :  { %2866 = vsyncpa [#allocation4], 1 }
 0x45f   :  { %2868 = vsyncpa [#allocation4 + $0x1], 1 }

</bundles_post_ra>
